<compile_context>
chip_gen: v7x
topology: tpu7x:2x2x1
jax: 0.10.0
libtpu: 0.0.40
codegen_flags: <defaults>
</compile_context>

<pallas_src>
import jax
import jax.numpy as jnp
from jax.experimental import pallas as pl
from jax.experimental.pallas import tpu as pltpu


# ---------------------------------------------------------------------------
# Kernel 1: conv (im2col-in-VMEM, shifted-window matmuls) + BN stats epilogue
# ---------------------------------------------------------------------------
def _make_conv_stats_kernel(kh, kw, Ho, Wo, Cout, srows):
    def kernel(x_ref, w_ref, out_ref, sum_ref, sq_ref, acc_ref):
        # init resident stats accumulators once (batch axis is "arbitrary")
        @pl.when(pl.program_id(0) == 0)
        def _init():
            sum_ref[...] = jnp.zeros_like(sum_ref)
            sq_ref[...] = jnp.zeros_like(sq_ref)

        # conv as a sum of kh*kw shifted-window matmuls, accumulated in VMEM.
        for t in range(kh * kw):
            dy, dx = divmod(t, kw)
            win = x_ref[0, dy:dy + Ho, dx:dx + Wo, :]          # (Ho, Wo, Cin)
            win2d = win.reshape(Ho * Wo, win.shape[-1])        # aligned retile
            contrib = jnp.dot(win2d, w_ref[t],                 # (Ho*Wo, Cout)
                              preferred_element_type=jnp.float32)
            if t == 0:
                acc_ref[...] = contrib
            else:
                acc_ref[...] += contrib

        acc = acc_ref[...]                                     # (Ho*Wo, Cout)
        out_ref[0] = acc

        # per-Cout partial stats: reduce into (srows, Cout) with VALU adds;
        # the final sublane reduce happens once in scalar glue outside.
        a8 = acc.reshape(Ho * Wo // srows, srows, Cout)
        sum_ref[...] += jnp.sum(a8, axis=0)
        sq_ref[...] += jnp.sum(a8 * a8, axis=0)

    return kernel


def _conv_stats(xp, w3, *, kh, kw, Ho, Wo, srows):
    N, Hp, Wp, Cin = xp.shape
    Cout = w3.shape[-1]
    kernel = _make_conv_stats_kernel(kh, kw, Ho, Wo, Cout, srows)
    return pl.pallas_call(
        kernel,
        out_shape=(
            jax.ShapeDtypeStruct((N, Ho * Wo, Cout), jnp.float32),
            jax.ShapeDtypeStruct((srows, Cout), jnp.float32),
            jax.ShapeDtypeStruct((srows, Cout), jnp.float32),
        ),
        grid=(N,),
        in_specs=[
            pl.BlockSpec((1, Hp, Wp, Cin), lambda n: (n, 0, 0, 0)),
            pl.BlockSpec((kh * kw, Cin, Cout), lambda n: (0, 0, 0)),
        ],
        out_specs=(
            pl.BlockSpec((1, Ho * Wo, Cout), lambda n: (n, 0, 0)),
            pl.BlockSpec((srows, Cout), lambda n: (0, 0)),
            pl.BlockSpec((srows, Cout), lambda n: (0, 0)),
        ),
        scratch_shapes=[pltpu.VMEM((Ho * Wo, Cout), jnp.float32)],
        compiler_params=pltpu.CompilerParams(
            dimension_semantics=("arbitrary",),          # stats accumulate across batch
            vmem_limit_bytes=32 * 1024 * 1024,
        ),
    )(xp, w3)


# ---------------------------------------------------------------------------
# Kernel 2: fused BatchNorm-affine + PReLU on a lane-packed (rows, 128) slab
# ---------------------------------------------------------------------------
def _bn_prelu_kernel(x_ref, scale_ref, shift_ref, alpha_ref, o_ref):
    y = x_ref[...] * scale_ref[...] + shift_ref[...]
    alpha = alpha_ref[0]                      # scalar from SMEM
    o_ref[...] = jnp.where(y > 0, y, alpha * y)


def _bn_prelu(xf, scale_l, shift_l, alpha1, tb):
    R, L = xf.shape
    return pl.pallas_call(
        _bn_prelu_kernel,
        out_shape=jax.ShapeDtypeStruct((R, L), jnp.float32),
        grid=(R // tb,),
        in_specs=[
            pl.BlockSpec((tb, L), lambda i: (i, 0)),
            pl.BlockSpec((1, L), lambda i: (0, 0)),
            pl.BlockSpec((1, L), lambda i: (0, 0)),
            pl.BlockSpec(memory_space=pltpu.MemorySpace.SMEM),   # alpha scalar
        ],
        out_specs=pl.BlockSpec((tb, L), lambda i: (i, 0)),
        compiler_params=pltpu.CompilerParams(
            dimension_semantics=("parallel",),
            vmem_limit_bytes=32 * 1024 * 1024,
        ),
    )(xf, scale_l, shift_l, alpha1)


def _pick_rows_tile(rows, cap_rows=2048):
    # largest tile that is the whole extent, or a multiple of 8 dividing rows.
    if rows <= cap_rows:
        return rows
    t = (cap_rows // 8) * 8
    while t >= 8:
        if rows % t == 0:
            return t
        t -= 8
    return rows  # single full-extent block fallback


# ---------------------------------------------------------------------------
# Forward pass (wrapper: NCHW in / NCHW out, matching the PyTorch module)
# ---------------------------------------------------------------------------
def subpixel_block_forward(x_nchw, w_oihw, gamma, beta, alpha,
                           *, stride=1, padding=1, upscale_factor=2, eps=1e-5):
    if stride != 1:
        # TODO(synk): stride > 1 would need strided window slices in the conv kernel.
        raise NotImplementedError("Pallas path implements stride=1.")

    N, Cin, H, W = x_nchw.shape
    Cout, _, kh, kw = w_oihw.shape
    r = upscale_factor
    rr = r * r
    C2 = Cout // rr
    Ho = (H + 2 * padding - kh) // stride + 1
    Wo = (W + 2 * padding - kw) // stride + 1

    # layout glue: NCHW -> padded NHWC (small input; conv weights -> (taps, Cin, Cout))
    x = jnp.transpose(x_nchw, (0, 2, 3, 1)).astype(jnp.float32)
    xp = jnp.pad(x, ((0, 0), (padding, padding), (padding, padding), (0, 0)))
    w3 = jnp.transpose(w_oihw, (2, 3, 1, 0)).reshape(kh * kw, Cin, Cout).astype(jnp.float32)

    # ---- pallas_call #1: conv + per-Cout batch-stat partials ----
    srows = 8 if (Ho * Wo) % 8 == 0 else 1
    conv_out, sums, sqs = _conv_stats(xp, w3, kh=kh, kw=kw, Ho=Ho, Wo=Wo, srows=srows)

    # scalar glue: per-Cout -> per-C2 (post-shuffle channel) batch statistics
    count = N * Ho * Wo * rr
    sum_c2 = sums.sum(axis=0).reshape(C2, rr).sum(axis=1)
    sq_c2 = sqs.sum(axis=0).reshape(C2, rr).sum(axis=1)
    mean = sum_c2 / count
    var = jnp.maximum(sq_c2 / count - mean * mean, 0.0)       # biased var, clamped
    scale_c2 = gamma.astype(jnp.float32) / jnp.sqrt(var + eps)
    shift_c2 = beta.astype(jnp.float32) - mean * scale_c2
    scale_cout = jnp.repeat(scale_c2, rr)                     # scale_cout[o] = scale_c2[o // rr]
    shift_cout = jnp.repeat(shift_c2, rr)

    # ---- pallas_call #2: fused BN+PReLU on the pre-shuffle layout, lane-packed ----
    M = N * Ho * Wo
    if 128 % Cout == 0 and M % (128 // Cout) == 0:
        pack = 128 // Cout
    else:
        pack = 1
    L = Cout * pack
    R = M // pack
    xf = conv_out.reshape(R, L)                               # free row-major reshape
    scale_l = jnp.tile(scale_cout, pack).reshape(1, L)
    shift_l = jnp.tile(shift_cout, pack).reshape(1, L)
    alpha1 = jnp.reshape(alpha, (1,)).astype(jnp.float32)

    tb = _pick_rows_tile(R)
    y = _bn_prelu(xf, scale_l, shift_l, alpha1, tb)

    # ---- pixel-shuffle + NCHW output as ONE trailing XLA transpose ----
    y = y.reshape(N, Ho, Wo, C2, r, r)
    y = jnp.transpose(y, (0, 3, 1, 4, 2, 5)).reshape(N, C2, Ho * r, Wo * r)
    return y


# ---------------------------------------------------------------------------
# Pure-JAX NCHW reference (sanity check)
# ---------------------------------------------------------------------------
def _reference_forward(x, w, gamma, beta, alpha, *, eps=1e-5, r=2):
    conv = jax.lax.conv_general_dilated(
        x, w, window_strides=(1, 1), padding=((1, 1), (1, 1)),
        dimension_numbers=("NCHW", "OIHW", "NCHW"))
    N, C, H, W = conv.shape
    C2 = C // (r * r)
    ps = conv.reshape(N, C2, r, r, H, W).transpose(0, 1, 4, 2, 5, 3).reshape(N, C2, H * r, W * r)
    mean = ps.mean(axis=(0, 2, 3), keepdims=True)
    var = ps.var(axis=(0, 2, 3), keepdims=True)
    y = (ps - mean) / jnp.sqrt(var + eps) * gamma.reshape(1, -1, 1, 1) + beta.reshape(1, -1, 1, 1)
    return jnp.where(y > 0, y, alpha * y)


if __name__ == "__main__":
    # _SubpixelBlock(in_channels=4, out_channels=16, kernel_size=3, stride=1,
    #                padding=1, bias=False, upscale_factor=2)
    N, Cin, H, W = 2, 4, 16, 16
    Cout, k, r = 16, 3, 2

    key = jax.random.PRNGKey(0)
    kx, kw_ = jax.random.split(key)
    x = jax.random.normal(kx, (N, Cin, H, W), dtype=jnp.float32)
    w = jax.random.normal(kw_, (Cout, Cin, k, k), dtype=jnp.float32) * 0.1
    gamma = jnp.ones((Cin,), dtype=jnp.float32)    # BatchNorm2d(in_channels) defaults
    beta = jnp.zeros((Cin,), dtype=jnp.float32)
    alpha = jnp.asarray(0.25, dtype=jnp.float32)   # PReLU default init

    fwd = jax.jit(lambda xx, ww, g, b, a: subpixel_block_forward(
        xx, ww, g, b, a, stride=1, padding=1, upscale_factor=r))
    out = jax.block_until_ready(fwd(x, w, gamma, beta, alpha))

    ref = jax.block_until_ready(_reference_forward(x, w, gamma, beta, alpha, r=r))
    assert out.shape == (N, Cin, H * r, W * r), out.shape
    assert jnp.allclose(out, ref, rtol=5e-2, atol=5e-2), float(jnp.max(jnp.abs(out - ref)))

    print("KERNEL_OK")
</pallas_src>

<mosaic_0001>
module attributes {stable_mosaic.version = 11 : i64} {
  func.func @kernel(%arg0: i32, %arg1: memref<1x18x18x4xf32, #tpu.memory_space<vmem>>, %arg2: memref<9x4x16xf32, #tpu.memory_space<vmem>>, %arg3: memref<1x256x16xf32, #tpu.memory_space<vmem>>, %arg4: memref<8x16xf32, #tpu.memory_space<vmem>>, %arg5: memref<8x16xf32, #tpu.memory_space<vmem>>, %arg6: memref<256x16xf32, #tpu.memory_space<vmem>>) attributes {dimension_semantics = [#tpu.dimension_semantics<arbitrary>], iteration_bounds = array<i64: 2>, scalar_prefetch = 0 : i64, scratch_operands = 1 : i64, tpu.core_type = #tpu.core_type<tc>, window_params = [{transform_indices = @transform_0, window_bounds = array<i64: 1, 18, 18, 4>}, {pipeline_mode = #tpu.pipeline_mode<synchronous>, transform_indices = @transform_1, window_bounds = array<i64: 9, 4, 16>}, {transform_indices = @transform_2, window_bounds = array<i64: 1, 256, 16>}, {pipeline_mode = #tpu.pipeline_mode<synchronous>, transform_indices = @transform_3, window_bounds = array<i64: 8, 16>}, {pipeline_mode = #tpu.pipeline_mode<synchronous>, transform_indices = @transform_4, window_bounds = array<i64: 8, 16>}]} {
    %c0_i32 = arith.constant 0 : i32
    %0 = arith.cmpi eq, %arg0, %c0_i32 : i32
    %1 = arith.extui %0 : i1 to i32
    %c0_i32_0 = arith.constant 0 : i32
    %2 = arith.cmpi ne, %1, %c0_i32_0 : i32
    scf.if %2 {
      %cst_112 = arith.constant 0.000000e+00 : f32
      %96 = vector.broadcast %cst_112 : f32 to vector<8x16xf32>
      %c0_113 = arith.constant 0 : index
      %c0_114 = arith.constant 0 : index
      %97 = vector.load %arg4[%c0_113, %c0_114] : memref<8x16xf32, #tpu.memory_space<vmem>>, vector<8x16xf32>
      tpu.vector_store %arg4[%c0_113, %c0_114], %96 {strides = array<i32>} : memref<8x16xf32, #tpu.memory_space<vmem>>, vector<8x16xf32>,
      %cst_115 = arith.constant 0.000000e+00 : f32
      %98 = vector.broadcast %cst_115 : f32 to vector<8x16xf32>
      %c0_116 = arith.constant 0 : index
      %c0_117 = arith.constant 0 : index
      %99 = vector.load %arg5[%c0_116, %c0_117] : memref<8x16xf32, #tpu.memory_space<vmem>>, vector<8x16xf32>
      tpu.vector_store %arg5[%c0_116, %c0_117], %98 {strides = array<i32>} : memref<8x16xf32, #tpu.memory_space<vmem>>, vector<8x16xf32>,
    } else {
    }
    %c0 = arith.constant 0 : index
    %c0_1 = arith.constant 0 : index
    %c0_2 = arith.constant 0 : index
    %c0_3 = arith.constant 0 : index
    %3 = vector.load %arg1[%c0, %c0_1, %c0_2, %c0_3] : memref<1x18x18x4xf32, #tpu.memory_space<vmem>>, vector<1x16x16x4xf32>
    %4 = vector.shape_cast %3 : vector<1x16x16x4xf32> to vector<16x16x4xf32>
    %5 = vector.shape_cast %4 : vector<16x16x4xf32> to vector<256x4xf32>
    %c0_4 = arith.constant 0 : index
    %c0_5 = arith.constant 0 : index
    %c0_6 = arith.constant 0 : index
    %6 = vector.load %arg2[%c0_4, %c0_5, %c0_6] : memref<9x4x16xf32, #tpu.memory_space<vmem>>, vector<1x4x16xf32>
    %7 = vector.shape_cast %6 : vector<1x4x16xf32> to vector<4x16xf32>
    %cst = arith.constant dense<0.000000e+00> : vector<256x16xf32>
    %8 = tpu.matmul %5, %7, %cst {dimension_numbers = #tpu.dot_dimension_numbers<[1], [0], [0], [1], [0, 0, 1, 1], [], []>} : vector<256x4xf32>, vector<4x16xf32>, vector<256x16xf32> -> vector<256x16xf32>
    %c0_7 = arith.constant 0 : index
    %c0_8 = arith.constant 0 : index
    %9 = vector.load %arg6[%c0_7, %c0_8] : memref<256x16xf32, #tpu.memory_space<vmem>>, vector<256x16xf32>
    tpu.vector_store %arg6[%c0_7, %c0_8], %8 {strides = array<i32>} : memref<256x16xf32, #tpu.memory_space<vmem>>, vector<256x16xf32>,
    %c0_9 = arith.constant 0 : index
    %c0_10 = arith.constant 0 : index
    %c1 = arith.constant 1 : index
    %c0_11 = arith.constant 0 : index
    %10 = vector.load %arg1[%c0_9, %c0_10, %c1, %c0_11] : memref<1x18x18x4xf32, #tpu.memory_space<vmem>>, vector<1x16x16x4xf32>
    %11 = vector.shape_cast %10 : vector<1x16x16x4xf32> to vector<16x16x4xf32>
    %12 = vector.shape_cast %11 : vector<16x16x4xf32> to vector<256x4xf32>
    %c1_12 = arith.constant 1 : index
    %c0_13 = arith.constant 0 : index
    %c0_14 = arith.constant 0 : index
    %13 = vector.load %arg2[%c1_12, %c0_13, %c0_14] : memref<9x4x16xf32, #tpu.memory_space<vmem>>, vector<1x4x16xf32>
    %14 = vector.shape_cast %13 : vector<1x4x16xf32> to vector<4x16xf32>
    %cst_15 = arith.constant dense<0.000000e+00> : vector<256x16xf32>
    %15 = tpu.matmul %12, %14, %cst_15 {dimension_numbers = #tpu.dot_dimension_numbers<[1], [0], [0], [1], [0, 0, 1, 1], [], []>} : vector<256x4xf32>, vector<4x16xf32>, vector<256x16xf32> -> vector<256x16xf32>
    %c0_16 = arith.constant 0 : index
    %c0_17 = arith.constant 0 : index
    %16 = vector.load %arg6[%c0_16, %c0_17] : memref<256x16xf32, #tpu.memory_space<vmem>>, vector<256x16xf32>
    %17 = arith.addf %16, %15 : vector<256x16xf32>
    %c0_18 = arith.constant 0 : index
    %c0_19 = arith.constant 0 : index
    %18 = vector.load %arg6[%c0_18, %c0_19] : memref<256x16xf32, #tpu.memory_space<vmem>>, vector<256x16xf32>
    tpu.vector_store %arg6[%c0_18, %c0_19], %17 {strides = array<i32>} : memref<256x16xf32, #tpu.memory_space<vmem>>, vector<256x16xf32>,
    %c0_20 = arith.constant 0 : index
    %c0_21 = arith.constant 0 : index
    %c2 = arith.constant 2 : index
    %c0_22 = arith.constant 0 : index
    %19 = vector.load %arg1[%c0_20, %c0_21, %c2, %c0_22] : memref<1x18x18x4xf32, #tpu.memory_space<vmem>>, vector<1x16x16x4xf32>
    %20 = vector.shape_cast %19 : vector<1x16x16x4xf32> to vector<16x16x4xf32>
    %21 = vector.shape_cast %20 : vector<16x16x4xf32> to vector<256x4xf32>
    %c2_23 = arith.constant 2 : index
    %c0_24 = arith.constant 0 : index
    %c0_25 = arith.constant 0 : index
    %22 = vector.load %arg2[%c2_23, %c0_24, %c0_25] : memref<9x4x16xf32, #tpu.memory_space<vmem>>, vector<1x4x16xf32>
    %23 = vector.shape_cast %22 : vector<1x4x16xf32> to vector<4x16xf32>
    %cst_26 = arith.constant dense<0.000000e+00> : vector<256x16xf32>
    %24 = tpu.matmul %21, %23, %cst_26 {dimension_numbers = #tpu.dot_dimension_numbers<[1], [0], [0], [1], [0, 0, 1, 1], [], []>} : vector<256x4xf32>, vector<4x16xf32>, vector<256x16xf32> -> vector<256x16xf32>
    %c0_27 = arith.constant 0 : index
    %c0_28 = arith.constant 0 : index
    %25 = vector.load %arg6[%c0_27, %c0_28] : memref<256x16xf32, #tpu.memory_space<vmem>>, vector<256x16xf32>
    %26 = arith.addf %25, %24 : vector<256x16xf32>
    %c0_29 = arith.constant 0 : index
    %c0_30 = arith.constant 0 : index
    %27 = vector.load %arg6[%c0_29, %c0_30] : memref<256x16xf32, #tpu.memory_space<vmem>>, vector<256x16xf32>
    tpu.vector_store %arg6[%c0_29, %c0_30], %26 {strides = array<i32>} : memref<256x16xf32, #tpu.memory_space<vmem>>, vector<256x16xf32>,
    %c0_31 = arith.constant 0 : index
    %c1_32 = arith.constant 1 : index
    %c0_33 = arith.constant 0 : index
    %c0_34 = arith.constant 0 : index
    %28 = vector.load %arg1[%c0_31, %c1_32, %c0_33, %c0_34] : memref<1x18x18x4xf32, #tpu.memory_space<vmem>>, vector<1x16x16x4xf32>
    %29 = vector.shape_cast %28 : vector<1x16x16x4xf32> to vector<16x16x4xf32>
    %30 = vector.shape_cast %29 : vector<16x16x4xf32> to vector<256x4xf32>
    %c3 = arith.constant 3 : index
    %c0_35 = arith.constant 0 : index
    %c0_36 = arith.constant 0 : index
    %31 = vector.load %arg2[%c3, %c0_35, %c0_36] : memref<9x4x16xf32, #tpu.memory_space<vmem>>, vector<1x4x16xf32>
    %32 = vector.shape_cast %31 : vector<1x4x16xf32> to vector<4x16xf32>
    %cst_37 = arith.constant dense<0.000000e+00> : vector<256x16xf32>
    %33 = tpu.matmul %30, %32, %cst_37 {dimension_numbers = #tpu.dot_dimension_numbers<[1], [0], [0], [1], [0, 0, 1, 1], [], []>} : vector<256x4xf32>, vector<4x16xf32>, vector<256x16xf32> -> vector<256x16xf32>
    %c0_38 = arith.constant 0 : index
    %c0_39 = arith.constant 0 : index
    %34 = vector.load %arg6[%c0_38, %c0_39] : memref<256x16xf32, #tpu.memory_space<vmem>>, vector<256x16xf32>
    %35 = arith.addf %34, %33 : vector<256x16xf32>
    %c0_40 = arith.constant 0 : index
    %c0_41 = arith.constant 0 : index
    %36 = vector.load %arg6[%c0_40, %c0_41] : memref<256x16xf32, #tpu.memory_space<vmem>>, vector<256x16xf32>
    tpu.vector_store %arg6[%c0_40, %c0_41], %35 {strides = array<i32>} : memref<256x16xf32, #tpu.memory_space<vmem>>, vector<256x16xf32>,
    %c0_42 = arith.constant 0 : index
    %c1_43 = arith.constant 1 : index
    %c1_44 = arith.constant 1 : index
    %c0_45 = arith.constant 0 : index
    %37 = vector.load %arg1[%c0_42, %c1_43, %c1_44, %c0_45] : memref<1x18x18x4xf32, #tpu.memory_space<vmem>>, vector<1x16x16x4xf32>
    %38 = vector.shape_cast %37 : vector<1x16x16x4xf32> to vector<16x16x4xf32>
    %39 = vector.shape_cast %38 : vector<16x16x4xf32> to vector<256x4xf32>
    %c4 = arith.constant 4 : index
    %c0_46 = arith.constant 0 : index
    %c0_47 = arith.constant 0 : index
    %40 = vector.load %arg2[%c4, %c0_46, %c0_47] : memref<9x4x16xf32, #tpu.memory_space<vmem>>, vector<1x4x16xf32>
    %41 = vector.shape_cast %40 : vector<1x4x16xf32> to vector<4x16xf32>
    %cst_48 = arith.constant dense<0.000000e+00> : vector<256x16xf32>
    %42 = tpu.matmul %39, %41, %cst_48 {dimension_numbers = #tpu.dot_dimension_numbers<[1], [0], [0], [1], [0, 0, 1, 1], [], []>} : vector<256x4xf32>, vector<4x16xf32>, vector<256x16xf32> -> vector<256x16xf32>
    %c0_49 = arith.constant 0 : index
    %c0_50 = arith.constant 0 : index
    %43 = vector.load %arg6[%c0_49, %c0_50] : memref<256x16xf32, #tpu.memory_space<vmem>>, vector<256x16xf32>
    %44 = arith.addf %43, %42 : vector<256x16xf32>
    %c0_51 = arith.constant 0 : index
    %c0_52 = arith.constant 0 : index
    %45 = vector.load %arg6[%c0_51, %c0_52] : memref<256x16xf32, #tpu.memory_space<vmem>>, vector<256x16xf32>
    tpu.vector_store %arg6[%c0_51, %c0_52], %44 {strides = array<i32>} : memref<256x16xf32, #tpu.memory_space<vmem>>, vector<256x16xf32>,
    %c0_53 = arith.constant 0 : index
    %c1_54 = arith.constant 1 : index
    %c2_55 = arith.constant 2 : index
    %c0_56 = arith.constant 0 : index
    %46 = vector.load %arg1[%c0_53, %c1_54, %c2_55, %c0_56] : memref<1x18x18x4xf32, #tpu.memory_space<vmem>>, vector<1x16x16x4xf32>
    %47 = vector.shape_cast %46 : vector<1x16x16x4xf32> to vector<16x16x4xf32>
    %48 = vector.shape_cast %47 : vector<16x16x4xf32> to vector<256x4xf32>
    %c5 = arith.constant 5 : index
    %c0_57 = arith.constant 0 : index
    %c0_58 = arith.constant 0 : index
    %49 = vector.load %arg2[%c5, %c0_57, %c0_58] : memref<9x4x16xf32, #tpu.memory_space<vmem>>, vector<1x4x16xf32>
    %50 = vector.shape_cast %49 : vector<1x4x16xf32> to vector<4x16xf32>
    %cst_59 = arith.constant dense<0.000000e+00> : vector<256x16xf32>
    %51 = tpu.matmul %48, %50, %cst_59 {dimension_numbers = #tpu.dot_dimension_numbers<[1], [0], [0], [1], [0, 0, 1, 1], [], []>} : vector<256x4xf32>, vector<4x16xf32>, vector<256x16xf32> -> vector<256x16xf32>
    %c0_60 = arith.constant 0 : index
    %c0_61 = arith.constant 0 : index
    %52 = vector.load %arg6[%c0_60, %c0_61] : memref<256x16xf32, #tpu.memory_space<vmem>>, vector<256x16xf32>
    %53 = arith.addf %52, %51 : vector<256x16xf32>
    %c0_62 = arith.constant 0 : index
    %c0_63 = arith.constant 0 : index
    %54 = vector.load %arg6[%c0_62, %c0_63] : memref<256x16xf32, #tpu.memory_space<vmem>>, vector<256x16xf32>
    tpu.vector_store %arg6[%c0_62, %c0_63], %53 {strides = array<i32>} : memref<256x16xf32, #tpu.memory_space<vmem>>, vector<256x16xf32>,
    %c0_64 = arith.constant 0 : index
    %c2_65 = arith.constant 2 : index
    %c0_66 = arith.constant 0 : index
    %c0_67 = arith.constant 0 : index
    %55 = vector.load %arg1[%c0_64, %c2_65, %c0_66, %c0_67] : memref<1x18x18x4xf32, #tpu.memory_space<vmem>>, vector<1x16x16x4xf32>
    %56 = vector.shape_cast %55 : vector<1x16x16x4xf32> to vector<16x16x4xf32>
    %57 = vector.shape_cast %56 : vector<16x16x4xf32> to vector<256x4xf32>
    %c6 = arith.constant 6 : index
    %c0_68 = arith.constant 0 : index
    %c0_69 = arith.constant 0 : index
    %58 = vector.load %arg2[%c6, %c0_68, %c0_69] : memref<9x4x16xf32, #tpu.memory_space<vmem>>, vector<1x4x16xf32>
    %59 = vector.shape_cast %58 : vector<1x4x16xf32> to vector<4x16xf32>
    %cst_70 = arith.constant dense<0.000000e+00> : vector<256x16xf32>
    %60 = tpu.matmul %57, %59, %cst_70 {dimension_numbers = #tpu.dot_dimension_numbers<[1], [0], [0], [1], [0, 0, 1, 1], [], []>} : vector<256x4xf32>, vector<4x16xf32>, vector<256x16xf32> -> vector<256x16xf32>
    %c0_71 = arith.constant 0 : index
    %c0_72 = arith.constant 0 : index
    %61 = vector.load %arg6[%c0_71, %c0_72] : memref<256x16xf32, #tpu.memory_space<vmem>>, vector<256x16xf32>
    %62 = arith.addf %61, %60 : vector<256x16xf32>
    %c0_73 = arith.constant 0 : index
    %c0_74 = arith.constant 0 : index
    %63 = vector.load %arg6[%c0_73, %c0_74] : memref<256x16xf32, #tpu.memory_space<vmem>>, vector<256x16xf32>
    tpu.vector_store %arg6[%c0_73, %c0_74], %62 {strides = array<i32>} : memref<256x16xf32, #tpu.memory_space<vmem>>, vector<256x16xf32>,
    %c0_75 = arith.constant 0 : index
    %c2_76 = arith.constant 2 : index
    %c1_77 = arith.constant 1 : index
    %c0_78 = arith.constant 0 : index
    %64 = vector.load %arg1[%c0_75, %c2_76, %c1_77, %c0_78] : memref<1x18x18x4xf32, #tpu.memory_space<vmem>>, vector<1x16x16x4xf32>
    %65 = vector.shape_cast %64 : vector<1x16x16x4xf32> to vector<16x16x4xf32>
    %66 = vector.shape_cast %65 : vector<16x16x4xf32> to vector<256x4xf32>
    %c7 = arith.constant 7 : index
    %c0_79 = arith.constant 0 : index
    %c0_80 = arith.constant 0 : index
    %67 = vector.load %arg2[%c7, %c0_79, %c0_80] : memref<9x4x16xf32, #tpu.memory_space<vmem>>, vector<1x4x16xf32>
    %68 = vector.shape_cast %67 : vector<1x4x16xf32> to vector<4x16xf32>
    %cst_81 = arith.constant dense<0.000000e+00> : vector<256x16xf32>
    %69 = tpu.matmul %66, %68, %cst_81 {dimension_numbers = #tpu.dot_dimension_numbers<[1], [0], [0], [1], [0, 0, 1, 1], [], []>} : vector<256x4xf32>, vector<4x16xf32>, vector<256x16xf32> -> vector<256x16xf32>
    %c0_82 = arith.constant 0 : index
    %c0_83 = arith.constant 0 : index
    %70 = vector.load %arg6[%c0_82, %c0_83] : memref<256x16xf32, #tpu.memory_space<vmem>>, vector<256x16xf32>
    %71 = arith.addf %70, %69 : vector<256x16xf32>
    %c0_84 = arith.constant 0 : index
    %c0_85 = arith.constant 0 : index
    %72 = vector.load %arg6[%c0_84, %c0_85] : memref<256x16xf32, #tpu.memory_space<vmem>>, vector<256x16xf32>
    tpu.vector_store %arg6[%c0_84, %c0_85], %71 {strides = array<i32>} : memref<256x16xf32, #tpu.memory_space<vmem>>, vector<256x16xf32>,
    %c0_86 = arith.constant 0 : index
    %c2_87 = arith.constant 2 : index
    %c2_88 = arith.constant 2 : index
    %c0_89 = arith.constant 0 : index
    %73 = vector.load %arg1[%c0_86, %c2_87, %c2_88, %c0_89] : memref<1x18x18x4xf32, #tpu.memory_space<vmem>>, vector<1x16x16x4xf32>
    %74 = vector.shape_cast %73 : vector<1x16x16x4xf32> to vector<16x16x4xf32>
    %75 = vector.shape_cast %74 : vector<16x16x4xf32> to vector<256x4xf32>
    %c8 = arith.constant 8 : index
    %c0_90 = arith.constant 0 : index
    %c0_91 = arith.constant 0 : index
    %76 = vector.load %arg2[%c8, %c0_90, %c0_91] : memref<9x4x16xf32, #tpu.memory_space<vmem>>, vector<1x4x16xf32>
    %77 = vector.shape_cast %76 : vector<1x4x16xf32> to vector<4x16xf32>
    %cst_92 = arith.constant dense<0.000000e+00> : vector<256x16xf32>
    %78 = tpu.matmul %75, %77, %cst_92 {dimension_numbers = #tpu.dot_dimension_numbers<[1], [0], [0], [1], [0, 0, 1, 1], [], []>} : vector<256x4xf32>, vector<4x16xf32>, vector<256x16xf32> -> vector<256x16xf32>
    %c0_93 = arith.constant 0 : index
    %c0_94 = arith.constant 0 : index
    %79 = vector.load %arg6[%c0_93, %c0_94] : memref<256x16xf32, #tpu.memory_space<vmem>>, vector<256x16xf32>
    %80 = arith.addf %79, %78 : vector<256x16xf32>
    %c0_95 = arith.constant 0 : index
    %c0_96 = arith.constant 0 : index
    %81 = vector.load %arg6[%c0_95, %c0_96] : memref<256x16xf32, #tpu.memory_space<vmem>>, vector<256x16xf32>
    tpu.vector_store %arg6[%c0_95, %c0_96], %80 {strides = array<i32>} : memref<256x16xf32, #tpu.memory_space<vmem>>, vector<256x16xf32>,
    %c0_97 = arith.constant 0 : index
    %c0_98 = arith.constant 0 : index
    %82 = vector.load %arg6[%c0_97, %c0_98] : memref<256x16xf32, #tpu.memory_space<vmem>>, vector<256x16xf32>
    %c0_99 = arith.constant 0 : index
    %c0_100 = arith.constant 0 : index
    %c0_101 = arith.constant 0 : index
    %83 = vector.load %arg3[%c0_99, %c0_100, %c0_101] : memref<1x256x16xf32, #tpu.memory_space<vmem>>, vector<1x256x16xf32>
    %84 = vector.shape_cast %83 : vector<1x256x16xf32> to vector<256x16xf32>
    %85 = vector.shape_cast %82 : vector<256x16xf32> to vector<1x256x16xf32>
    tpu.vector_store %arg3[%c0_99, %c0_100, %c0_101], %85 {strides = array<i32>} : memref<1x256x16xf32, #tpu.memory_space<vmem>>, vector<1x256x16xf32>,
    %86 = vector.shape_cast %82 : vector<256x16xf32> to vector<32x8x16xf32>
    %c0_102 = arith.constant 0 : index
    %c0_103 = arith.constant 0 : index
    %87 = vector.load %arg4[%c0_102, %c0_103] : memref<8x16xf32, #tpu.memory_space<vmem>>, vector<8x16xf32>
    %cst_104 = arith.constant dense<0.000000e+00> : vector<8x16xf32>
    %88 = vector.multi_reduction <add>, %86, %cst_104 [0] : vector<32x8x16xf32> to vector<8x16xf32>
    %89 = arith.addf %87, %88 : vector<8x16xf32>
    %c0_105 = arith.constant 0 : index
    %c0_106 = arith.constant 0 : index
    %90 = vector.load %arg4[%c0_105, %c0_106] : memref<8x16xf32, #tpu.memory_space<vmem>>, vector<8x16xf32>
    tpu.vector_store %arg4[%c0_105, %c0_106], %89 {strides = array<i32>} : memref<8x16xf32, #tpu.memory_space<vmem>>, vector<8x16xf32>,
    %c0_107 = arith.constant 0 : index
    %c0_108 = arith.constant 0 : index
    %91 = vector.load %arg5[%c0_107, %c0_108] : memref<8x16xf32, #tpu.memory_space<vmem>>, vector<8x16xf32>
    %92 = arith.mulf %86, %86 : vector<32x8x16xf32>
    %cst_109 = arith.constant dense<0.000000e+00> : vector<8x16xf32>
    %93 = vector.multi_reduction <add>, %92, %cst_109 [0] : vector<32x8x16xf32> to vector<8x16xf32>
    %94 = arith.addf %91, %93 : vector<8x16xf32>
    %c0_110 = arith.constant 0 : index
    %c0_111 = arith.constant 0 : index
    %95 = vector.load %arg5[%c0_110, %c0_111] : memref<8x16xf32, #tpu.memory_space<vmem>>, vector<8x16xf32>
    tpu.vector_store %arg5[%c0_110, %c0_111], %94 {strides = array<i32>} : memref<8x16xf32, #tpu.memory_space<vmem>>, vector<8x16xf32>,
    return
  }
  func.func @transform_0(%arg0: i32) -> (i32, i32, i32, i32) {
    %c0_i32 = arith.constant 0 : i32
    %c0_i32_0 = arith.constant 0 : i32
    %c0_i32_1 = arith.constant 0 : i32
    %c0_i32_2 = arith.constant 0 : i32
    return %arg0, %c0_i32, %c0_i32_0, %c0_i32_1 : i32, i32, i32, i32
  }
  func.func @transform_1(%arg0: i32) -> (i32, i32, i32) {
    %c0_i32 = arith.constant 0 : i32
    %c0_i32_0 = arith.constant 0 : i32
    %c0_i32_1 = arith.constant 0 : i32
    %c0_i32_2 = arith.constant 0 : i32
    return %c0_i32, %c0_i32_0, %c0_i32_1 : i32, i32, i32
  }
  func.func @transform_2(%arg0: i32) -> (i32, i32, i32) {
    %c0_i32 = arith.constant 0 : i32
    %c0_i32_0 = arith.constant 0 : i32
    %c0_i32_1 = arith.constant 0 : i32
    return %arg0, %c0_i32, %c0_i32_0 : i32, i32, i32
  }
  func.func @transform_3(%arg0: i32) -> (i32, i32) {
    %c0_i32 = arith.constant 0 : i32
    %c0_i32_0 = arith.constant 0 : i32
    %c0_i32_1 = arith.constant 0 : i32
    return %c0_i32, %c0_i32_0 : i32, i32
  }
  func.func @transform_4(%arg0: i32) -> (i32, i32) {
    %c0_i32 = arith.constant 0 : i32
    %c0_i32_0 = arith.constant 0 : i32
    %c0_i32_1 = arith.constant 0 : i32
    return %c0_i32, %c0_i32_0 : i32, i32
  }
}

module attributes {stable_mosaic.version = 11 : i64} {
  func.func @_bn_prelu_kernel(%arg0: i32, %arg1: memref<64x128xf32, #tpu.memory_space<vmem>>, %arg2: memref<1x128xf32, #tpu.memory_space<vmem>>, %arg3: memref<1x128xf32, #tpu.memory_space<vmem>>, %arg4: memref<1xf32, #tpu.memory_space<smem>>, %arg5: memref<64x128xf32, #tpu.memory_space<vmem>>) attributes {dimension_semantics = [#tpu.dimension_semantics<parallel>], iteration_bounds = array<i64: 1>, scalar_prefetch = 0 : i64, scratch_operands = 0 : i64, tpu.core_type = #tpu.core_type<tc>, window_params = [{transform_indices = @transform_0, window_bounds = array<i64: 64, 128>}, {pipeline_mode = #tpu.pipeline_mode<synchronous>, transform_indices = @transform_1, window_bounds = array<i64: 1, 128>}, {pipeline_mode = #tpu.pipeline_mode<synchronous>, transform_indices = @transform_2, window_bounds = array<i64: 1, 128>}, {transform_indices = @transform_3, window_bounds = array<i64: 1>}, {transform_indices = @transform_4, window_bounds = array<i64: 64, 128>}]} {
    %c0 = arith.constant 0 : index
    %c0_0 = arith.constant 0 : index
    %0 = vector.load %arg1[%c0, %c0_0] : memref<64x128xf32, #tpu.memory_space<vmem>>, vector<64x128xf32>
    %c0_1 = arith.constant 0 : index
    %c0_2 = arith.constant 0 : index
    %1 = vector.load %arg2[%c0_1, %c0_2] : memref<1x128xf32, #tpu.memory_space<vmem>>, vector<1x128xf32>
    %2 = vector.broadcast %1 : vector<1x128xf32> to vector<64x128xf32>
    %3 = arith.mulf %0, %2 : vector<64x128xf32>
    %c0_3 = arith.constant 0 : index
    %c0_4 = arith.constant 0 : index
    %4 = vector.load %arg3[%c0_3, %c0_4] : memref<1x128xf32, #tpu.memory_space<vmem>>, vector<1x128xf32>
    %5 = vector.broadcast %4 : vector<1x128xf32> to vector<64x128xf32>
    %6 = arith.addf %3, %5 : vector<64x128xf32>
    %c0_5 = arith.constant 0 : index
    %7 = memref.load %arg4[%c0_5] : memref<1xf32, #tpu.memory_space<smem>>
    %cst = arith.constant 0.000000e+00 : f32
    %8 = vector.broadcast %cst : f32 to vector<64x128xf32>
    %9 = arith.cmpf ogt, %6, %8 : vector<64x128xf32>
    %10 = vector.broadcast %7 : f32 to vector<64x128xf32>
    %11 = arith.mulf %10, %6 : vector<64x128xf32>
    %12 = arith.select %9, %6, %11 : vector<64x128xi1>, vector<64x128xf32>
    %c0_6 = arith.constant 0 : index
    %c0_7 = arith.constant 0 : index
    %13 = vector.load %arg5[%c0_6, %c0_7] : memref<64x128xf32, #tpu.memory_space<vmem>>, vector<64x128xf32>
    tpu.vector_store %arg5[%c0_6, %c0_7], %12 {strides = array<i32>} : memref<64x128xf32, #tpu.memory_space<vmem>>, vector<64x128xf32>,
    return
  }
  func.func @transform_0(%arg0: i32) -> (i32, i32) {
    %c0_i32 = arith.constant 0 : i32
    %c0_i32_0 = arith.constant 0 : i32
    return %arg0, %c0_i32 : i32, i32
  }
  func.func @transform_1(%arg0: i32) -> (i32, i32) {
    %c0_i32 = arith.constant 0 : i32
    %c0_i32_0 = arith.constant 0 : i32
    %c0_i32_1 = arith.constant 0 : i32
    return %c0_i32, %c0_i32_0 : i32, i32
  }
  func.func @transform_2(%arg0: i32) -> (i32, i32) {
    %c0_i32 = arith.constant 0 : i32
    %c0_i32_0 = arith.constant 0 : i32
    %c0_i32_1 = arith.constant 0 : i32
    return %c0_i32, %c0_i32_0 : i32, i32
  }
  func.func @transform_3(%arg0: i32) -> i32 {
    %c0_i32 = arith.constant 0 : i32
    %c0_i32_0 = arith.constant 0 : i32
    return %c0_i32 : i32
  }
  func.func @transform_4(%arg0: i32) -> (i32, i32) {
    %c0_i32 = arith.constant 0 : i32
    %c0_i32_0 = arith.constant 0 : i32
    return %arg0, %c0_i32 : i32, i32
  }
}

</mosaic_0001>

<bundles_post_ra>
// kernel: tile.13
= control target key start
LH: loop header
LB: loop body
LE: loop exit
PB: predicated region body
PF: predicated region fallthrough
CT: control target
= control target key end

     0   :  { %vm7_vm0 = vcmask 31744   ;;  %s37_s8 = smov 4   ;;  %s38_s9 = smov 8   ;;  %vm13_vm1 = vcmask 130144   ;;  %vm19_vm2 = vcmask 97344   ;;  %vm25_vm3 = vcmask 64544   ;;  %s55_s0 = inlined_call_operand.vmem [shape: f32[4,4], index: 0, kind: input, shape index: {}]   ;;  %s56_s1 = inlined_call_operand.vmem [shape: f32[16], index: 1, kind: output, shape index: {}]  }
   0x1   :  { %v4_v0 = vld [vmem:[%s55_s0] sm:$0xf]  ;;  %s36_s0 = smov 12  }
   0x2   :  { %5 = vst [vmem:[#allocation1] sm:$0xf] %v4_v0 }
   0x9   :  { %v10_v1 = vld [vmem:[#allocation1 + $0x3] sm:$0x1]   ;;  %v22_v2 = vld [vmem:[#allocation1 + $0x1] sm:$0x1]   ;;  %v6_v3 = vld [vmem:[#allocation1] sm:$0x1]  }
   0xa   :  { %11 = vrot.lane.b32.xlu0 %v10_v1, %s36_s0  ;;  %23 = vrot.lane.b32.xlu1 %v22_v2, %s37_s8  ;;  %v16_v4 = vld [vmem:[#allocation1 + $0x2] sm:$0x1]   ;;  %8 = vst.msk [vmem:[#allocation0] sm:$0x1] %vm7_vm0, %v6_v3  }
   0xe   :  { %17 = vrot.lane.b32.xlu0 %v16_v4, %s38_s9 }
  0x7c   :  { %v12_v5 = vpop.permute.xlu0 %11   ;;  %v24_v6 = vpop.permute.xlu1 %23  }
  0x7d   :  { %14 = vst.msk [vmem:[#allocation0] sm:$0x1] %vm13_vm1, %v12_v5  }
  0x80   :  { %v18_v7 = vpop.permute.xlu0 %17  }
  0x81   :  { %20 = vst.msk [vmem:[#allocation0] sm:$0x1] %vm19_vm2, %v18_v7  }
  0x82   :  { %26 = vst.msk [vmem:[#allocation0] sm:$0x1] %vm25_vm3, %v24_v6  }
  0x89   :  { %v30_v8 = vld [vmem:[#allocation0] sm:$0x1] }
  0x8a   :  { %32 = vst [vmem:[%s56_s1] sm:$0x1] %v30_v8 }

// kernel: tile.10
= control target key start
LH: loop header
LB: loop body
LE: loop exit
PB: predicated region body
PF: predicated region fallthrough
CT: control target
= control target key end

     0   :  { %s22_s0 = inlined_call_operand.vmem [shape: f32[16], index: 0, kind: input, shape index: {}]   ;;  %s23_s1 = inlined_call_operand.vmem [shape: f32[8,16], index: 1, kind: output, shape index: {}]  }
   0x1   :  { %v4_v0 = vld [vmem:[%s22_s0] ss:$0 sm:$0xff] }
   0x2   :  { %5 = vst [vmem:[%s23_s1] sm:$0xff] %v4_v0 }

// kernel: tile.11
= control target key start
LH: loop header
LB: loop body
LE: loop exit
PB: predicated region body
PF: predicated region fallthrough
CT: control target
= control target key end

     0   :  { %s67_s10 = smov 112   ;;  %s68_s11 = smov 80   ;;  %vm3_vm0 = vcmask 130048   ;;  %vm9_vm1 = vcmask 1048448   ;;  %vm15_vm2 = vcmask 917248   ;;  %vm21_vm3 = vcmask 786048   ;;  %s111_s0 = inlined_call_operand.vmem [shape: f32[8,16], index: 0, kind: input, shape index: {}]   ;;  %s112_s1 = inlined_call_operand.vmem [shape: f32[1,128], index: 1, kind: output, shape index: {}]  }
   0x1   :  { %v53_v0 = vld [vmem:[%s111_s0 + $0x7] sm:$0x1]   ;;  %v55_v1 = vld [vmem:[%s111_s0 + $0x5] sm:$0x1]   ;;  %v54_v2 = vld [vmem:[%s111_s0 + $0x6] sm:$0x1]  }
   0x2   :  { %7 = vrot.lane.b32.xlu0 %v53_v0, %s67_s10  ;;  %19 = vrot.lane.b32.xlu1 %v55_v1, %s68_s11  ;;  %v56_v3 = vld [vmem:[%s111_s0 + $0x4] sm:$0x1]   ;;  %v2_v4 = vld [vmem:[%s111_s0] sm:$0x1]   ;;  %s69_s18 = smov 96   ;;  %s70_s19 = smov 64  }
   0x3   :  { %4 = vst.msk [vmem:[#allocation0] sm:$0x1] %vm3_vm0, %v2_v4   ;;  %v57_v5 = vld [vmem:[%s111_s0 + $0x3] sm:$0x1]   ;;  %v58_v6 = vld [vmem:[%s111_s0 + $0x2] sm:$0x1]  }
   0x4   :  { %s71_s24 = smov 48   ;;  %s72_s25 = smov 32   ;;  %v59_v7 = vld [vmem:[%s111_s0 + $0x1] sm:$0x1]   ;;  %vm27_vm4 = vcmask 654848   ;;  %vm33_vm5 = vcmask 523648  }
   0x5   :  { %s73_s0 = smov 16   ;;  %vm39_vm6 = vcmask 392448   ;;  %vm45_vm7 = vcmask 261248  }
   0x6   :  { %13 = vrot.lane.b32.xlu0 %v54_v2, %s69_s18  ;;  %25 = vrot.lane.b32.xlu1 %v56_v3, %s70_s19 }
   0xa   :  { %31 = vrot.lane.b32.xlu0 %v57_v5, %s71_s24  ;;  %37 = vrot.lane.b32.xlu1 %v58_v6, %s72_s25 }
   0xe   :  { %43 = vrot.lane.b32.xlu0 %v59_v7, %s73_s0 }
  0x74   :  { %v8_v8 = vpop.permute.xlu0 %7   ;;  %v20_v9 = vpop.permute.xlu1 %19  }
  0x75   :  { %10 = vst.msk [vmem:[#allocation0] sm:$0x1] %vm9_vm1, %v8_v8  }
  0x78   :  { %v14_v10 = vpop.permute.xlu0 %13   ;;  %v26_v11 = vpop.permute.xlu1 %25  }
  0x79   :  { %16 = vst.msk [vmem:[#allocation0] sm:$0x1] %vm15_vm2, %v14_v10  }
  0x7a   :  { %22 = vst.msk [vmem:[#allocation0] sm:$0x1] %vm21_vm3, %v20_v9  }
  0x7b   :  { %28 = vst.msk [vmem:[#allocation0] sm:$0x1] %vm27_vm4, %v26_v11  }
  0x7c   :  { %v32_v12 = vpop.permute.xlu0 %31   ;;  %v38_v13 = vpop.permute.xlu1 %37  }
  0x7d   :  { %34 = vst.msk [vmem:[#allocation0] sm:$0x1] %vm33_vm5, %v32_v12  }
  0x7e   :  { %40 = vst.msk [vmem:[#allocation0] sm:$0x1] %vm39_vm6, %v38_v13  }
  0x80   :  { %v44_v14 = vpop.permute.xlu0 %43  }
  0x81   :  { %46 = vst.msk [vmem:[#allocation0] sm:$0x1] %vm45_vm7, %v44_v14  }
  0x88   :  { %v50_v15 = vld [vmem:[#allocation0] sm:$0x1] }
  0x89   :  { %52 = vst [vmem:[%s112_s1] sm:$0x1] %v50_v15 }

// kernel: _lambda_.3
= control target key start
LH: loop header
LB: loop body
LE: loop exit
PB: predicated region body
PF: predicated region fallthrough
CT: control target
= control target key end

     0   :  { %s178_s0 = inlined_call_operand.vmem [shape: f32[64,128], index: 0, kind: input, shape index: {}]   ;;  %s179_s1 = inlined_call_operand.vmem [shape: f32[1,128], index: 1, kind: input, shape index: {}]   ;;  %s180_s2 = inlined_call_operand.vmem [shape: f32[1,128], index: 2, kind: input, shape index: {}]   ;;  %s181_s3 = inlined_call_operand.<no memory space> [shape: f32[1], index: 3, kind: input, shape index: {}]   ;;  %s182_s4 = inlined_call_operand.vmem [shape: f32[64,128], index: 4, kind: output, shape index: {}]  }
   0x1   :  { %v18_v0 = vld [vmem:[%s178_s0] sm:$0xff]  ;;  %v19_v4 = vld [vmem:[%s178_s0 + $0x8] sm:$0xff]  ;;  %v20_v5 = vld [vmem:[%s178_s0 + $0x10] sm:$0xff]  ;;  %v65_v7 = vstv %s181_s3 }
   0x2   :  { %v94_v1 = vld [vmem:[%s179_s1] ss:$0 sm:$0xff]  ;;  %v21_v6 = vld [vmem:[%s178_s0 + $0x18] sm:$0xff]  ;;  %v23_v12 = vld [vmem:[%s178_s0 + $0x28] sm:$0xff] }
   0x3   :  { %v95_v2 = vld [vmem:[%s180_s2] ss:$0 sm:$0xff]  ;;  %v33_v3 = vmul.f32 %v94_v1, %v18_v0  ;;  %v34_v8 = vmul.f32 %v94_v1, %v19_v4  ;;  %v35_v9 = vmul.f32 %v94_v1, %v20_v5  ;;  %v36_v10 = vmul.f32 %v94_v1, %v21_v6  ;;  %v24_v13 = vld [vmem:[%s178_s0 + $0x30] sm:$0xff]  ;;  %v25_v18 = vld [vmem:[%s178_s0 + $0x38] sm:$0xff] }
   0x4   :  { %v22_v11 = vld [vmem:[%s178_s0 + $0x20] sm:$0xff]  ;;  %v38_v16 = vmul.f32 %v94_v1, %v23_v12  ;;  %v39_v17 = vmul.f32 %v94_v1, %v24_v13  ;;  %v40_v22 = vmul.f32 %v94_v1, %v25_v18 }
   0x5   :  { %v48_v14 = vadd.f32 %v95_v2, %v33_v3  ;;  %v37_v15 = vmul.f32 %v94_v1, %v22_v11  ;;  %v49_v19 = vadd.f32 %v95_v2, %v34_v8  ;;  %v50_v20 = vadd.f32 %v95_v2, %v35_v9 }
   0x6   :  { %v51_v21 = vadd.f32 %v95_v2, %v36_v10  ;;  %v53_v25 = vadd.f32 %v95_v2, %v38_v16  ;;  %v54_v35 = vadd.f32 %v95_v2, %v39_v17  ;;  %v55_v36 = vadd.f32 %v95_v2, %v40_v22 }
   0x7   :  { %vm57_vm0 = vcmp.gt.f32.partialorder %v48_v14, 0.0  ;;  %v66_v23 = vmul.f32 %v65_v7, %v48_v14  ;;  %v52_v24 = vadd.f32 %v95_v2, %v37_v15  ;;  %vm58_vm1 = vcmp.gt.f32.partialorder %v49_v19, 0.0 }
   0x8   :  { %v67_v26 = vmul.f32 %v65_v7, %v49_v19  ;;  %vm59_vm2 = vcmp.gt.f32.partialorder %v50_v20, 0.0  ;;  %v68_v27 = vmul.f32 %v65_v7, %v50_v20  ;;  %vm60_vm3 = vcmp.gt.f32.partialorder %v51_v21, 0.0 }
   0x9   :  { %v74_v28 = vsel %vm57_vm0, %v48_v14, %v66_v23  ;;  %v69_v29 = vmul.f32 %v65_v7, %v51_v21  ;;  %vm61_vm4 = vcmp.gt.f32.partialorder %v52_v24, 0.0  ;;  %v70_v32 = vmul.f32 %v65_v7, %v52_v24 }
   0xa   :  { %82 = vst [vmem:[%s182_s4] sm:$0xff] %v74_v28  ;;  %v75_v30 = vsel %vm58_vm1, %v49_v19, %v67_v26  ;;  %v76_v31 = vsel %vm59_vm2, %v50_v20, %v68_v27  ;;  %vm62_vm5 = vcmp.gt.f32.partialorder %v53_v25, 0.0  ;;  %v71_v34 = vmul.f32 %v65_v7, %v53_v25 }
   0xb   :  { %83 = vst [vmem:[%s182_s4 + $0x8] sm:$0xff] %v75_v30  ;;  %84 = vst [vmem:[%s182_s4 + $0x10] sm:$0xff] %v76_v31  ;;  %v77_v33 = vsel %vm60_vm3, %v51_v21, %v69_v29  ;;  %v78_v37 = vsel %vm61_vm4, %v52_v24, %v70_v32  ;;  %vm63_vm6 = vcmp.gt.f32.partialorder %v54_v35, 0.0  ;;  %v72_v39 = vmul.f32 %v65_v7, %v54_v35 }
   0xc   :  { %85 = vst [vmem:[%s182_s4 + $0x18] sm:$0xff] %v77_v33  ;;  %86 = vst [vmem:[%s182_s4 + $0x20] sm:$0xff] %v78_v37  ;;  %v79_v38 = vsel %vm62_vm5, %v53_v25, %v71_v34  ;;  %vm64_vm7 = vcmp.gt.f32.partialorder %v55_v36, 0.0  ;;  %v73_v40 = vmul.f32 %v65_v7, %v55_v36 }
   0xd   :  { %87 = vst [vmem:[%s182_s4 + $0x28] sm:$0xff] %v79_v38  ;;  %v80_v41 = vsel %vm63_vm6, %v54_v35, %v72_v39 }
   0xe   :  { %88 = vst [vmem:[%s182_s4 + $0x30] sm:$0xff] %v80_v41  ;;  %v81_v42 = vsel %vm64_vm7, %v55_v36, %v73_v40 }
   0xf   :  { %89 = vst [vmem:[%s182_s4 + $0x38] sm:$0xff] %v81_v42 }

// kernel: _lambda_.2
= control target key start
LH: loop header
LB: loop body
LE: loop exit
PB: predicated region body
PF: predicated region fallthrough
CT: control target
= control target key end

     0   :  { %10 = vsyncpa [#allocation4], 0  ;;  %s5892_s15 = smov 0   ;;  %s7312_s0 = inlined_call_operand.vmem [shape: f32[2,18,18,4], index: 0, kind: input, shape index: {}]   ;;  %s7313_s1 = inlined_call_operand.hbm [shape: f32[9,4,16], index: 1, kind: input, shape index: {}]   ;;  %s7314_s2 = inlined_call_operand.vmem [shape: f32[2,256,16], index: 2, kind: output, shape index: {0}]   ;;  %s7315_s3 = inlined_call_operand.vmem [shape: f32[8,16], index: 3, kind: output, shape index: {1}]   ;;  %s7316_s4 = inlined_call_operand.vmem [shape: f32[8,16], index: 4, kind: output, shape index: {2}]  }
   0x1 LB: > { %s5898_s16 = sadd.s32 4294967295, %s5861_s15   ;;  %p4550_p0 = scmp.ge.s32.totalorder %s5861_s15, 1  ;;  %s5861_s15 = sphi %s5892_s15, %s16_s15  }
   0x2   : > { %p136_p1 = scmp.lt.s32.totalorder %s5861_s15, 3  ;;  %s5863_s17 = smov [#allocation3]  }
   0x3   : > { %s148_s18 = sshll.u32 %s5863_s17, 4  ;;  %p7317_p4 = scmp.eq.s32.totalorder %s5898_s16, 0  ;;  %s149_s18 = int_to_ptr.vmem [resolvable:$true] %s148_s18 }
   0x4   : > { %p5903_p3 = pnand %p4550_p0, %p136_p1  ;;  %s5823_s23 = scalar_lea.hbm %s7313_s1, 576 }
   0x5   : > { %p5824_p7 = scmp.ne.s32.totalorder %s7313_s1, %s5823_s23  ;;  %p5830_p11 = scmp.lt.u32.totalorder %s5823_s23, %s7313_s1 }
   0x6   : > { %s7366_s19 = scalar_select %p5903_p3, 1, 0 }
   0x7   : > { %p5805_p5 = pneg %p5903_p3 }
   0x9   : > { %p5912_p6 = pnand %p7317_p4, %p5805_p5 }
   0xb   : > { %p5825_p8 = pneg %p5912_p6 }
   0xd   : > { %p5826_p9 = pnand %p5825_p8, %p5824_p7 }
   0xf   : > { %p5827_p10 = pneg %p5826_p9 }
  0x11   : > { %p5832_p12 = pnand %p5830_p11, %p5827_p10 }
  0x13   : > { %5835 = shalt.err (!%p5832_p12)
}
  0x14   : > { %s5836_s28 = scalar_lea.vmem %s149_s18, 576  ;;  %p5844_p5 = scmp.lt.s32.totalorder %s149_s18, %s149_s18 }
  0x15   : > { %p5837_p13 = scmp.ne.s32.totalorder %s149_s18, %s5836_s28  ;;  %p5845_p2 = scmp.lt.s32.totalorder %s5836_s28, %s5836_s28 }
  0x17   : > { %p5839_p0 = pnand %p5837_p13, %p5825_p8  ;;  %p5846_p4 = por %p5845_p2, %p5844_p5 }
  0x19   : > { %p5840_p1 = pneg %p5839_p0 }
  0x1b   : > { %p5847_p3 = pnand %p5846_p4, %p5840_p1 }
  0x1d   : > { %5850 = shalt.err (!%p5847_p3)
}
  0x1e   : > { %s5864_s29 = smov 64   ;;  %s5865_s30 = smov 4  }
  0x1f   : > { %5808 = dma.hbm_to_vmem [thread:$0]  (!%p5912_p6), %s7313_s1, 576, %s149_s18, [#allocation4], %s5864_s29, %s5864_s29, %s5865_s30  }
  0x20   : > { %p7368_p7 = scmp.ne.s32.totalorder %s7366_s19, 0 }
  0x22   : > { %172 = sbr.rel (%p7368_p7) target bundleno = 585 (0x249), region = 28 }
  0x29   : > { %p7369_p9 = scmp.eq.s32.totalorder %s5898_s16, 0 }
  0x2b   : > { %5856 = dma.done.wait (%p7369_p9), [#allocation4], 576   ;;  %p7370_p8 = pmov %p7369_p9 }
  0x2c   : > { %p198_p2 = scmp.lt.s32.totalorder %s5898_s16, 1  ;;  %p7371_p3 = scmp.ne.s32.totalorder %s5898_s16, 0 }
  0x2d   : > { %5858 = vsyncadd (%p7370_p8), [#allocation4], 4294966720  ;;  %vm212_vm0 = vcmask (!%p7371_p3), 130048   ;;  %v5866_v0 = vmov (!%p7371_p3), 0.0  }
  0x2e   : > { %s199_s7 = scalar_select %p198_p2, %s5898_s16, 1 }
  0x2f   : > { %211 = sbr.rel (%p7371_p3) target bundleno = 54 (0x36), region = 36  ;;  %213 = vst.msk [vmem:[%s7315_s3] sm:$0xff] (!%p7371_p3), %vm212_vm0, %v5866_v0  ;;  %214 = vst.msk [vmem:[%s7316_s4] sm:$0xff] (!%p7371_p3), %vm212_vm0, %v5866_v0 }
  0x30   : > { %s5800_s8 = smul.u32 432, %s199_s7  ;;  %s5050_s9 = sshll.u32 %s199_s7, 8 }
  0x31   : > { %s5943_s12 = scalar_lea.vmem %s7314_s2, %s5050_s9 }
  0x32   : > { %s5948_s17 = scalar_lea.vmem %s7312_s0, %s5800_s8 }
  0x36 PF: > { %v247_v1 = vld [vmem:[#allocation3] sm:$0xf]  ;;  %vm345_vm1 = vcmask 1043456   ;;  %vm248_vm2 = vcmask 31744   ;;  %v5962_v3 = vld [vmem:[%s5948_s17 + $0xc8] sm:$0xff]  ;;  %v5968_v5 = vld [vmem:[%s5948_s17 + $0xd8] sm:$0xff] }
  0x37   : > { %v5959_v2 = vld [vmem:[%s5948_s17 + $0xc0] sm:$0xff]  ;;  %5798 = vmatprep.subr.msk.mxu1 %vm345_vm1, %v247_v1  ;;  %5348 = vmatprep.subr.msk.mxu0 %vm345_vm1, %v247_v1  ;;  %v216_v7 = vld [vmem:[%s5948_s17 + $0x8] sm:$0xff]  ;;  %v5984_v10 = vld [vmem:[%s5948_s17 + $0xf0] sm:$0xff]  ;;  %vm574_vm3 = vcmask 130048  }
  0x38   : > { %5374 = vmatprep.mubr.msk.f32.mxu1 %vm248_vm2, %v5959_v2  ;;  %v640_v4 = vld [vmem:[#allocation3 + $0x4] sm:$0xf]  ;;  %5799 = vmatpush3.msk.msra.mxu1 %vm345_vm1, %v247_v1  ;;  %v1094_v8 = vld [vmem:[#allocation3 + $0x8] sm:$0xf]  ;;  %v5989_v11 = vld [vmem:[%s5948_s17 + $0x18] sm:$0xff] }
  0x39   : > { %v215_v6 = vld [vmem:[%s5948_s17] sm:$0xff]  ;;  %5375 = vmatmul.mubr.msk.f32.vlgmr.msra.gmra.mrb[0].mxu1 %vm248_vm2, %v5962_v3  ;;  %5398 = vmatprep.subr.msk.mxu1 %vm345_vm1, %v640_v4  ;;  %v6002_v13 = vld [vmem:[%s5948_s17 + $0xf8] sm:$0xff]  ;;  %v6007_v14 = vld [vmem:[%s5948_s17 + $0x30] sm:$0xff] }
  0x3a   : > { %5399 = vmatpush3.msk.msra.mxu1 %vm345_vm1, %v640_v4  ;;  %5377 = vmatprep.mubr.msk.f32.mxu1 %vm248_vm2, %v5968_v5  ;;  %v5981_v9 = vld [vmem:[%s5948_s17 + $0xe0] sm:$0xff]  ;;  %v6010_v15 = vld [vmem:[%s5948_s17 + $0x108] sm:$0xff]  ;;  %v6019_v16 = vld [vmem:[%s5948_s17 + $0x38] sm:$0xff] }
  0x3b   : > { %5349 = vmatpush3.msk.msra.mxu0 %vm345_vm1, %v247_v1  ;;  %5350 = vmatprep.mubr.msk.f32.mxu0 %vm248_vm2, %v215_v6  ;;  %v5997_v12 = vld [vmem:[%s5948_s17 + $0x20] sm:$0xff]  ;;  %v1549_v17 = vld [vmem:[#allocation3 + $0xc] sm:$0xf]  ;;  %v6024_v18 = vld [vmem:[%s5948_s17 + $0x110] sm:$0xff] }
  0x3c   : > { %5351 = vmatmul.mubr.msk.f32.vlgmr.msra.gmra.mrb[0].mxu0 %vm248_vm2, %v216_v7  ;;  %5448 = vmatprep.subr.msk.mxu0 %vm345_vm1, %v1094_v8  ;;  %v6027_v19 = vld [vmem:[%s5948_s17 + $0x48] sm:$0xff]  ;;  %v6031_v20 = vld [vmem:[%s5948_s17 + $0x120] sm:$0xff]  ;;  %v2003_v21 = vld [vmem:[#allocation3 + $0x10] sm:$0xf] }
  0x3d   : > { %5378 = vmatmul.mubr.msk.f32.gmra.mrb[2].mxu1 %vm248_vm2, %v5981_v9  ;;  %5449 = vmatpush3.msk.msra.mxu0 %vm345_vm1, %v1094_v8  ;;  %v6040_v22 = vld [vmem:[%s5948_s17 + $0x50] sm:$0xff]  ;;  %v6045_v23 = vld [vmem:[%s5948_s17 + $0x128] sm:$0xff]  ;;  %v6048_v24 = vld [vmem:[%s5948_s17 + $0x60] sm:$0xff] }
  0x3e   : > { %5380 = vmatprep.mubr.msk.f32.mxu1 %vm248_vm2, %v5984_v10  ;;  %5353 = vmatprep.mubr.msk.f32.mxu0 %vm248_vm2, %v5989_v11  ;;  %v6052_v25 = vld [vmem:[%s5948_s17 + $0x138] sm:$0xff]  ;;  %v6061_v26 = vld [vmem:[%s5948_s17 + $0x68] sm:$0xff]  ;;  %v6066_v27 = vld [vmem:[%s5948_s17 + $0x140] sm:$0xff] }
  0x3f   : > { %5498 = vmatprep.subr.msk.mxu1 %vm345_vm1, %v1549_v17  ;;  %5548 = vmatprep.subr.msk.mxu0 %vm345_vm1, %v2003_v21  ;;  %v6069_v28 = vld [vmem:[%s5948_s17 + $0x78] sm:$0xff]  ;;  %v6072_v29 = vld [vmem:[%s5948_s17 + $0x150] sm:$0xff]  ;;  %v6081_v30 = vld [vmem:[%s5948_s17 + $0x80] sm:$0xff] }
  0x40   : > { %5354 = vmatmul.mubr.msk.f32.gmra.mrb[2].mxu0 %vm248_vm2, %v5997_v12  ;;  %v6086_v31 = vld [vmem:[%s5948_s17 + $0x158] sm:$0xff]  ;;  %v6089_v32 = vld [vmem:[%s5948_s17 + $0x90] sm:$0xff]  ;;  %v6092_v33 = vld [vmem:[%s5948_s17 + $0x168] sm:$0xff] }
  0x41   : > { %5381 = vmatmul.mubr.msk.f32.gmra.mrb[4].mxu1 %vm248_vm2, %v6002_v13  ;;  %5356 = vmatprep.mubr.msk.f32.mxu0 %vm248_vm2, %v6007_v14  ;;  %7372 = vst [vmem:[#allocation6_spill] sm:$0xff] %v6092_v33  ;;  %v6101_v34 = vld [vmem:[%s5948_s17 + $0x98] sm:$0xff]  ;;  %v6106_v35 = vld [vmem:[%s5948_s17 + $0x170] sm:$0xff]  ;;  %v6109_v36 = vld [vmem:[%s5948_s17 + $0xa8] sm:$0xff] }
  0x42   : > { %5383 = vmatprep.mubr.msk.f32.mxu1 %vm248_vm2, %v6010_v15  ;;  %7373 = vst [vmem:[#allocation7_spill] sm:$0xff] %v6106_v35  ;;  %v607_v37 = vld [vmem:[%s5948_s17 + $0x1] sm:$0xff]  ;;  %v6119_v38 = vld [vmem:[%s5948_s17 + $0xb0] sm:$0xff]  ;;  %v6125_v41 = vld [vmem:[%s5948_s17 + $0x19] sm:$0xff] }
  0x43   : > { %v608_v39 = vld [vmem:[%s5948_s17 + $0x9] sm:$0xff]  ;;  %v6129_v42 = vld [vmem:[#allocation3 + $0x14] sm:$0xf]  ;;  %v6138_v44 = vld [vmem:[%s5948_s17 + $0x21] sm:$0xff] }
  0x44   : > { %5357 = vmatmul.mubr.msk.f32.gmra.mrb[4].mxu0 %vm248_vm2, %v6019_v16  ;;  %v1061_v40 = vld [vmem:[%s5948_s17 + $0x2] sm:$0xff]  ;;  %v1062_v43 = vld [vmem:[%s5948_s17 + $0xa] sm:$0xff]  ;;  %v6144_v46 = vld [vmem:[%s5948_s17 + $0x1a] sm:$0xff] }
  0x45   : > { %5384 = vmatmul.mubr.msk.f32.gmra.mrb[6].mxu1 %vm248_vm2, %v6024_v18  ;;  %5359 = vmatprep.mubr.msk.f32.mxu0 %vm248_vm2, %v6027_v19  ;;  %v6141_v45 = vld [vmem:[%s5948_s17 + $0x31] sm:$0xff]  ;;  %7374 = vst [vmem:[#allocation8_spill] sm:$0xff] %v6144_v46  ;;  %v6155_v48 = vld [vmem:[%s5948_s17 + $0x22] sm:$0xff]  ;;  %v6160_v49 = vld [vmem:[%s5948_s17 + $0x39] sm:$0xff] }
  0x46   : > { %5386 = vmatprep.mubr.msk.f32.mxu1 %vm248_vm2, %v6031_v20  ;;  %v6149_v47 = vld [vmem:[#allocation3 + $0x18] sm:$0xf]  ;;  %7375 = vst [vmem:[#allocation9_spill] sm:$0xff] %v6155_v48  ;;  %v6168_v51 = vld [vmem:[%s5948_s17 + $0x49] sm:$0xff]  ;;  %v6190_v55 = vld [vmem:[%s5948_s17 + $0x61] sm:$0xff] }
  0x47   : > { %v6165_v50 = vld [vmem:[%s5948_s17 + $0x32] sm:$0xff]  ;;  %v6179_v52 = vld [vmem:[%s5948_s17 + $0x3a] sm:$0xff]  ;;  %v6187_v54 = vld [vmem:[%s5948_s17 + $0x4a] sm:$0xff] }
  0x48   : > { %5360 = vmatmul.mubr.msk.f32.gmra.mrb[6].mxu0 %vm248_vm2, %v6040_v22  ;;  %7376 = vst [vmem:[#allocation10_spill] sm:$0xff] %v6165_v50  ;;  %7377 = vst [vmem:[#allocation11_spill] sm:$0xff] %v6179_v52  ;;  %v6184_v53 = vld [vmem:[%s5948_s17 + $0x51] sm:$0xff]  ;;  %v6204_v57 = vld [vmem:[%s5948_s17 + $0x69] sm:$0xff] }
  0x49   : > { %5387 = vmatmul.mubr.msk.f32.gmra.mrb[8].mxu1 %vm248_vm2, %v6045_v23  ;;  %5362 = vmatprep.mubr.msk.f32.mxu0 %vm248_vm2, %v6048_v24  ;;  %7378 = vst [vmem:[#allocation12_spill] sm:$0xff] %v6187_v54  ;;  %v6199_v56 = vld [vmem:[%s5948_s17 + $0x52] sm:$0xff]  ;;  %v6207_v58 = vld [vmem:[%s5948_s17 + $0x62] sm:$0xff]  ;;  %v6219_v60 = vld [vmem:[%s5948_s17 + $0x6a] sm:$0xff] }
  0x4a   : > { %5389 = vmatprep.mubr.msk.f32.mxu1 %vm248_vm2, %v6052_v25  ;;  %7379 = vst [vmem:[#allocation13_spill] sm:$0xff] %v6199_v56  ;;  %7380 = vst [vmem:[#allocation14_spill] sm:$0xff] %v6207_v58  ;;  %v6210_v59 = vld [vmem:[%s5948_s17 + $0x79] sm:$0xff]  ;;  %v6224_v61 = vld [vmem:[%s5948_s17 + $0x81] sm:$0xff] }
  0x4b   : > { %7381 = vst [vmem:[#allocation15_spill] sm:$0xff] %v6219_v60  ;;  %v6227_v62 = vld [vmem:[%s5948_s17 + $0x7a] sm:$0xff]  ;;  %v6230_v63 = vld [vmem:[%s5948_s17 + $0x91] sm:$0xff]  ;;  %v6239_v0 = vld [vmem:[%s5948_s17 + $0x82] sm:$0xff] }
  0x4c   : > { %5363 = vmatmul.mubr.msk.f32.gmra.mrb[8].mxu0 %vm248_vm2, %v6061_v26  ;;  %7382 = vst [vmem:[#allocation16_spill] sm:$0xff] %v6227_v62  ;;  %7383 = vst [vmem:[#allocation17_spill] sm:$0xff] %v6239_v0  ;;  %v6244_v1 = vld [vmem:[%s5948_s17 + $0x99] sm:$0xff]  ;;  %v6250_v6 = vld [vmem:[%s5948_s17 + $0xa9] sm:$0xff] }
  0x4d   : > { %5390 = vmatmul.mubr.msk.f32.gmra.mrb[10].mxu1 %vm248_vm2, %v6066_v27  ;;  %5365 = vmatprep.mubr.msk.f32.mxu0 %vm248_vm2, %v6069_v28  ;;  %v6247_v4 = vld [vmem:[%s5948_s17 + $0x92] sm:$0xff]  ;;  %v6259_v7 = vld [vmem:[%s5948_s17 + $0x9a] sm:$0xff] }
  0x4e   : > { %5392 = vmatprep.mubr.msk.f32.mxu1 %vm248_vm2, %v6072_v29  ;;  %7384 = vst [vmem:[#allocation18_spill] sm:$0xff] %v6247_v4  ;;  %7385 = vst [vmem:[#allocation19_spill] sm:$0xff] %v6259_v7  ;;  %v6264_v8 = vld [vmem:[%s5948_s17 + $0xb1] sm:$0xff] }
  0x50   : > { %5366 = vmatmul.mubr.msk.f32.gmra.mrb[10].mxu0 %vm248_vm2, %v6081_v30 }
  0x51   : > { %5393 = vmatmul.mubr.msk.f32.gmra.mrb[12].mxu1 %vm248_vm2, %v6086_v31  ;;  %5368 = vmatprep.mubr.msk.f32.mxu0 %vm248_vm2, %v6089_v32 }
  0x52   : > { %5395 = vmatprep.mubr.msk.f32.mxu1 %vm248_vm2, %v6092_v33  ;;  %v6427_v33 = vld [vmem:[%s5948_s17 + $0x16a] sm:$0xff] }
  0x54   : > { %5369 = vmatmul.mubr.msk.f32.gmra.mrb[12].mxu0 %vm248_vm2, %v6101_v34 }
  0x55   : > { %5396 = vmatmul.mubr.msk.f32.gmra.mrb[14].mxu1 %vm248_vm2, %v6106_v35  ;;  %5371 = vmatprep.mubr.msk.f32.mxu0 %vm248_vm2, %v6109_v36  ;;  %v6410_v35 = vld [vmem:[%s5948_s17 + $0x169] sm:$0xff] }
  0x56   : > { %5400 = vmatprep.mubr.msk.f32.mxu1 %vm248_vm2, %v607_v37  ;;  %v6279_v37 = vld [vmem:[%s5948_s17 + $0xb2] sm:$0xff] }
  0x57   : > { %7387 = vst [vmem:[#allocation21_spill] sm:$0xff] %v6279_v37 }
  0x58   : > { %5372 = vmatmul.mubr.msk.f32.gmra.mrb[14].mxu0 %vm248_vm2, %v6119_v38 }
  0x59   : > { %5401 = vmatmul.mubr.msk.f32.vlgmr.msra.gmra.mrb[16].mxu1 %vm248_vm2, %v608_v39  ;;  %5450 = vmatprep.mubr.msk.f32.mxu0 %vm248_vm2, %v1061_v40  ;;  %v6284_v39 = vld [vmem:[%s5948_s17 + $0xc9] sm:$0xff] }
  0x5a   : > { %5499 = vmatpush3.msk.msra.mxu1 %vm345_vm1, %v1549_v17  ;;  %5403 = vmatprep.mubr.msk.f32.mxu1 %vm248_vm2, %v6125_v41  ;;  %v6267_v17 = vld [vmem:[%s5948_s17 + $0xaa] sm:$0xff]  ;;  %v6287_v40 = vld [vmem:[%s5948_s17 + $0xc2] sm:$0xff] }
  0x5b   : > { %5598 = vmatprep.subr.msk.mxu1 %vm345_vm1, %v6129_v42  ;;  %7386 = vst [vmem:[#allocation20_spill] sm:$0xff] %v6267_v17  ;;  %7388 = vst [vmem:[#allocation22_spill] sm:$0xff] %v6287_v40 }
  0x5c   : > { %5451 = vmatmul.mubr.msk.f32.vlgmr.msra.gmra.mrb[16].mxu0 %vm248_vm2, %v1062_v43  ;;  %v6290_v43 = vld [vmem:[%s5948_s17 + $0xd9] sm:$0xff] }
  0x5d   : > { %5404 = vmatmul.mubr.msk.f32.gmra.mrb[18].mxu1 %vm248_vm2, %v6138_v44  ;;  %5549 = vmatpush3.msk.msra.mxu0 %vm345_vm1, %v2003_v21  ;;  %v6270_v21 = vld [vmem:[%s5948_s17 + $0xc1] sm:$0xff] }
  0x5e   : > { %5406 = vmatprep.mubr.msk.f32.mxu1 %vm248_vm2, %v6141_v45  ;;  %5453 = vmatprep.mubr.msk.f32.mxu0 %vm248_vm2, %v6144_v46  ;;  %v6407_v46 = vld [vmem:[%s5948_s17 + $0x152] sm:$0xff] }
  0x5f   : > { %5648 = vmatprep.subr.msk.mxu0 %vm345_vm1, %v6149_v47  ;;  %7400 = vst [vmem:[#allocation34_spill] sm:$0xff] %v6407_v46 }
  0x60   : > { %5454 = vmatmul.mubr.msk.f32.gmra.mrb[18].mxu0 %vm248_vm2, %v6155_v48  ;;  %v6390_v48 = vld [vmem:[%s5948_s17 + $0x151] sm:$0xff] }
  0x61   : > { %5407 = vmatmul.mubr.msk.f32.gmra.mrb[20].mxu1 %vm248_vm2, %v6160_v49  ;;  %5456 = vmatprep.mubr.msk.f32.mxu0 %vm248_vm2, %v6165_v50  ;;  %v6387_v50 = vld [vmem:[%s5948_s17 + $0x13a] sm:$0xff] }
  0x62   : > { %5409 = vmatprep.mubr.msk.f32.mxu1 %vm248_vm2, %v6168_v51  ;;  %7398 = vst [vmem:[#allocation32_spill] sm:$0xff] %v6387_v50 }
  0x64   : > { %5457 = vmatmul.mubr.msk.f32.gmra.mrb[20].mxu0 %vm248_vm2, %v6179_v52  ;;  %v6370_v52 = vld [vmem:[%s5948_s17 + $0x139] sm:$0xff] }
  0x65   : > { %5410 = vmatmul.mubr.msk.f32.gmra.mrb[22].mxu1 %vm248_vm2, %v6184_v53  ;;  %5459 = vmatprep.mubr.msk.f32.mxu0 %vm248_vm2, %v6187_v54  ;;  %v6367_v54 = vld [vmem:[%s5948_s17 + $0x122] sm:$0xff] }
  0x66   : > { %5412 = vmatprep.mubr.msk.f32.mxu1 %vm248_vm2, %v6190_v55  ;;  %7396 = vst [vmem:[#allocation30_spill] sm:$0xff] %v6367_v54 }
  0x68   : > { %5460 = vmatmul.mubr.msk.f32.gmra.mrb[22].mxu0 %vm248_vm2, %v6199_v56  ;;  %v6350_v56 = vld [vmem:[%s5948_s17 + $0x121] sm:$0xff] }
  0x69   : > { %5413 = vmatmul.mubr.msk.f32.gmra.mrb[24].mxu1 %vm248_vm2, %v6204_v57  ;;  %5462 = vmatprep.mubr.msk.f32.mxu0 %vm248_vm2, %v6207_v58  ;;  %v6347_v58 = vld [vmem:[%s5948_s17 + $0x10a] sm:$0xff] }
  0x6a   : > { %5415 = vmatprep.mubr.msk.f32.mxu1 %vm248_vm2, %v6210_v59  ;;  %7394 = vst [vmem:[#allocation28_spill] sm:$0xff] %v6347_v58 }
  0x6c   : > { %5463 = vmatmul.mubr.msk.f32.gmra.mrb[24].mxu0 %vm248_vm2, %v6219_v60  ;;  %v6330_v60 = vld [vmem:[%s5948_s17 + $0x109] sm:$0xff] }
  0x6d   : > { %5416 = vmatmul.mubr.msk.f32.gmra.mrb[26].mxu1 %vm248_vm2, %v6224_v61  ;;  %5465 = vmatprep.mubr.msk.f32.mxu0 %vm248_vm2, %v6227_v62  ;;  %v6327_v62 = vld [vmem:[%s5948_s17 + $0xf2] sm:$0xff] }
  0x6e   : > { %5418 = vmatprep.mubr.msk.f32.mxu1 %vm248_vm2, %v6230_v63  ;;  %7392 = vst [vmem:[#allocation26_spill] sm:$0xff] %v6327_v62 }
  0x70   : > { %5466 = vmatmul.mubr.msk.f32.gmra.mrb[26].mxu0 %vm248_vm2, %v6239_v0  ;;  %v6310_v0 = vld [vmem:[%s5948_s17 + $0xf1] sm:$0xff] }
  0x71   : > { %5419 = vmatmul.mubr.msk.f32.gmra.mrb[28].mxu1 %vm248_vm2, %v6244_v1  ;;  %5468 = vmatprep.mubr.msk.f32.mxu0 %vm248_vm2, %v6247_v4  ;;  %v6307_v4 = vld [vmem:[%s5948_s17 + $0xda] sm:$0xff] }
  0x72   : > { %5421 = vmatprep.mubr.msk.f32.mxu1 %vm248_vm2, %v6250_v6  ;;  %7390 = vst [vmem:[#allocation24_spill] sm:$0xff] %v6307_v4 }
  0x74   : > { %5469 = vmatmul.mubr.msk.f32.gmra.mrb[28].mxu0 %vm248_vm2, %v6259_v7  ;;  %v6304_v7 = vld [vmem:[%s5948_s17 + $0xe1] sm:$0xff] }
  0x75   : > { %5422 = vmatmul.mubr.msk.f32.gmra.mrb[30].mxu1 %vm248_vm2, %v6264_v8  ;;  %5471 = vmatprep.mubr.msk.f32.mxu0 %vm248_vm2, %v6267_v17  ;;  %v6299_v17 = vld [vmem:[%s5948_s17 + $0xca] sm:$0xff] }
  0x76   : > { %5424 = vmatprep.mubr.msk.f32.mxu1 %vm248_vm2, %v6270_v21  ;;  %7389 = vst [vmem:[#allocation23_spill] sm:$0xff] %v6299_v17 }
  0x78   : > { %5472 = vmatmul.mubr.msk.f32.gmra.mrb[30].mxu0 %vm248_vm2, %v6279_v37  ;;  %v6324_v37 = vld [vmem:[%s5948_s17 + $0xf9] sm:$0xff] }
  0x79   : > { %5425 = vmatmul.mubr.msk.f32.gmra.mrb[32].mxu1 %vm248_vm2, %v6284_v39  ;;  %5474 = vmatprep.mubr.msk.f32.mxu0 %vm248_vm2, %v6287_v40  ;;  %v6319_v40 = vld [vmem:[%s5948_s17 + $0xe2] sm:$0xff] }
  0x7a   : > { %5427 = vmatprep.mubr.msk.f32.mxu1 %vm248_vm2, %v6290_v43  ;;  %7391 = vst [vmem:[#allocation25_spill] sm:$0xff] %v6319_v40 }
  0x7c   : > { %5475 = vmatmul.mubr.msk.f32.gmra.mrb[32].mxu0 %vm248_vm2, %v6299_v17  ;;  %v6344_v17 = vld [vmem:[%s5948_s17 + $0x111] sm:$0xff] }
  0x7d   : > { %5428 = vmatmul.mubr.msk.f32.gmra.mrb[34].mxu1 %vm248_vm2, %v6304_v7  ;;  %5477 = vmatprep.mubr.msk.f32.mxu0 %vm248_vm2, %v6307_v4  ;;  %v6339_v4 = vld [vmem:[%s5948_s17 + $0xfa] sm:$0xff] }
  0x7e   : > { %5430 = vmatprep.mubr.msk.f32.mxu1 %vm248_vm2, %v6310_v0  ;;  %7393 = vst [vmem:[#allocation27_spill] sm:$0xff] %v6339_v4 }
  0x80   : > { %5478 = vmatmul.mubr.msk.f32.gmra.mrb[34].mxu0 %vm248_vm2, %v6319_v40  ;;  %v6364_v40 = vld [vmem:[%s5948_s17 + $0x129] sm:$0xff] }
  0x81   : > { %5431 = vmatmul.mubr.msk.f32.gmra.mrb[36].mxu1 %vm248_vm2, %v6324_v37  ;;  %5480 = vmatprep.mubr.msk.f32.mxu0 %vm248_vm2, %v6327_v62  ;;  %v6359_v62 = vld [vmem:[%s5948_s17 + $0x112] sm:$0xff] }
  0x82   : > { %5433 = vmatprep.mubr.msk.f32.mxu1 %vm248_vm2, %v6330_v60  ;;  %7395 = vst [vmem:[#allocation29_spill] sm:$0xff] %v6359_v62 }
  0x84   : > { %5481 = vmatmul.mubr.msk.f32.gmra.mrb[36].mxu0 %vm248_vm2, %v6339_v4  ;;  %v6384_v4 = vld [vmem:[%s5948_s17 + $0x141] sm:$0xff] }
  0x85   : > { %5434 = vmatmul.mubr.msk.f32.gmra.mrb[38].mxu1 %vm248_vm2, %v6344_v17  ;;  %5483 = vmatprep.mubr.msk.f32.mxu0 %vm248_vm2, %v6347_v58  ;;  %v6379_v58 = vld [vmem:[%s5948_s17 + $0x12a] sm:$0xff] }
  0x86   : > { %5436 = vmatprep.mubr.msk.f32.mxu1 %vm248_vm2, %v6350_v56  ;;  %7397 = vst [vmem:[#allocation31_spill] sm:$0xff] %v6379_v58 }
  0x88   : > { %5484 = vmatmul.mubr.msk.f32.gmra.mrb[38].mxu0 %vm248_vm2, %v6359_v62  ;;  %v6404_v62 = vld [vmem:[%s5948_s17 + $0x159] sm:$0xff] }
  0x89   : > { %5437 = vmatmul.mubr.msk.f32.gmra.mrb[40].mxu1 %vm248_vm2, %v6364_v40  ;;  %5486 = vmatprep.mubr.msk.f32.mxu0 %vm248_vm2, %v6367_v54  ;;  %v6399_v54 = vld [vmem:[%s5948_s17 + $0x142] sm:$0xff] }
  0x8a   : > { %5439 = vmatprep.mubr.msk.f32.mxu1 %vm248_vm2, %v6370_v52  ;;  %7399 = vst [vmem:[#allocation33_spill] sm:$0xff] %v6399_v54 }
  0x8c   : > { %5487 = vmatmul.mubr.msk.f32.gmra.mrb[40].mxu0 %vm248_vm2, %v6379_v58  ;;  %v6424_v58 = vld [vmem:[%s5948_s17 + $0x171] sm:$0xff] }
  0x8d   : > { %5440 = vmatmul.mubr.msk.f32.gmra.mrb[42].mxu1 %vm248_vm2, %v6384_v4  ;;  %5489 = vmatprep.mubr.msk.f32.mxu0 %vm248_vm2, %v6387_v50  ;;  %v6419_v50 = vld [vmem:[%s5948_s17 + $0x15a] sm:$0xff] }
  0x8e   : > { %5442 = vmatprep.mubr.msk.f32.mxu1 %vm248_vm2, %v6390_v48 }
  0x90   : > { %5490 = vmatmul.mubr.msk.f32.gmra.mrb[42].mxu0 %vm248_vm2, %v6399_v54  ;;  %v6436_v54 = vld [vmem:[%s5948_s17 + $0x172] sm:$0xff] }
  0x91   : > { %5443 = vmatmul.mubr.msk.f32.gmra.mrb[44].mxu1 %vm248_vm2, %v6404_v62  ;;  %5492 = vmatprep.mubr.msk.f32.mxu0 %vm248_vm2, %v6407_v46  ;;  %v6442_v46 = vld [vmem:[#allocation3 + $0x1c] sm:$0xf] }
  0x92   : > { %5445 = vmatprep.mubr.msk.f32.mxu1 %vm248_vm2, %v6410_v35 }
  0x94   : > { %5493 = vmatmul.mubr.msk.f32.gmra.mrb[44].mxu0 %vm248_vm2, %v6419_v50 }
  0x95   : > { %5446 = vmatmul.mubr.msk.f32.gmra.mrb[46].mxu1 %vm248_vm2, %v6424_v58  ;;  %5495 = vmatprep.mubr.msk.f32.mxu0 %vm248_vm2, %v6427_v33 }
  0x96   : > { %5500 = vmatprep.mubr.msk.f32.mxu1 %vm248_vm2, %v5989_v11  ;;  %v6456_v11 = vld [vmem:[#allocation3 + $0x20] sm:$0xf] }
  0x98   : > { %5496 = vmatmul.mubr.msk.f32.gmra.mrb[46].mxu0 %vm248_vm2, %v6436_v54 }
  0x99   : > { %5501 = vmatmul.mubr.msk.f32.vlgmr.msra.gmra.mrb[48].mxu1 %vm248_vm2, %v5997_v12  ;;  %5550 = vmatprep.mubr.msk.f32.mxu0 %vm248_vm2, %v6125_v41  ;;  %v7401_v12 = vld [vmem:[#allocation6_spill] sm:$0xff] }
  0x9a   : > { %5599 = vmatpush3.msk.msra.mxu1 %vm345_vm1, %v6129_v42  ;;  %5503 = vmatprep.mubr.msk.f32.mxu1 %vm248_vm2, %v6007_v14  ;;  %v6565_v41 = vld [vmem:[%s5948_s17 + $0x180] sm:$0xff]  ;;  %v7402_v42 = vld [vmem:[#allocation7_spill] sm:$0xff] }
  0x9b   : > { %5698 = vmatprep.subr.msk.mxu1 %vm345_vm1, %v6442_v46 }
  0x9c   : > { %5551 = vmatmul.mubr.msk.f32.vlgmr.msra.gmra.mrb[48].mxu0 %vm248_vm2, %v6138_v44  ;;  %v6576_v44 = vld [vmem:[%s5948_s17 + $0x188] sm:$0xff] }
  0x9d   : > { %5504 = vmatmul.mubr.msk.f32.gmra.mrb[50].mxu1 %vm248_vm2, %v6019_v16  ;;  %5649 = vmatpush3.msk.msra.mxu0 %vm345_vm1, %v6149_v47  ;;  %v6579_v47 = vld [vmem:[%s5948_s17 + $0x181] sm:$0xff] }
  0x9e   : > { %5506 = vmatprep.mubr.msk.f32.mxu1 %vm248_vm2, %v6027_v19  ;;  %5553 = vmatprep.mubr.msk.f32.mxu0 %vm248_vm2, %v6141_v45 }
  0x9f   : > { %5748 = vmatprep.subr.msk.mxu0 %vm345_vm1, %v6456_v11 }
  0xa0   : > { %5554 = vmatmul.mubr.msk.f32.gmra.mrb[50].mxu0 %vm248_vm2, %v6160_v49 }
  0xa1   : > { %5507 = vmatmul.mubr.msk.f32.gmra.mrb[52].mxu1 %vm248_vm2, %v6040_v22  ;;  %5556 = vmatprep.mubr.msk.f32.mxu0 %vm248_vm2, %v6168_v51 }
  0xa2   : > { %5509 = vmatprep.mubr.msk.f32.mxu1 %vm248_vm2, %v6048_v24 }
  0xa4   : > { %5557 = vmatmul.mubr.msk.f32.gmra.mrb[52].mxu0 %vm248_vm2, %v6184_v53 }
  0xa5   : > { %5510 = vmatmul.mubr.msk.f32.gmra.mrb[54].mxu1 %vm248_vm2, %v6061_v26  ;;  %5559 = vmatprep.mubr.msk.f32.mxu0 %vm248_vm2, %v6190_v55 }
  0xa6   : > { %5512 = vmatprep.mubr.msk.f32.mxu1 %vm248_vm2, %v6069_v28 }
  0xa8   : > { %5560 = vmatmul.mubr.msk.f32.gmra.mrb[54].mxu0 %vm248_vm2, %v6204_v57 }
  0xa9   : > { %5513 = vmatmul.mubr.msk.f32.gmra.mrb[56].mxu1 %vm248_vm2, %v6081_v30  ;;  %5562 = vmatprep.mubr.msk.f32.mxu0 %vm248_vm2, %v6210_v59 }
  0xaa   : > { %5515 = vmatprep.mubr.msk.f32.mxu1 %vm248_vm2, %v6089_v32 }
  0xac   : > { %5563 = vmatmul.mubr.msk.f32.gmra.mrb[56].mxu0 %vm248_vm2, %v6224_v61 }
  0xad   : > { %5516 = vmatmul.mubr.msk.f32.gmra.mrb[58].mxu1 %vm248_vm2, %v6101_v34  ;;  %5565 = vmatprep.mubr.msk.f32.mxu0 %vm248_vm2, %v6230_v63 }
  0xae   : > { %5518 = vmatprep.mubr.msk.f32.mxu1 %vm248_vm2, %v6109_v36 }
  0xb0   : > { %5566 = vmatmul.mubr.msk.f32.gmra.mrb[58].mxu0 %vm248_vm2, %v6244_v1 }
  0xb1   : > { %5519 = vmatmul.mubr.msk.f32.gmra.mrb[60].mxu1 %vm248_vm2, %v6119_v38  ;;  %5568 = vmatprep.mubr.msk.f32.mxu0 %vm248_vm2, %v6250_v6 }
  0xb2   : > { %5521 = vmatprep.mubr.msk.f32.mxu1 %vm248_vm2, %v5959_v2 }
  0xb4   : > { %5569 = vmatmul.mubr.msk.f32.gmra.mrb[60].mxu0 %vm248_vm2, %v6264_v8 }
  0xb5   : > { %5522 = vmatmul.mubr.msk.f32.gmra.mrb[62].mxu1 %vm248_vm2, %v5962_v3  ;;  %5571 = vmatprep.mubr.msk.f32.mxu0 %vm248_vm2, %v6270_v21 }
  0xb6   : > { %5524 = vmatprep.mubr.msk.f32.mxu1 %vm248_vm2, %v5968_v5 }
  0xb8   : > { %5572 = vmatmul.mubr.msk.f32.gmra.mrb[62].mxu0 %vm248_vm2, %v6284_v39 }
  0xb9   : > { %5525 = vmatmul.mubr.msk.f32.gmra.mrb[64].mxu1 %vm248_vm2, %v5981_v9  ;;  %5574 = vmatprep.mubr.msk.f32.mxu0 %vm248_vm2, %v6290_v43 }
  0xba   : > { %5527 = vmatprep.mubr.msk.f32.mxu1 %vm248_vm2, %v5984_v10 }
  0xbc   : > { %5575 = vmatmul.mubr.msk.f32.gmra.mrb[64].mxu0 %vm248_vm2, %v6304_v7 }
  0xbd   : > { %5528 = vmatmul.mubr.msk.f32.gmra.mrb[66].mxu1 %vm248_vm2, %v6002_v13  ;;  %5577 = vmatprep.mubr.msk.f32.mxu0 %vm248_vm2, %v6310_v0 }
  0xbe   : > { %5530 = vmatprep.mubr.msk.f32.mxu1 %vm248_vm2, %v6010_v15 }
  0xc0   : > { %5578 = vmatmul.mubr.msk.f32.gmra.mrb[66].mxu0 %vm248_vm2, %v6324_v37 }
  0xc1   : > { %5531 = vmatmul.mubr.msk.f32.gmra.mrb[68].mxu1 %vm248_vm2, %v6024_v18  ;;  %5580 = vmatprep.mubr.msk.f32.mxu0 %vm248_vm2, %v6330_v60 }
  0xc2   : > { %5533 = vmatprep.mubr.msk.f32.mxu1 %vm248_vm2, %v6031_v20 }
  0xc4   : > { %5581 = vmatmul.mubr.msk.f32.gmra.mrb[68].mxu0 %vm248_vm2, %v6344_v17 }
  0xc5   : > { %5534 = vmatmul.mubr.msk.f32.gmra.mrb[70].mxu1 %vm248_vm2, %v6045_v23  ;;  %5583 = vmatprep.mubr.msk.f32.mxu0 %vm248_vm2, %v6350_v56  ;;  %v7405_v56 = vld [vmem:[#allocation10_spill] sm:$0xff] }
  0xc6   : > { %5536 = vmatprep.mubr.msk.f32.mxu1 %vm248_vm2, %v6052_v25 }
  0xc8   : > { %5584 = vmatmul.mubr.msk.f32.gmra.mrb[70].mxu0 %vm248_vm2, %v6364_v40  ;;  %v4883_v40 = vld [vmem:[%s5948_s17 + $0x198] sm:$0xff] }
  0xc9   : > { %5537 = vmatmul.mubr.msk.f32.gmra.mrb[72].mxu1 %vm248_vm2, %v6066_v27  ;;  %5586 = vmatprep.mubr.msk.f32.mxu0 %vm248_vm2, %v6370_v52  ;;  %v7403_v52 = vld [vmem:[#allocation8_spill] sm:$0xff] }
  0xca   : > { %5539 = vmatprep.mubr.msk.f32.mxu1 %vm248_vm2, %v6072_v29 }
  0xcc   : > { %5587 = vmatmul.mubr.msk.f32.gmra.mrb[72].mxu0 %vm248_vm2, %v6384_v4 }
  0xcd   : > { %5540 = vmatmul.mubr.msk.f32.gmra.mrb[74].mxu1 %vm248_vm2, %v6086_v31  ;;  %5589 = vmatprep.mubr.msk.f32.mxu0 %vm248_vm2, %v6390_v48  ;;  %v6588_v48 = vld [vmem:[%s5948_s17 + $0x189] sm:$0xff] }
  0xce   : > { %5542 = vmatprep.mubr.msk.f32.mxu1 %vm248_vm2, %v7401_v12 }
  0xd0   : > { %5590 = vmatmul.mubr.msk.f32.gmra.mrb[74].mxu0 %vm248_vm2, %v6404_v62  ;;  %v7407_v62 = vld [vmem:[#allocation12_spill] sm:$0xff] }
  0xd1   : > { %5543 = vmatmul.mubr.msk.f32.gmra.mrb[76].mxu1 %vm248_vm2, %v7402_v42  ;;  %5592 = vmatprep.mubr.msk.f32.mxu0 %vm248_vm2, %v6410_v35  ;;  %v7404_v35 = vld [vmem:[#allocation9_spill] sm:$0xff] }
  0xd2   : > { %5545 = vmatprep.mubr.msk.f32.mxu1 %vm248_vm2, %v6565_v41 }
  0xd4   : > { %5593 = vmatmul.mubr.msk.f32.gmra.mrb[76].mxu0 %vm248_vm2, %v6424_v58  ;;  %v7406_v58 = vld [vmem:[#allocation11_spill] sm:$0xff] }
  0xd5   : > { %5546 = vmatmul.mubr.msk.f32.gmra.mrb[78].mxu1 %vm248_vm2, %v6576_v44  ;;  %5595 = vmatprep.mubr.msk.f32.mxu0 %vm248_vm2, %v6579_v47 }
  0xd6   : > { %5600 = vmatprep.mubr.msk.f32.mxu1 %vm248_vm2, %v7403_v52 }
  0xd8   : > { %5596 = vmatmul.mubr.msk.f32.gmra.mrb[78].mxu0 %vm248_vm2, %v6588_v48 }
  0xd9   : > { %5601 = vmatmul.mubr.msk.f32.vlgmr.msra.gmra.mrb[80].mxu1 %vm248_vm2, %v7404_v35  ;;  %5650 = vmatprep.mubr.msk.f32.mxu0 %vm248_vm2, %v6007_v14  ;;  %v7408_v14 = vld [vmem:[#allocation13_spill] sm:$0xff] }
  0xda   : > { %5699 = vmatpush3.msk.msra.mxu1 %vm345_vm1, %v6442_v46  ;;  %5603 = vmatprep.mubr.msk.f32.mxu1 %vm248_vm2, %v7405_v56  ;;  %v7410_v46 = vld [vmem:[#allocation15_spill] sm:$0xff] }
  0xdc   : > { %5651 = vmatmul.mubr.msk.f32.vlgmr.msra.gmra.mrb[80].mxu0 %vm248_vm2, %v6019_v16  ;;  %v7409_v16 = vld [vmem:[#allocation14_spill] sm:$0xff] }
  0xdd   : > { %5604 = vmatmul.mubr.msk.f32.gmra.mrb[82].mxu1 %vm248_vm2, %v7406_v58  ;;  %5749 = vmatpush3.msk.msra.mxu0 %vm345_vm1, %v6456_v11 }
  0xde   : > { %5606 = vmatprep.mubr.msk.f32.mxu1 %vm248_vm2, %v7407_v62  ;;  %5653 = vmatprep.mubr.msk.f32.mxu0 %vm248_vm2, %v6027_v19  ;;  %v7411_v19 = vld [vmem:[#allocation16_spill] sm:$0xff] }
  0xe0   : > { %5654 = vmatmul.mubr.msk.f32.gmra.mrb[82].mxu0 %vm248_vm2, %v6040_v22  ;;  %v7412_v22 = vld [vmem:[#allocation17_spill] sm:$0xff] }
  0xe1   : > { %5607 = vmatmul.mubr.msk.f32.gmra.mrb[84].mxu1 %vm248_vm2, %v7408_v14  ;;  %5656 = vmatprep.mubr.msk.f32.mxu0 %vm248_vm2, %v6048_v24  ;;  %v7413_v24 = vld [vmem:[#allocation18_spill] sm:$0xff] }
  0xe2   : > { %5609 = vmatprep.mubr.msk.f32.mxu1 %vm248_vm2, %v7409_v16 }
  0xe4   : > { %5657 = vmatmul.mubr.msk.f32.gmra.mrb[84].mxu0 %vm248_vm2, %v6061_v26  ;;  %v7414_v26 = vld [vmem:[#allocation19_spill] sm:$0xff] }
  0xe5   : > { %5610 = vmatmul.mubr.msk.f32.gmra.mrb[86].mxu1 %vm248_vm2, %v7410_v46  ;;  %5659 = vmatprep.mubr.msk.f32.mxu0 %vm248_vm2, %v6069_v28  ;;  %v7415_v28 = vld [vmem:[#allocation20_spill] sm:$0xff] }
  0xe6   : > { %5612 = vmatprep.mubr.msk.f32.mxu1 %vm248_vm2, %v7411_v19 }
  0xe8   : > { %5660 = vmatmul.mubr.msk.f32.gmra.mrb[86].mxu0 %vm248_vm2, %v6081_v30  ;;  %v7416_v30 = vld [vmem:[#allocation21_spill] sm:$0xff] }
  0xe9   : > { %5613 = vmatmul.mubr.msk.f32.gmra.mrb[88].mxu1 %vm248_vm2, %v7412_v22  ;;  %5662 = vmatprep.mubr.msk.f32.mxu0 %vm248_vm2, %v6089_v32  ;;  %v7417_v32 = vld [vmem:[#allocation22_spill] sm:$0xff] }
  0xea   : > { %5615 = vmatprep.mubr.msk.f32.mxu1 %vm248_vm2, %v7413_v24 }
  0xec   : > { %5663 = vmatmul.mubr.msk.f32.gmra.mrb[88].mxu0 %vm248_vm2, %v6101_v34  ;;  %v7418_v34 = vld [vmem:[#allocation23_spill] sm:$0xff] }
  0xed   : > { %5616 = vmatmul.mubr.msk.f32.gmra.mrb[90].mxu1 %vm248_vm2, %v7414_v26  ;;  %5665 = vmatprep.mubr.msk.f32.mxu0 %vm248_vm2, %v6109_v36  ;;  %v7419_v36 = vld [vmem:[#allocation24_spill] sm:$0xff] }
  0xee   : > { %5618 = vmatprep.mubr.msk.f32.mxu1 %vm248_vm2, %v7415_v28 }
  0xf0   : > { %5666 = vmatmul.mubr.msk.f32.gmra.mrb[90].mxu0 %vm248_vm2, %v6119_v38  ;;  %v7420_v38 = vld [vmem:[#allocation25_spill] sm:$0xff] }
  0xf1   : > { %5619 = vmatmul.mubr.msk.f32.gmra.mrb[92].mxu1 %vm248_vm2, %v7416_v30  ;;  %5668 = vmatprep.mubr.msk.f32.mxu0 %vm248_vm2, %v5959_v2  ;;  %v7421_v2 = vld [vmem:[#allocation26_spill] sm:$0xff] }
  0xf2   : > { %5621 = vmatprep.mubr.msk.f32.mxu1 %vm248_vm2, %v7417_v32 }
  0xf4   : > { %5669 = vmatmul.mubr.msk.f32.gmra.mrb[92].mxu0 %vm248_vm2, %v5962_v3  ;;  %v7422_v3 = vld [vmem:[#allocation27_spill] sm:$0xff] }
  0xf5   : > { %5622 = vmatmul.mubr.msk.f32.gmra.mrb[94].mxu1 %vm248_vm2, %v7418_v34  ;;  %5671 = vmatprep.mubr.msk.f32.mxu0 %vm248_vm2, %v5968_v5  ;;  %v7423_v5 = vld [vmem:[#allocation28_spill] sm:$0xff] }
  0xf6   : > { %5624 = vmatprep.mubr.msk.f32.mxu1 %vm248_vm2, %v7419_v36 }
  0xf8   : > { %5672 = vmatmul.mubr.msk.f32.gmra.mrb[94].mxu0 %vm248_vm2, %v5981_v9  ;;  %v7424_v9 = vld [vmem:[#allocation29_spill] sm:$0xff] }
  0xf9   : > { %5625 = vmatmul.mubr.msk.f32.gmra.mrb[96].mxu1 %vm248_vm2, %v7420_v38  ;;  %5674 = vmatprep.mubr.msk.f32.mxu0 %vm248_vm2, %v5984_v10  ;;  %v7425_v10 = vld [vmem:[#allocation30_spill] sm:$0xff] }
  0xfa   : > { %5627 = vmatprep.mubr.msk.f32.mxu1 %vm248_vm2, %v7421_v2 }
  0xfc   : > { %5675 = vmatmul.mubr.msk.f32.gmra.mrb[96].mxu0 %vm248_vm2, %v6002_v13  ;;  %v7426_v13 = vld [vmem:[#allocation31_spill] sm:$0xff] }
  0xfd   : > { %5628 = vmatmul.mubr.msk.f32.gmra.mrb[98].mxu1 %vm248_vm2, %v7422_v3  ;;  %5677 = vmatprep.mubr.msk.f32.mxu0 %vm248_vm2, %v6010_v15  ;;  %v7427_v15 = vld [vmem:[#allocation32_spill] sm:$0xff] }
  0xfe   : > { %5630 = vmatprep.mubr.msk.f32.mxu1 %vm248_vm2, %v7423_v5 }
 0x100   : > { %5678 = vmatmul.mubr.msk.f32.gmra.mrb[98].mxu0 %vm248_vm2, %v6024_v18  ;;  %v7428_v18 = vld [vmem:[#allocation33_spill] sm:$0xff] }
 0x101   : > { %5631 = vmatmul.mubr.msk.f32.gmra.mrb[100].mxu1 %vm248_vm2, %v7424_v9  ;;  %5680 = vmatprep.mubr.msk.f32.mxu0 %vm248_vm2, %v6031_v20  ;;  %v7429_v20 = vld [vmem:[#allocation34_spill] sm:$0xff] }
 0x102   : > { %5633 = vmatprep.mubr.msk.f32.mxu1 %vm248_vm2, %v7425_v10 }
 0x104   : > { %5681 = vmatmul.mubr.msk.f32.gmra.mrb[100].mxu0 %vm248_vm2, %v6045_v23 }
 0x105   : > { %5634 = vmatmul.mubr.msk.f32.gmra.mrb[102].mxu1 %vm248_vm2, %v7426_v13  ;;  %5683 = vmatprep.mubr.msk.f32.mxu0 %vm248_vm2, %v6052_v25 }
 0x106   : > { %5636 = vmatprep.mubr.msk.f32.mxu1 %vm248_vm2, %v7427_v15 }
 0x108   : > { %5684 = vmatmul.mubr.msk.f32.gmra.mrb[102].mxu0 %vm248_vm2, %v6066_v27  ;;  %v6711_v27 = vld [vmem:[%s5948_s17 + $0x182] sm:$0xff] }
 0x109   : > { %5637 = vmatmul.mubr.msk.f32.gmra.mrb[104].mxu1 %vm248_vm2, %v7428_v18  ;;  %5686 = vmatprep.mubr.msk.f32.mxu0 %vm248_vm2, %v6072_v29 }
 0x10a   : > { %5639 = vmatprep.mubr.msk.f32.mxu1 %vm248_vm2, %v7429_v20 }
 0x10c   : > { %v5376_v23 = vpop.f32.mrb[0].mxu1  ;;  %5687 = vmatmul.mubr.msk.f32.gmra.mrb[104].mxu0 %vm248_vm2, %v6086_v31 }
 0x10d   : > { %592 = vst.msk [vmem:[#allocation2 + $0x88] sm:$0xff] %vm574_vm3, %v5376_v23  ;;  %v495_v25 = vpop.f32.mrb[1].mxu1  ;;  %5640 = vmatmul.mubr.msk.f32.gmra.mrb[106].mxu1 %vm248_vm2, %v6419_v50  ;;  %5689 = vmatprep.mubr.msk.f32.mxu0 %vm248_vm2, %v7401_v12 }
 0x10e   : > { %591 = vst.msk [vmem:[#allocation2 + $0x80] sm:$0xff] %vm574_vm3, %v495_v25  ;;  %5642 = vmatprep.mubr.msk.f32.mxu1 %vm248_vm2, %v6427_v33  ;;  %v6726_v33 = vld [vmem:[%s5948_s17 + $0x18a] sm:$0xff] }
 0x10f   : > { %v5352_v29 = vpop.f32.mrb[0].mxu0 }
 0x110   : > { %v5379_v31 = vpop.f32.mrb[2].mxu1  ;;  %576 = vst.msk [vmem:[#allocation2 + $0x8] sm:$0xff] %vm574_vm3, %v5352_v29  ;;  %v415_v4 = vpop.f32.mrb[1].mxu0  ;;  %5690 = vmatmul.mubr.msk.f32.gmra.mrb[106].mxu0 %vm248_vm2, %v7402_v42 }
 0x111   : > { %594 = vst.msk [vmem:[#allocation2 + $0x98] sm:$0xff] %vm574_vm3, %v5379_v31  ;;  %v505_v50 = vpop.f32.mrb[3].mxu1  ;;  %5643 = vmatmul.mubr.msk.f32.gmra.mrb[108].mxu1 %vm248_vm2, %v6436_v54  ;;  %575 = vst.msk [vmem:[#allocation2] sm:$0xff] %vm574_vm3, %v415_v4  ;;  %5692 = vmatprep.mubr.msk.f32.mxu0 %vm248_vm2, %v6565_v41  ;;  %v4884_v41 = vld [vmem:[%s5948_s17 + $0x1a0] sm:$0xff] }
 0x112   : > { %593 = vst.msk [vmem:[#allocation2 + $0x90] sm:$0xff] %vm574_vm3, %v505_v50  ;;  %5645 = vmatprep.mubr.msk.f32.mxu1 %vm248_vm2, %v6711_v27  ;;  %v4999_v50 = vld [vmem:[%s5948_s17 + $0xf2] sm:$0xff] }
 0x113   : > { %v5355_v11 = vpop.f32.mrb[2].mxu0 }
 0x114   : > { %v5382_v12 = vpop.f32.mrb[4].mxu1  ;;  %578 = vst.msk [vmem:[#allocation2 + $0x18] sm:$0xff] %vm574_vm3, %v5355_v11  ;;  %v425_v42 = vpop.f32.mrb[3].mxu0  ;;  %5693 = vmatmul.mubr.msk.f32.gmra.mrb[108].mxu0 %vm248_vm2, %v6576_v44 }
 0x115   : > { %596 = vst.msk [vmem:[#allocation2 + $0xa8] sm:$0xff] %vm574_vm3, %v5382_v12  ;;  %v515_v54 = vpop.f32.mrb[5].mxu1  ;;  %5646 = vmatmul.mubr.msk.f32.gmra.mrb[110].mxu1 %vm248_vm2, %v6726_v33  ;;  %577 = vst.msk [vmem:[#allocation2 + $0x10] sm:$0xff] %vm574_vm3, %v425_v42  ;;  %5695 = vmatprep.mubr.msk.f32.mxu0 %vm248_vm2, %v4883_v40 }
 0x116   : > { %595 = vst.msk [vmem:[#allocation2 + $0xa0] sm:$0xff] %vm574_vm3, %v515_v54  ;;  %5700 = vmatprep.mubr.msk.f32.mxu1 %vm248_vm2, %v6141_v45 }
 0x117   : > { %v5358_v52 = vpop.f32.mrb[4].mxu0  ;;  %v966_v9 = vld [vmem:[#allocation2 + $0x8] sm:$0xff] }
 0x118   : > { %v5385_v35 = vpop.f32.mrb[6].mxu1  ;;  %580 = vst.msk [vmem:[#allocation2 + $0x28] sm:$0xff] %vm574_vm3, %v5358_v52  ;;  %v435_v44 = vpop.f32.mrb[5].mxu0  ;;  %5696 = vmatmul.mubr.msk.f32.gmra.mrb[110].mxu0 %vm248_vm2, %v4884_v41  ;;  %v965_v13 = vld [vmem:[#allocation2] sm:$0xff] }
 0x119   : > { %598 = vst.msk [vmem:[#allocation2 + $0xb8] sm:$0xff] %vm574_vm3, %v5385_v35  ;;  %v525_v2 = vpop.f32.mrb[7].mxu1  ;;  %5701 = vmatmul.mubr.msk.f32.vlgmr.msra.gmra.mrb[112].mxu1 %vm248_vm2, %v6160_v49  ;;  %579 = vst.msk [vmem:[#allocation2 + $0x20] sm:$0xff] %vm574_vm3, %v435_v44  ;;  %5750 = vmatprep.mubr.msk.f32.mxu0 %vm248_vm2, %v7405_v56  ;;  %v5000_v52 = vld [vmem:[%s5948_s17 + $0xfa] sm:$0xff] }
 0x11a   : > { %597 = vst.msk [vmem:[#allocation2 + $0xb0] sm:$0xff] %vm574_vm3, %v525_v2  ;;  %5703 = vmatprep.mubr.msk.f32.mxu1 %vm248_vm2, %v6168_v51 }
 0x11b   : > { %v5361_v45 = vpop.f32.mrb[6].mxu0  ;;  %v968_v15 = vld [vmem:[#allocation2 + $0x18] sm:$0xff] }
 0x11c   : > { %v5388_v3 = vpop.f32.mrb[8].mxu1  ;;  %582 = vst.msk [vmem:[#allocation2 + $0x38] sm:$0xff] %vm574_vm3, %v5361_v45  ;;  %v445_v5 = vpop.f32.mrb[7].mxu0  ;;  %5751 = vmatmul.mubr.msk.f32.vlgmr.msra.gmra.mrb[112].mxu0 %vm248_vm2, %v7406_v58  ;;  %v967_v23 = vld [vmem:[#allocation2 + $0x10] sm:$0xff] }
 0x11d   : > { %600 = vst.msk [vmem:[#allocation2 + $0xc8] sm:$0xff] %vm574_vm3, %v5388_v3  ;;  %v535_v49 = vpop.f32.mrb[9].mxu1  ;;  %5704 = vmatmul.mubr.msk.f32.gmra.mrb[114].mxu1 %vm248_vm2, %v6184_v53  ;;  %581 = vst.msk [vmem:[#allocation2 + $0x30] sm:$0xff] %vm574_vm3, %v445_v5  ;;  %5753 = vmatprep.mubr.msk.f32.mxu0 %vm248_vm2, %v7407_v62  ;;  %v4938_v3 = vld [vmem:[%s5948_s17 + $0x121] sm:$0xff] }
 0x11e   : > { %599 = vst.msk [vmem:[#allocation2 + $0xc0] sm:$0xff] %vm574_vm3, %v535_v49  ;;  %5706 = vmatprep.mubr.msk.f32.mxu1 %vm248_vm2, %v6190_v55 }
 0x11f   : > { %v5364_v51 = vpop.f32.mrb[8].mxu0  ;;  %v970_v25 = vld [vmem:[#allocation2 + $0x28] sm:$0xff] }
 0x120   : > { %v5391_v56 = vpop.f32.mrb[10].mxu1  ;;  %584 = vst.msk [vmem:[#allocation2 + $0x48] sm:$0xff] %vm574_vm3, %v5364_v51  ;;  %v455_v58 = vpop.f32.mrb[9].mxu0  ;;  %5754 = vmatmul.mubr.msk.f32.gmra.mrb[114].mxu0 %vm248_vm2, %v7408_v14  ;;  %v969_v4 = vld [vmem:[#allocation2 + $0x20] sm:$0xff] }
 0x121   : > { %602 = vst.msk [vmem:[#allocation2 + $0xd8] sm:$0xff] %vm574_vm3, %v5391_v56  ;;  %v545_v53 = vpop.f32.mrb[11].mxu1  ;;  %5707 = vmatmul.mubr.msk.f32.gmra.mrb[116].mxu1 %vm248_vm2, %v6204_v57  ;;  %583 = vst.msk [vmem:[#allocation2 + $0x40] sm:$0xff] %vm574_vm3, %v455_v58  ;;  %5756 = vmatprep.mubr.msk.f32.mxu0 %vm248_vm2, %v7409_v16 }
 0x122   : > { %601 = vst.msk [vmem:[#allocation2 + $0xd0] sm:$0xff] %vm574_vm3, %v545_v53  ;;  %5709 = vmatprep.mubr.msk.f32.mxu1 %vm248_vm2, %v6210_v59 }
 0x123   : > { %v5367_v55 = vpop.f32.mrb[10].mxu0  ;;  %v972_v42 = vld [vmem:[#allocation2 + $0x38] sm:$0xff] }
 0x124   : > { %v5394_v62 = vpop.f32.mrb[12].mxu1  ;;  %586 = vst.msk [vmem:[#allocation2 + $0x58] sm:$0xff] %vm574_vm3, %v5367_v55  ;;  %v465_v14 = vpop.f32.mrb[11].mxu0  ;;  %5757 = vmatmul.mubr.msk.f32.gmra.mrb[116].mxu0 %vm248_vm2, %v7410_v46  ;;  %v971_v41 = vld [vmem:[#allocation2 + $0x30] sm:$0xff] }
 0x125   : > { %604 = vst.msk [vmem:[#allocation2 + $0xe8] sm:$0xff] %vm574_vm3, %v5394_v62  ;;  %v555_v57 = vpop.f32.mrb[13].mxu1  ;;  %5710 = vmatmul.mubr.msk.f32.gmra.mrb[118].mxu1 %vm248_vm2, %v6224_v61  ;;  %585 = vst.msk [vmem:[#allocation2 + $0x50] sm:$0xff] %vm574_vm3, %v465_v14  ;;  %5759 = vmatprep.mubr.msk.f32.mxu0 %vm248_vm2, %v7411_v19  ;;  %v5002_v55 = vld [vmem:[%s5948_s17 + $0x112] sm:$0xff] }
 0x126   : > { %603 = vst.msk [vmem:[#allocation2 + $0xe0] sm:$0xff] %vm574_vm3, %v555_v57  ;;  %5712 = vmatprep.mubr.msk.f32.mxu1 %vm248_vm2, %v6230_v63  ;;  %v4939_v57 = vld [vmem:[%s5948_s17 + $0x129] sm:$0xff] }
 0x127   : > { %v5370_v59 = vpop.f32.mrb[12].mxu0  ;;  %v974_v51 = vld [vmem:[#allocation2 + $0x48] sm:$0xff] }
 0x128   : > { %v5397_v16 = vpop.f32.mrb[14].mxu1  ;;  %588 = vst.msk [vmem:[#allocation2 + $0x68] sm:$0xff] %vm574_vm3, %v5370_v59  ;;  %v475_v46 = vpop.f32.mrb[13].mxu0  ;;  %5760 = vmatmul.mubr.msk.f32.gmra.mrb[118].mxu0 %vm248_vm2, %v7412_v22  ;;  %v973_v53 = vld [vmem:[#allocation2 + $0x40] sm:$0xff] }
 0x129   : > { %606 = vst.msk [vmem:[#allocation2 + $0xf8] sm:$0xff] %vm574_vm3, %v5397_v16  ;;  %v565_v61 = vpop.f32.mrb[15].mxu1  ;;  %5713 = vmatmul.mubr.msk.f32.gmra.mrb[120].mxu1 %vm248_vm2, %v6244_v1  ;;  %587 = vst.msk [vmem:[#allocation2 + $0x60] sm:$0xff] %vm574_vm3, %v475_v46  ;;  %5762 = vmatprep.mubr.msk.f32.mxu0 %vm248_vm2, %v7413_v24  ;;  %v5003_v59 = vld [vmem:[%s5948_s17 + $0x122] sm:$0xff] }
 0x12a   : > { %605 = vst.msk [vmem:[#allocation2 + $0xf0] sm:$0xff] %vm574_vm3, %v565_v61  ;;  %5715 = vmatprep.mubr.msk.f32.mxu1 %vm248_vm2, %v6250_v6  ;;  %v4940_v61 = vld [vmem:[%s5948_s17 + $0x139] sm:$0xff] }
 0x12b   : > { %v5373_v63 = vpop.f32.mrb[14].mxu0 }
 0x12c   : > { %v5402_v19 = vpop.f32.mrb[16].mxu1  ;;  %590 = vst.msk [vmem:[#allocation2 + $0x78] sm:$0xff] %vm574_vm3, %v5373_v63  ;;  %v485_v22 = vpop.f32.mrb[15].mxu0  ;;  %5763 = vmatmul.mubr.msk.f32.gmra.mrb[120].mxu0 %vm248_vm2, %v7414_v26 }
 0x12d   : > { %v998_v1 = vadd.f32 %v5402_v19, %v966_v9  ;;  %v806_v10 = vpop.f32.mrb[17].mxu1  ;;  %5716 = vmatmul.mubr.msk.f32.gmra.mrb[122].mxu1 %vm248_vm2, %v6264_v8  ;;  %589 = vst.msk [vmem:[#allocation2 + $0x70] sm:$0xff] %vm574_vm3, %v485_v22  ;;  %5765 = vmatprep.mubr.msk.f32.mxu0 %vm248_vm2, %v7415_v28  ;;  %v976_v9 = vld [vmem:[#allocation2 + $0x58] sm:$0xff] }
 0x12e   : > { %v997_v6 = vadd.f32 %v965_v13, %v806_v10  ;;  %5718 = vmatprep.mubr.msk.f32.mxu1 %vm248_vm2, %v6270_v21  ;;  %v975_v13 = vld [vmem:[#allocation2 + $0x50] sm:$0xff] }
 0x12f   : > { %1030 = vst.msk [vmem:[#allocation2 + $0x8] sm:$0xff] %vm574_vm3, %v998_v1  ;;  %v5452_v24 = vpop.f32.mrb[16].mxu0 }
 0x130   : > { %1029 = vst.msk [vmem:[#allocation2] sm:$0xff] %vm574_vm3, %v997_v6  ;;  %v5405_v26 = vpop.f32.mrb[18].mxu1  ;;  %v1260_v18 = vpop.f32.mrb[17].mxu0  ;;  %5766 = vmatmul.mubr.msk.f32.gmra.mrb[122].mxu0 %vm248_vm2, %v7416_v30  ;;  %v5004_v6 = vld [vmem:[%s5948_s17 + $0x12a] sm:$0xff] }
 0x131   : > { %v1000_v8 = vadd.f32 %v5405_v26, %v968_v15  ;;  %v816_v20 = vpop.f32.mrb[19].mxu1  ;;  %5719 = vmatmul.mubr.msk.f32.gmra.mrb[124].mxu1 %vm248_vm2, %v6284_v39  ;;  %5768 = vmatprep.mubr.msk.f32.mxu0 %vm248_vm2, %v7417_v32  ;;  %v4941_v15 = vld [vmem:[%s5948_s17 + $0x141] sm:$0xff] }
 0x132   : > { %v999_v21 = vadd.f32 %v967_v23, %v816_v20  ;;  %5721 = vmatprep.mubr.msk.f32.mxu1 %vm248_vm2, %v6290_v43  ;;  %v4942_v23 = vld [vmem:[%s5948_s17 + $0x151] sm:$0xff] }
 0x133   : > { %1032 = vst.msk [vmem:[#allocation2 + $0x18] sm:$0xff] %vm574_vm3, %v1000_v8  ;;  %v5455_v28 = vpop.f32.mrb[18].mxu0 }
 0x134   : > { %1031 = vst.msk [vmem:[#allocation2 + $0x10] sm:$0xff] %vm574_vm3, %v999_v21  ;;  %v5408_v30 = vpop.f32.mrb[20].mxu1  ;;  %v1270_v29 = vpop.f32.mrb[19].mxu0  ;;  %5769 = vmatmul.mubr.msk.f32.gmra.mrb[124].mxu0 %vm248_vm2, %v7418_v34 }
 0x135   : > { %v1002_v39 = vadd.f32 %v5408_v30, %v970_v25  ;;  %v826_v31 = vpop.f32.mrb[21].mxu1  ;;  %5722 = vmatmul.mubr.msk.f32.gmra.mrb[126].mxu1 %vm248_vm2, %v6304_v7  ;;  %5771 = vmatprep.mubr.msk.f32.mxu0 %vm248_vm2, %v7419_v36  ;;  %v978_v25 = vld [vmem:[#allocation2 + $0x68] sm:$0xff] }
 0x136   : > { %v1001_v43 = vadd.f32 %v969_v4, %v826_v31  ;;  %v1420_v32 = vld [vmem:[#allocation2 + $0x8] sm:$0xff]  ;;  %5724 = vmatprep.mubr.msk.f32.mxu1 %vm248_vm2, %v6310_v0  ;;  %v977_v4 = vld [vmem:[#allocation2 + $0x60] sm:$0xff] }
 0x137   : > { %1034 = vst.msk [vmem:[#allocation2 + $0x28] sm:$0xff] %vm574_vm3, %v1002_v39  ;;  %v1452_v40 = vadd.f32 %v5452_v24, %v1420_v32  ;;  %v1419_v34 = vld [vmem:[#allocation2] sm:$0xff]  ;;  %v5458_v11 = vpop.f32.mrb[20].mxu0 }
 0x138   : > { %1033 = vst.msk [vmem:[#allocation2 + $0x20] sm:$0xff] %vm574_vm3, %v1001_v43  ;;  %v1451_v12 = vadd.f32 %v1419_v34, %v1260_v18  ;;  %v5411_v7 = vpop.f32.mrb[22].mxu1  ;;  %v1280_v54 = vpop.f32.mrb[21].mxu0  ;;  %5772 = vmatmul.mubr.msk.f32.gmra.mrb[126].mxu0 %vm248_vm2, %v7420_v38  ;;  %v5001_v38 = vld [vmem:[%s5948_s17 + $0x10a] sm:$0xff]  ;;  %v5005_v18 = vld [vmem:[%s5948_s17 + $0x13a] sm:$0xff]  ;;  %v5006_v43 = vld [vmem:[%s5948_s17 + $0x142] sm:$0xff] }
 0x139   : > { %1484 = vst.msk [vmem:[#allocation2 + $0x8] sm:$0xff] %vm574_vm3, %v1452_v40  ;;  %v1004_v0 = vadd.f32 %v5411_v7, %v972_v42  ;;  %v836_v36 = vpop.f32.mrb[23].mxu1  ;;  %5725 = vmatmul.mubr.msk.f32.gmra.mrb[128].mxu1 %vm248_vm2, %v6324_v37  ;;  %5774 = vmatprep.mubr.msk.f32.mxu0 %vm248_vm2, %v4999_v50  ;;  %v4943_v40 = vld [vmem:[%s5948_s17 + $0x159] sm:$0xff]  ;;  %v4944_v7 = vld [vmem:[%s5948_s17 + $0x169] sm:$0xff] }
 0x13a   : > { %1483 = vst.msk [vmem:[#allocation2] sm:$0xff] %vm574_vm3, %v1451_v12  ;;  %v1003_v35 = vadd.f32 %v971_v41, %v836_v36  ;;  %v1422_v44 = vld [vmem:[#allocation2 + $0x18] sm:$0xff]  ;;  %5727 = vmatprep.mubr.msk.f32.mxu1 %vm248_vm2, %v6330_v60 }
 0x13b   : > { %1036 = vst.msk [vmem:[#allocation2 + $0x38] sm:$0xff] %vm574_vm3, %v1004_v0  ;;  %v1454_v2 = vadd.f32 %v5455_v28, %v1422_v44  ;;  %v1421_v45 = vld [vmem:[#allocation2 + $0x10] sm:$0xff]  ;;  %v5461_v5 = vpop.f32.mrb[22].mxu0  ;;  %v980_v36 = vld [vmem:[#allocation2 + $0x78] sm:$0xff] }
 0x13c   : > { %1035 = vst.msk [vmem:[#allocation2 + $0x30] sm:$0xff] %vm574_vm3, %v1003_v35  ;;  %v1453_v37 = vadd.f32 %v1421_v45, %v1270_v29  ;;  %v5414_v49 = vpop.f32.mrb[24].mxu1  ;;  %v1290_v56 = vpop.f32.mrb[23].mxu0  ;;  %5775 = vmatmul.mubr.msk.f32.gmra.mrb[128].mxu0 %vm248_vm2, %v5000_v52  ;;  %v5007_v34 = vld [vmem:[%s5948_s17 + $0x152] sm:$0xff] }
 0x13d   : > { %1486 = vst.msk [vmem:[#allocation2 + $0x18] sm:$0xff] %vm574_vm3, %v1454_v2  ;;  %v1006_v60 = vadd.f32 %v5414_v49, %v974_v51  ;;  %v846_v58 = vpop.f32.mrb[25].mxu1  ;;  %5728 = vmatmul.mubr.msk.f32.gmra.mrb[130].mxu1 %vm248_vm2, %v6344_v17  ;;  %5777 = vmatprep.mubr.msk.f32.mxu0 %vm248_vm2, %v5001_v38  ;;  %v979_v44 = vld [vmem:[#allocation2 + $0x70] sm:$0xff]  ;;  %v5008_v38 = vld [vmem:[%s5948_s17 + $0x15a] sm:$0xff] }
 0x13e   : > { %1485 = vst.msk [vmem:[#allocation2 + $0x10] sm:$0xff] %vm574_vm3, %v1453_v37  ;;  %v1005_v62 = vadd.f32 %v973_v53, %v846_v58  ;;  %v1424_v14 = vld [vmem:[#allocation2 + $0x28] sm:$0xff]  ;;  %5730 = vmatprep.mubr.msk.f32.mxu1 %vm248_vm2, %v4938_v3  ;;  %v4945_v3 = vld [vmem:[%s5948_s17 + $0x171] sm:$0xff] }
 0x13f   : > { %1038 = vst.msk [vmem:[#allocation2 + $0x48] sm:$0xff] %vm574_vm3, %v1006_v60  ;;  %v1456_v16 = vadd.f32 %v5458_v11, %v1424_v14  ;;  %v1423_v46 = vld [vmem:[#allocation2 + $0x20] sm:$0xff]  ;;  %v5464_v63 = vpop.f32.mrb[24].mxu0  ;;  %v982_v58 = vld [vmem:[#allocation2 + $0x88] sm:$0xff] }
 0x140   : > { %1037 = vst.msk [vmem:[#allocation2 + $0x40] sm:$0xff] %vm574_vm3, %v1005_v62  ;;  %v1455_v17 = vadd.f32 %v1423_v46, %v1280_v54  ;;  %v5417_v19 = vpop.f32.mrb[26].mxu1  ;;  %v1300_v22 = vpop.f32.mrb[25].mxu0  ;;  %5778 = vmatmul.mubr.msk.f32.gmra.mrb[130].mxu0 %vm248_vm2, %v5002_v55  ;;  %v981_v14 = vld [vmem:[#allocation2 + $0x80] sm:$0xff] }
 0x141   : > { %1488 = vst.msk [vmem:[#allocation2 + $0x28] sm:$0xff] %vm574_vm3, %v1456_v16  ;;  %v1008_v1 = vadd.f32 %v5417_v19, %v976_v9  ;;  %v856_v10 = vpop.f32.mrb[27].mxu1  ;;  %5731 = vmatmul.mubr.msk.f32.gmra.mrb[132].mxu1 %vm248_vm2, %v4939_v57  ;;  %5780 = vmatprep.mubr.msk.f32.mxu0 %vm248_vm2, %v5003_v59  ;;  %v5010_v57 = vld [vmem:[%s5948_s17 + $0x172] sm:$0xff] }
 0x142   : > { %1487 = vst.msk [vmem:[#allocation2 + $0x20] sm:$0xff] %vm574_vm3, %v1455_v17  ;;  %v1007_v24 = vadd.f32 %v975_v13, %v856_v10  ;;  %v1426_v26 = vld [vmem:[#allocation2 + $0x38] sm:$0xff]  ;;  %5733 = vmatprep.mubr.msk.f32.mxu1 %vm248_vm2, %v4940_v61  ;;  %v983_v13 = vld [vmem:[#allocation2 + $0x90] sm:$0xff] }
 0x143   : > { %1040 = vst.msk [vmem:[#allocation2 + $0x58] sm:$0xff] %vm574_vm3, %v1008_v1  ;;  %v1458_v8 = vadd.f32 %v5461_v5, %v1426_v26  ;;  %v1425_v20 = vld [vmem:[#allocation2 + $0x30] sm:$0xff]  ;;  %v5467_v21 = vpop.f32.mrb[26].mxu0  ;;  %v4949_v26 = vld [vmem:[%s5948_s17 + $0x1a1] sm:$0xff] }
 0x144   : > { %1039 = vst.msk [vmem:[#allocation2 + $0x50] sm:$0xff] %vm574_vm3, %v1007_v24  ;;  %v1457_v28 = vadd.f32 %v1425_v20, %v1290_v56  ;;  %v5420_v30 = vpop.f32.mrb[28].mxu1  ;;  %v1310_v29 = vpop.f32.mrb[27].mxu0  ;;  %5781 = vmatmul.mubr.msk.f32.gmra.mrb[132].mxu0 %vm248_vm2, %v5004_v6  ;;  %v5009_v5 = vld [vmem:[%s5948_s17 + $0x16a] sm:$0xff] }
 0x145   : > { %1490 = vst.msk [vmem:[#allocation2 + $0x38] sm:$0xff] %vm574_vm3, %v1458_v8  ;;  %v1010_v39 = vadd.f32 %v5420_v30, %v978_v25  ;;  %v866_v31 = vpop.f32.mrb[29].mxu1  ;;  %5734 = vmatmul.mubr.msk.f32.gmra.mrb[134].mxu1 %vm248_vm2, %v4941_v15  ;;  %5783 = vmatprep.mubr.msk.f32.mxu0 %vm248_vm2, %v5005_v18  ;;  %v5013_v15 = vld [vmem:[%s5948_s17 + $0x19a] sm:$0xff] }
 0x146   : > { %1489 = vst.msk [vmem:[#allocation2 + $0x30] sm:$0xff] %vm574_vm3, %v1457_v28  ;;  %v1009_v32 = vadd.f32 %v977_v4, %v866_v31  ;;  %v1428_v50 = vld [vmem:[#allocation2 + $0x48] sm:$0xff]  ;;  %5736 = vmatprep.mubr.msk.f32.mxu1 %vm248_vm2, %v4942_v23  ;;  %v985_v25 = vld [vmem:[#allocation2 + $0xa0] sm:$0xff] }
 0x147   : > { %1042 = vst.msk [vmem:[#allocation2 + $0x68] sm:$0xff] %vm574_vm3, %v1010_v39  ;;  %v1460_v11 = vadd.f32 %v5464_v63, %v1428_v50  ;;  %v1427_v12 = vld [vmem:[#allocation2 + $0x40] sm:$0xff]  ;;  %v5470_v42 = vpop.f32.mrb[28].mxu0 }
 0x148   : > { %1041 = vst.msk [vmem:[#allocation2 + $0x60] sm:$0xff] %vm574_vm3, %v1009_v32  ;;  %v1459_v54 = vadd.f32 %v1427_v12, %v1300_v22  ;;  %v5423_v0 = vpop.f32.mrb[30].mxu1  ;;  %v1320_v41 = vpop.f32.mrb[29].mxu0  ;;  %5784 = vmatmul.mubr.msk.f32.gmra.mrb[134].mxu0 %vm248_vm2, %v5006_v43  ;;  %v4948_v63 = vld [vmem:[%s5948_s17 + $0x199] sm:$0xff] }
 0x149   : > { %1492 = vst.msk [vmem:[#allocation2 + $0x48] sm:$0xff] %vm574_vm3, %v1460_v11  ;;  %v1012_v52 = vadd.f32 %v5423_v0, %v980_v36  ;;  %v876_v35 = vpop.f32.mrb[31].mxu1  ;;  %5737 = vmatmul.mubr.msk.f32.gmra.mrb[136].mxu1 %vm248_vm2, %v4943_v40  ;;  %5786 = vmatprep.mubr.msk.f32.mxu0 %vm248_vm2, %v5007_v34  ;;  %v984_v22 = vld [vmem:[#allocation2 + $0x98] sm:$0xff] }
 0x14a   : > { %1491 = vst.msk [vmem:[#allocation2 + $0x40] sm:$0xff] %vm574_vm3, %v1459_v54  ;;  %v1011_v2 = vadd.f32 %v979_v44, %v876_v35  ;;  %v1430_v45 = vld [vmem:[#allocation2 + $0x58] sm:$0xff]  ;;  %5739 = vmatprep.mubr.msk.f32.mxu1 %vm248_vm2, %v4944_v7  ;;  %v987_v7 = vld [vmem:[#allocation2 + $0xb0] sm:$0xff]  ;;  %v990_v44 = vld [vmem:[#allocation2 + $0xc8] sm:$0xff] }
 0x14b   : > { %1044 = vst.msk [vmem:[#allocation2 + $0x78] sm:$0xff] %vm574_vm3, %v1012_v52  ;;  %v1462_v37 = vadd.f32 %v5467_v21, %v1430_v45  ;;  %v1429_v49 = vld [vmem:[#allocation2 + $0x50] sm:$0xff]  ;;  %v5473_v51 = vpop.f32.mrb[30].mxu0  ;;  %v986_v21 = vld [vmem:[#allocation2 + $0xa8] sm:$0xff]  ;;  %v988_v40 = vld [vmem:[#allocation2 + $0xb8] sm:$0xff] }
 0x14c   : > { %1043 = vst.msk [vmem:[#allocation2 + $0x70] sm:$0xff] %vm574_vm3, %v1011_v2  ;;  %v1461_v56 = vadd.f32 %v1429_v49, %v1310_v29  ;;  %v5426_v60 = vpop.f32.mrb[32].mxu1  ;;  %v1330_v53 = vpop.f32.mrb[31].mxu0  ;;  %5787 = vmatmul.mubr.msk.f32.gmra.mrb[136].mxu0 %vm248_vm2, %v5008_v38  ;;  %v5014_v29 = vld [vmem:[%s5948_s17 + $0x1a2] sm:$0xff] }
 0x14d   : > { %1494 = vst.msk [vmem:[#allocation2 + $0x58] sm:$0xff] %vm574_vm3, %v1462_v37  ;;  %v1014_v55 = vadd.f32 %v5426_v60, %v982_v58  ;;  %v886_v62 = vpop.f32.mrb[33].mxu1  ;;  %5740 = vmatmul.mubr.msk.f32.gmra.mrb[138].mxu1 %vm248_vm2, %v4945_v3  ;;  %5789 = vmatprep.mubr.msk.f32.mxu0 %vm248_vm2, %v5009_v5  ;;  %v989_v3 = vld [vmem:[#allocation2 + $0xc0] sm:$0xff] }
 0x14e   : > { %1493 = vst.msk [vmem:[#allocation2 + $0x50] sm:$0xff] %vm574_vm3, %v1461_v56  ;;  %v1013_v59 = vadd.f32 %v981_v14, %v886_v62  ;;  %v1432_v16 = vld [vmem:[#allocation2 + $0x68] sm:$0xff]  ;;  %5742 = vmatprep.mubr.msk.f32.mxu1 %vm248_vm2, %v6579_v47 }
 0x14f   : > { %1046 = vst.msk [vmem:[#allocation2 + $0x88] sm:$0xff] %vm574_vm3, %v1014_v55  ;;  %v1464_v46 = vadd.f32 %v5470_v42, %v1432_v16  ;;  %v1431_v61 = vld [vmem:[#allocation2 + $0x60] sm:$0xff]  ;;  %v5476_v17 = vpop.f32.mrb[32].mxu0 }
 0x150   : > { %1045 = vst.msk [vmem:[#allocation2 + $0x80] sm:$0xff] %vm574_vm3, %v1013_v59  ;;  %v1463_v19 = vadd.f32 %v1431_v61, %v1320_v41  ;;  %v5429_v9 = vpop.f32.mrb[34].mxu1  ;;  %v1340_v1 = vpop.f32.mrb[33].mxu0  ;;  %5790 = vmatmul.mubr.msk.f32.gmra.mrb[138].mxu0 %vm248_vm2, %v5010_v57  ;;  %v991_v57 = vld [vmem:[#allocation2 + $0xd0] sm:$0xff] }
 0x151   : > { %1496 = vst.msk [vmem:[#allocation2 + $0x68] sm:$0xff] %vm574_vm3, %v1464_v46  ;;  %v1016_v10 = vadd.f32 %v5429_v9, %v984_v22  ;;  %v896_v47 = vpop.f32.mrb[35].mxu1  ;;  %5743 = vmatmul.mubr.msk.f32.gmra.mrb[140].mxu1 %vm248_vm2, %v6588_v48  ;;  %5792 = vmatprep.mubr.msk.f32.mxu0 %vm248_vm2, %v6711_v27  ;;  %v994_v9 = vld [vmem:[#allocation2 + $0xe8] sm:$0xff] }
 0x152   : > { %1495 = vst.msk [vmem:[#allocation2 + $0x60] sm:$0xff] %vm574_vm3, %v1463_v19  ;;  %v1015_v6 = vadd.f32 %v983_v13, %v896_v47  ;;  %v1434_v24 = vld [vmem:[#allocation2 + $0x78] sm:$0xff]  ;;  %5745 = vmatprep.mubr.msk.f32.mxu1 %vm248_vm2, %v4948_v63  ;;  %v993_v47 = vld [vmem:[#allocation2 + $0xe0] sm:$0xff] }
 0x153   : > { %1048 = vst.msk [vmem:[#allocation2 + $0x98] sm:$0xff] %vm574_vm3, %v1016_v10  ;;  %v1466_v18 = vadd.f32 %v5473_v51, %v1434_v24  ;;  %v1433_v8 = vld [vmem:[#allocation2 + $0x70] sm:$0xff]  ;;  %v5479_v20 = vpop.f32.mrb[34].mxu0 }
 0x154   : > { %1047 = vst.msk [vmem:[#allocation2 + $0x90] sm:$0xff] %vm574_vm3, %v1015_v6  ;;  %v1465_v48 = vadd.f32 %v1433_v8, %v1330_v53  ;;  %v5432_v23 = vpop.f32.mrb[36].mxu1  ;;  %v1350_v27 = vpop.f32.mrb[35].mxu0  ;;  %5793 = vmatmul.mubr.msk.f32.gmra.mrb[140].mxu0 %vm248_vm2, %v6726_v33  ;;  %v992_v53 = vld [vmem:[#allocation2 + $0xd8] sm:$0xff] }
 0x155   : > { %1498 = vst.msk [vmem:[#allocation2 + $0x78] sm:$0xff] %vm574_vm3, %v1466_v18  ;;  %v1018_v28 = vadd.f32 %v5432_v23, %v986_v21  ;;  %v906_v30 = vpop.f32.mrb[37].mxu1  ;;  %5746 = vmatmul.mubr.msk.f32.gmra.mrb[142].mxu1 %vm248_vm2, %v4949_v26  ;;  %5795 = vmatprep.mubr.msk.f32.mxu0 %vm248_vm2, %v5013_v15 }
 0x156   : > { %1497 = vst.msk [vmem:[#allocation2 + $0x70] sm:$0xff] %vm574_vm3, %v1465_v48  ;;  %v1017_v39 = vadd.f32 %v985_v25, %v906_v30  ;;  %v1436_v31 = vld [vmem:[#allocation2 + $0x88] sm:$0xff] }
 0x157   : > { %1050 = vst.msk [vmem:[#allocation2 + $0xa8] sm:$0xff] %vm574_vm3, %v1018_v28  ;;  %v1468_v4 = vadd.f32 %v5476_v17, %v1436_v31  ;;  %v1435_v43 = vld [vmem:[#allocation2 + $0x80] sm:$0xff]  ;;  %v5482_v32 = vpop.f32.mrb[36].mxu0 }
 0x158   : > { %1049 = vst.msk [vmem:[#allocation2 + $0xa0] sm:$0xff] %vm574_vm3, %v1017_v39  ;;  %v1467_v33 = vadd.f32 %v1435_v43, %v1340_v1  ;;  %v5435_v50 = vpop.f32.mrb[38].mxu1  ;;  %v1360_v34 = vpop.f32.mrb[37].mxu0  ;;  %5796 = vmatmul.mubr.msk.f32.gmra.mrb[142].mxu0 %vm248_vm2, %v5014_v29  ;;  %v1875_v43 = vld [vmem:[#allocation2 + $0x8] sm:$0xff] }
 0x159   : > { %1500 = vst.msk [vmem:[#allocation2 + $0x88] sm:$0xff] %vm574_vm3, %v1468_v4  ;;  %v1020_v11 = vadd.f32 %v5435_v50, %v988_v40  ;;  %v916_v12 = vpop.f32.mrb[39].mxu1  ;;  %v1874_v40 = vld [vmem:[#allocation2] sm:$0xff] }
 0x15a   : > { %1499 = vst.msk [vmem:[#allocation2 + $0x80] sm:$0xff] %vm574_vm3, %v1467_v33  ;;  %v1019_v42 = vadd.f32 %v987_v7, %v916_v12  ;;  %v1438_v54 = vld [vmem:[#allocation2 + $0x98] sm:$0xff] }
 0x15b   : > { %1052 = vst.msk [vmem:[#allocation2 + $0xb8] sm:$0xff] %vm574_vm3, %v1020_v11  ;;  %v1470_v0 = vadd.f32 %v5479_v20, %v1438_v54  ;;  %v1437_v36 = vld [vmem:[#allocation2 + $0x90] sm:$0xff]  ;;  %v5485_v41 = vpop.f32.mrb[38].mxu0  ;;  %v996_v20 = vld [vmem:[#allocation2 + $0xf8] sm:$0xff] }
 0x15c   : > { %1051 = vst.msk [vmem:[#allocation2 + $0xb0] sm:$0xff] %vm574_vm3, %v1019_v42  ;;  %v1469_v52 = vadd.f32 %v1437_v36, %v1350_v27  ;;  %v5438_v35 = vpop.f32.mrb[40].mxu1  ;;  %v1370_v38 = vpop.f32.mrb[39].mxu0  ;;  %v995_v27 = vld [vmem:[#allocation2 + $0xf0] sm:$0xff]  ;;  %v1877_v36 = vld [vmem:[#allocation2 + $0x18] sm:$0xff] }
 0x15d   : > { %1502 = vst.msk [vmem:[#allocation2 + $0x98] sm:$0xff] %vm574_vm3, %v1470_v0  ;;  %v1022_v2 = vadd.f32 %v5438_v35, %v990_v44  ;;  %v926_v45 = vpop.f32.mrb[41].mxu1  ;;  %v1876_v44 = vld [vmem:[#allocation2 + $0x10] sm:$0xff] }
 0x15e   : > { %1501 = vst.msk [vmem:[#allocation2 + $0x90] sm:$0xff] %vm574_vm3, %v1469_v52  ;;  %v1021_v5 = vadd.f32 %v989_v3, %v926_v45  ;;  %v1440_v37 = vld [vmem:[#allocation2 + $0xa8] sm:$0xff] }
 0x15f   : > { %1054 = vst.msk [vmem:[#allocation2 + $0xc8] sm:$0xff] %vm574_vm3, %v1022_v2  ;;  %v1472_v49 = vadd.f32 %v5482_v32, %v1440_v37  ;;  %v1439_v51 = vld [vmem:[#allocation2 + $0xa0] sm:$0xff]  ;;  %v5488_v56 = vpop.f32.mrb[40].mxu0 }
 0x160   : > { %1053 = vst.msk [vmem:[#allocation2 + $0xc0] sm:$0xff] %vm574_vm3, %v1021_v5  ;;  %v1471_v60 = vadd.f32 %v1439_v51, %v1360_v34  ;;  %v5441_v58 = vpop.f32.mrb[42].mxu1  ;;  %v1380_v55 = vpop.f32.mrb[41].mxu0  ;;  %v1879_v51 = vld [vmem:[#allocation2 + $0x28] sm:$0xff] }
 0x161   : > { %1504 = vst.msk [vmem:[#allocation2 + $0xa8] sm:$0xff] %vm574_vm3, %v1472_v49  ;;  %v1024_v62 = vadd.f32 %v5441_v58, %v992_v53  ;;  %v936_v14 = vpop.f32.mrb[43].mxu1  ;;  %v1878_v53 = vld [vmem:[#allocation2 + $0x20] sm:$0xff] }
 0x162   : > { %1503 = vst.msk [vmem:[#allocation2 + $0xa0] sm:$0xff] %vm574_vm3, %v1471_v60  ;;  %v1023_v59 = vadd.f32 %v991_v57, %v936_v14  ;;  %v1442_v16 = vld [vmem:[#allocation2 + $0xb8] sm:$0xff] }
 0x163   : > { %1056 = vst.msk [vmem:[#allocation2 + $0xd8] sm:$0xff] %vm574_vm3, %v1024_v62  ;;  %v1474_v46 = vadd.f32 %v5485_v41, %v1442_v16  ;;  %v1441_v61 = vld [vmem:[#allocation2 + $0xb0] sm:$0xff]  ;;  %v5491_v63 = vpop.f32.mrb[42].mxu0 }
 0x164   : > { %1055 = vst.msk [vmem:[#allocation2 + $0xd0] sm:$0xff] %vm574_vm3, %v1023_v59  ;;  %v1473_v17 = vadd.f32 %v1441_v61, %v1370_v38  ;;  %v5444_v19 = vpop.f32.mrb[44].mxu1  ;;  %v1390_v22 = vpop.f32.mrb[43].mxu0  ;;  %v1881_v61 = vld [vmem:[#allocation2 + $0x38] sm:$0xff] }
 0x165   : > { %1506 = vst.msk [vmem:[#allocation2 + $0xb8] sm:$0xff] %vm574_vm3, %v1474_v46  ;;  %v1026_v1 = vadd.f32 %v5444_v19, %v994_v9  ;;  %v946_v10 = vpop.f32.mrb[45].mxu1  ;;  %v1880_v9 = vld [vmem:[#allocation2 + $0x30] sm:$0xff] }
 0x166   : > { %1505 = vst.msk [vmem:[#allocation2 + $0xb0] sm:$0xff] %vm574_vm3, %v1473_v17  ;;  %v1025_v13 = vadd.f32 %v993_v47, %v946_v10  ;;  %v1444_v6 = vld [vmem:[#allocation2 + $0xc8] sm:$0xff] }
 0x167   : > { %1058 = vst.msk [vmem:[#allocation2 + $0xe8] sm:$0xff] %vm574_vm3, %v1026_v1  ;;  %v1476_v24 = vadd.f32 %v5488_v56, %v1444_v6  ;;  %v1443_v26 = vld [vmem:[#allocation2 + $0xc0] sm:$0xff]  ;;  %v5494_v15 = vpop.f32.mrb[44].mxu0 }
 0x168   : > { %1057 = vst.msk [vmem:[#allocation2 + $0xe0] sm:$0xff] %vm574_vm3, %v1025_v13  ;;  %v1475_v18 = vadd.f32 %v1443_v26, %v1380_v55  ;;  %v5447_v8 = vpop.f32.mrb[46].mxu1  ;;  %v1400_v48 = vpop.f32.mrb[45].mxu0  ;;  %v1883_v26 = vld [vmem:[#allocation2 + $0x48] sm:$0xff] }
 0x169   : > { %1508 = vst.msk [vmem:[#allocation2 + $0xc8] sm:$0xff] %vm574_vm3, %v1476_v24  ;;  %v1028_v23 = vadd.f32 %v5447_v8, %v996_v20  ;;  %v956_v21 = vpop.f32.mrb[47].mxu1  ;;  %v1882_v20 = vld [vmem:[#allocation2 + $0x40] sm:$0xff] }
 0x16a   : > { %1507 = vst.msk [vmem:[#allocation2 + $0xc0] sm:$0xff] %vm574_vm3, %v1475_v18  ;;  %v1027_v28 = vadd.f32 %v995_v27, %v956_v21  ;;  %v1446_v30 = vld [vmem:[#allocation2 + $0xd8] sm:$0xff] }
 0x16b   : > { %1060 = vst.msk [vmem:[#allocation2 + $0xf8] sm:$0xff] %vm574_vm3, %v1028_v23  ;;  %v1478_v25 = vadd.f32 %v5491_v63, %v1446_v30  ;;  %v1445_v29 = vld [vmem:[#allocation2 + $0xd0] sm:$0xff]  ;;  %v5497_v39 = vpop.f32.mrb[46].mxu0 }
 0x16c   : > { %1059 = vst.msk [vmem:[#allocation2 + $0xf0] sm:$0xff] %vm574_vm3, %v1027_v28  ;;  %v1477_v31 = vadd.f32 %v1445_v29, %v1390_v22  ;;  %v5502_v4 = vpop.f32.mrb[48].mxu1  ;;  %v1410_v32 = vpop.f32.mrb[47].mxu0  ;;  %v1885_v29 = vld [vmem:[#allocation2 + $0x58] sm:$0xff] }
 0x16d   : > { %1510 = vst.msk [vmem:[#allocation2 + $0xd8] sm:$0xff] %vm574_vm3, %v1478_v25  ;;  %v1907_v33 = vadd.f32 %v5502_v4, %v1875_v43  ;;  %v1715_v50 = vpop.f32.mrb[49].mxu1  ;;  %v1884_v43 = vld [vmem:[#allocation2 + $0x50] sm:$0xff] }
 0x16e   : > { %1509 = vst.msk [vmem:[#allocation2 + $0xd0] sm:$0xff] %vm574_vm3, %v1477_v31  ;;  %v1906_v34 = vadd.f32 %v1874_v40, %v1715_v50  ;;  %v1448_v11 = vld [vmem:[#allocation2 + $0xe8] sm:$0xff] }
 0x16f   : > { %1939 = vst.msk [vmem:[#allocation2 + $0x8] sm:$0xff] %vm574_vm3, %v1907_v33  ;;  %v1480_v12 = vadd.f32 %v5494_v15, %v1448_v11  ;;  %v1447_v7 = vld [vmem:[#allocation2 + $0xe0] sm:$0xff]  ;;  %v5552_v42 = vpop.f32.mrb[48].mxu0 }
 0x170   : > { %1938 = vst.msk [vmem:[#allocation2] sm:$0xff] %vm574_vm3, %v1906_v34  ;;  %v1479_v54 = vadd.f32 %v1447_v7, %v1400_v48  ;;  %v5505_v0 = vpop.f32.mrb[50].mxu1  ;;  %v2169_v41 = vpop.f32.mrb[49].mxu0  ;;  %v1887_v7 = vld [vmem:[#allocation2 + $0x68] sm:$0xff] }
 0x171   : > { %1512 = vst.msk [vmem:[#allocation2 + $0xe8] sm:$0xff] %vm574_vm3, %v1480_v12  ;;  %v1909_v52 = vadd.f32 %v5505_v0, %v1877_v36  ;;  %v1725_v35 = vpop.f32.mrb[51].mxu1  ;;  %v1886_v36 = vld [vmem:[#allocation2 + $0x60] sm:$0xff] }
 0x172   : > { %1511 = vst.msk [vmem:[#allocation2 + $0xe0] sm:$0xff] %vm574_vm3, %v1479_v54  ;;  %v1908_v38 = vadd.f32 %v1876_v44, %v1725_v35  ;;  %v1450_v2 = vld [vmem:[#allocation2 + $0xf8] sm:$0xff] }
 0x173   : > { %1941 = vst.msk [vmem:[#allocation2 + $0x18] sm:$0xff] %vm574_vm3, %v1909_v52  ;;  %v1482_v45 = vadd.f32 %v5497_v39, %v1450_v2  ;;  %v1449_v3 = vld [vmem:[#allocation2 + $0xf0] sm:$0xff]  ;;  %v5555_v5 = vpop.f32.mrb[50].mxu0 }
 0x174   : > { %1940 = vst.msk [vmem:[#allocation2 + $0x10] sm:$0xff] %vm574_vm3, %v1908_v38  ;;  %v1481_v37 = vadd.f32 %v1449_v3, %v1410_v32  ;;  %v5508_v49 = vpop.f32.mrb[52].mxu1  ;;  %v2179_v56 = vpop.f32.mrb[51].mxu0  ;;  %v1889_v3 = vld [vmem:[#allocation2 + $0x78] sm:$0xff] }
 0x175   : > { %1514 = vst.msk [vmem:[#allocation2 + $0xf8] sm:$0xff] %vm574_vm3, %v1482_v45  ;;  %v1911_v60 = vadd.f32 %v5508_v49, %v1879_v51  ;;  %v1735_v58 = vpop.f32.mrb[53].mxu1  ;;  %v1888_v51 = vld [vmem:[#allocation2 + $0x70] sm:$0xff] }
 0x176   : > { %1513 = vst.msk [vmem:[#allocation2 + $0xf0] sm:$0xff] %vm574_vm3, %v1481_v37  ;;  %v1910_v55 = vadd.f32 %v1878_v53, %v1735_v58  ;;  %v2329_v62 = vld [vmem:[#allocation2 + $0x8] sm:$0xff] }
 0x177   : > { %1943 = vst.msk [vmem:[#allocation2 + $0x28] sm:$0xff] %vm574_vm3, %v1911_v60  ;;  %v2361_v14 = vadd.f32 %v5552_v42, %v2329_v62  ;;  %v2328_v57 = vld [vmem:[#allocation2] sm:$0xff]  ;;  %v5558_v59 = vpop.f32.mrb[52].mxu0 }
 0x178   : > { %1942 = vst.msk [vmem:[#allocation2 + $0x20] sm:$0xff] %vm574_vm3, %v1910_v55  ;;  %v2360_v16 = vadd.f32 %v2328_v57, %v2169_v41  ;;  %v5511_v46 = vpop.f32.mrb[54].mxu1  ;;  %v2189_v63 = vpop.f32.mrb[53].mxu0  ;;  %v1891_v57 = vld [vmem:[#allocation2 + $0x88] sm:$0xff] }
 0x179   : > { %2393 = vst.msk [vmem:[#allocation2 + $0x8] sm:$0xff] %vm574_vm3, %v2361_v14  ;;  %v1913_v17 = vadd.f32 %v5511_v46, %v1881_v61  ;;  %v1745_v19 = vpop.f32.mrb[55].mxu1  ;;  %v1890_v61 = vld [vmem:[#allocation2 + $0x80] sm:$0xff] }
 0x17a   : > { %2392 = vst.msk [vmem:[#allocation2] sm:$0xff] %vm574_vm3, %v2360_v16  ;;  %v1912_v22 = vadd.f32 %v1880_v9, %v1745_v19  ;;  %v2331_v1 = vld [vmem:[#allocation2 + $0x18] sm:$0xff] }
 0x17b   : > { %1945 = vst.msk [vmem:[#allocation2 + $0x38] sm:$0xff] %vm574_vm3, %v1913_v17  ;;  %v2363_v10 = vadd.f32 %v5555_v5, %v2331_v1  ;;  %v2330_v47 = vld [vmem:[#allocation2 + $0x10] sm:$0xff]  ;;  %v5561_v13 = vpop.f32.mrb[54].mxu0 }
 0x17c   : > { %1944 = vst.msk [vmem:[#allocation2 + $0x30] sm:$0xff] %vm574_vm3, %v1912_v22  ;;  %v2362_v6 = vadd.f32 %v2330_v47, %v2179_v56  ;;  %v5514_v24 = vpop.f32.mrb[56].mxu1  ;;  %v2199_v15 = vpop.f32.mrb[55].mxu0  ;;  %v1893_v47 = vld [vmem:[#allocation2 + $0x98] sm:$0xff] }
 0x17d   : > { %2395 = vst.msk [vmem:[#allocation2 + $0x18] sm:$0xff] %vm574_vm3, %v2363_v10  ;;  %v1915_v18 = vadd.f32 %v5514_v24, %v1883_v26  ;;  %v1755_v8 = vpop.f32.mrb[57].mxu1  ;;  %v1892_v26 = vld [vmem:[#allocation2 + $0x90] sm:$0xff] }
 0x17e   : > { %2394 = vst.msk [vmem:[#allocation2 + $0x10] sm:$0xff] %vm574_vm3, %v2362_v6  ;;  %v1914_v48 = vadd.f32 %v1882_v20, %v1755_v8  ;;  %v2333_v23 = vld [vmem:[#allocation2 + $0x28] sm:$0xff] }
 0x17f   : > { %1947 = vst.msk [vmem:[#allocation2 + $0x48] sm:$0xff] %vm574_vm3, %v1915_v18  ;;  %v2365_v21 = vadd.f32 %v5558_v59, %v2333_v23  ;;  %v2332_v27 = vld [vmem:[#allocation2 + $0x20] sm:$0xff]  ;;  %v5564_v28 = vpop.f32.mrb[56].mxu0 }
 0x180   : > { %1946 = vst.msk [vmem:[#allocation2 + $0x40] sm:$0xff] %vm574_vm3, %v1914_v48  ;;  %v2364_v30 = vadd.f32 %v2332_v27, %v2189_v63  ;;  %v5517_v25 = vpop.f32.mrb[58].mxu1  ;;  %v2209_v39 = vpop.f32.mrb[57].mxu0  ;;  %v1895_v27 = vld [vmem:[#allocation2 + $0xa8] sm:$0xff] }
 0x181   : > { %2397 = vst.msk [vmem:[#allocation2 + $0x28] sm:$0xff] %vm574_vm3, %v2365_v21  ;;  %v1917_v31 = vadd.f32 %v5517_v25, %v1885_v29  ;;  %v1765_v4 = vpop.f32.mrb[59].mxu1  ;;  %v1894_v29 = vld [vmem:[#allocation2 + $0xa0] sm:$0xff] }
 0x182   : > { %2396 = vst.msk [vmem:[#allocation2 + $0x20] sm:$0xff] %vm574_vm3, %v2364_v30  ;;  %v1916_v32 = vadd.f32 %v1884_v43, %v1765_v4  ;;  %v2335_v33 = vld [vmem:[#allocation2 + $0x38] sm:$0xff] }
 0x183   : > { %1949 = vst.msk [vmem:[#allocation2 + $0x58] sm:$0xff] %vm574_vm3, %v1917_v31  ;;  %v2367_v50 = vadd.f32 %v5561_v13, %v2335_v33  ;;  %v2334_v40 = vld [vmem:[#allocation2 + $0x30] sm:$0xff]  ;;  %v5567_v34 = vpop.f32.mrb[58].mxu0 }
 0x184   : > { %1948 = vst.msk [vmem:[#allocation2 + $0x50] sm:$0xff] %vm574_vm3, %v1916_v32  ;;  %v2366_v11 = vadd.f32 %v2334_v40, %v2199_v15  ;;  %v5520_v12 = vpop.f32.mrb[60].mxu1  ;;  %v2219_v42 = vpop.f32.mrb[59].mxu0  ;;  %v1897_v40 = vld [vmem:[#allocation2 + $0xb8] sm:$0xff] }
 0x185   : > { %2399 = vst.msk [vmem:[#allocation2 + $0x38] sm:$0xff] %vm574_vm3, %v2367_v50  ;;  %v1919_v54 = vadd.f32 %v5520_v12, %v1887_v7  ;;  %v1775_v0 = vpop.f32.mrb[61].mxu1  ;;  %v1896_v7 = vld [vmem:[#allocation2 + $0xb0] sm:$0xff] }
 0x186   : > { %2398 = vst.msk [vmem:[#allocation2 + $0x30] sm:$0xff] %vm574_vm3, %v2366_v11  ;;  %v1918_v41 = vadd.f32 %v1886_v36, %v1775_v0  ;;  %v2337_v52 = vld [vmem:[#allocation2 + $0x48] sm:$0xff] }
 0x187   : > { %1951 = vst.msk [vmem:[#allocation2 + $0x68] sm:$0xff] %vm574_vm3, %v1919_v54  ;;  %v2369_v35 = vadd.f32 %v5564_v28, %v2337_v52  ;;  %v2336_v44 = vld [vmem:[#allocation2 + $0x40] sm:$0xff]  ;;  %v5570_v38 = vpop.f32.mrb[60].mxu0 }
 0x188   : > { %1950 = vst.msk [vmem:[#allocation2 + $0x60] sm:$0xff] %vm574_vm3, %v1918_v41  ;;  %v2368_v2 = vadd.f32 %v2336_v44, %v2209_v39  ;;  %v5523_v45 = vpop.f32.mrb[62].mxu1  ;;  %v2229_v5 = vpop.f32.mrb[61].mxu0  ;;  %v1899_v44 = vld [vmem:[#allocation2 + $0xc8] sm:$0xff] }
 0x189   : > { %2401 = vst.msk [vmem:[#allocation2 + $0x48] sm:$0xff] %vm574_vm3, %v2369_v35  ;;  %v1921_v37 = vadd.f32 %v5523_v45, %v1889_v3  ;;  %v1785_v49 = vpop.f32.mrb[63].mxu1  ;;  %v1898_v3 = vld [vmem:[#allocation2 + $0xc0] sm:$0xff] }
 0x18a   : > { %2400 = vst.msk [vmem:[#allocation2 + $0x40] sm:$0xff] %vm574_vm3, %v2368_v2  ;;  %v1920_v56 = vadd.f32 %v1888_v51, %v1785_v49  ;;  %v2339_v60 = vld [vmem:[#allocation2 + $0x58] sm:$0xff] }
 0x18b   : > { %1953 = vst.msk [vmem:[#allocation2 + $0x78] sm:$0xff] %vm574_vm3, %v1921_v37  ;;  %v2371_v58 = vadd.f32 %v5567_v34, %v2339_v60  ;;  %v2338_v53 = vld [vmem:[#allocation2 + $0x50] sm:$0xff]  ;;  %v5573_v55 = vpop.f32.mrb[62].mxu0 }
 0x18c   : > { %1952 = vst.msk [vmem:[#allocation2 + $0x70] sm:$0xff] %vm574_vm3, %v1920_v56  ;;  %v2370_v62 = vadd.f32 %v2338_v53, %v2219_v42  ;;  %v5526_v14 = vpop.f32.mrb[64].mxu1  ;;  %v2239_v59 = vpop.f32.mrb[63].mxu0  ;;  %v1901_v53 = vld [vmem:[#allocation2 + $0xd8] sm:$0xff] }
 0x18d   : > { %2403 = vst.msk [vmem:[#allocation2 + $0x58] sm:$0xff] %vm574_vm3, %v2371_v58  ;;  %v1923_v16 = vadd.f32 %v5526_v14, %v1891_v57  ;;  %v1795_v46 = vpop.f32.mrb[65].mxu1  ;;  %v1900_v57 = vld [vmem:[#allocation2 + $0xd0] sm:$0xff] }
 0x18e   : > { %2402 = vst.msk [vmem:[#allocation2 + $0x50] sm:$0xff] %vm574_vm3, %v2370_v62  ;;  %v1922_v63 = vadd.f32 %v1890_v61, %v1795_v46  ;;  %v2341_v17 = vld [vmem:[#allocation2 + $0x68] sm:$0xff] }
 0x18f   : > { %1955 = vst.msk [vmem:[#allocation2 + $0x88] sm:$0xff] %vm574_vm3, %v1923_v16  ;;  %v2373_v19 = vadd.f32 %v5570_v38, %v2341_v17  ;;  %v2340_v9 = vld [vmem:[#allocation2 + $0x60] sm:$0xff]  ;;  %v5576_v22 = vpop.f32.mrb[64].mxu0 }
 0x190   : > { %1954 = vst.msk [vmem:[#allocation2 + $0x80] sm:$0xff] %vm574_vm3, %v1922_v63  ;;  %v2372_v1 = vadd.f32 %v2340_v9, %v2229_v5  ;;  %v5529_v10 = vpop.f32.mrb[66].mxu1  ;;  %v2249_v13 = vpop.f32.mrb[65].mxu0  ;;  %v1903_v9 = vld [vmem:[#allocation2 + $0xe8] sm:$0xff] }
 0x191   : > { %2405 = vst.msk [vmem:[#allocation2 + $0x68] sm:$0xff] %vm574_vm3, %v2373_v19  ;;  %v1925_v6 = vadd.f32 %v5529_v10, %v1893_v47  ;;  %v1805_v24 = vpop.f32.mrb[67].mxu1  ;;  %v1902_v47 = vld [vmem:[#allocation2 + $0xe0] sm:$0xff] }
 0x192   : > { %2404 = vst.msk [vmem:[#allocation2 + $0x60] sm:$0xff] %vm574_vm3, %v2372_v1  ;;  %v1924_v15 = vadd.f32 %v1892_v26, %v1805_v24  ;;  %v2343_v18 = vld [vmem:[#allocation2 + $0x78] sm:$0xff] }
 0x193   : > { %1957 = vst.msk [vmem:[#allocation2 + $0x98] sm:$0xff] %vm574_vm3, %v1925_v6  ;;  %v2375_v8 = vadd.f32 %v5573_v55, %v2343_v18  ;;  %v2342_v20 = vld [vmem:[#allocation2 + $0x70] sm:$0xff]  ;;  %v5579_v48 = vpop.f32.mrb[66].mxu0 }
 0x194   : > { %1956 = vst.msk [vmem:[#allocation2 + $0x90] sm:$0xff] %vm574_vm3, %v1924_v15  ;;  %v2374_v23 = vadd.f32 %v2342_v20, %v2239_v59  ;;  %v5532_v21 = vpop.f32.mrb[68].mxu1  ;;  %v2259_v28 = vpop.f32.mrb[67].mxu0  ;;  %v1905_v20 = vld [vmem:[#allocation2 + $0xf8] sm:$0xff] }
 0x195   : > { %2407 = vst.msk [vmem:[#allocation2 + $0x78] sm:$0xff] %vm574_vm3, %v2375_v8  ;;  %v1927_v30 = vadd.f32 %v5532_v21, %v1895_v27  ;;  %v1815_v25 = vpop.f32.mrb[69].mxu1  ;;  %v1904_v27 = vld [vmem:[#allocation2 + $0xf0] sm:$0xff] }
 0x196   : > { %2406 = vst.msk [vmem:[#allocation2 + $0x70] sm:$0xff] %vm574_vm3, %v2374_v23  ;;  %v1926_v39 = vadd.f32 %v1894_v29, %v1815_v25  ;;  %v2345_v31 = vld [vmem:[#allocation2 + $0x88] sm:$0xff] }
 0x197   : > { %1959 = vst.msk [vmem:[#allocation2 + $0xa8] sm:$0xff] %vm574_vm3, %v1927_v30  ;;  %v2377_v4 = vadd.f32 %v5576_v22, %v2345_v31  ;;  %v2344_v43 = vld [vmem:[#allocation2 + $0x80] sm:$0xff]  ;;  %v5582_v32 = vpop.f32.mrb[68].mxu0 }
 0x198   : > { %1958 = vst.msk [vmem:[#allocation2 + $0xa0] sm:$0xff] %vm574_vm3, %v1926_v39  ;;  %v2376_v33 = vadd.f32 %v2344_v43, %v2249_v13  ;;  %v5535_v50 = vpop.f32.mrb[70].mxu1  ;;  %v2269_v34 = vpop.f32.mrb[69].mxu0  ;;  %v2783_v43 = vld [vmem:[#allocation2 + $0x8] sm:$0xff] }
 0x199   : > { %2409 = vst.msk [vmem:[#allocation2 + $0x88] sm:$0xff] %vm574_vm3, %v2377_v4  ;;  %v1929_v11 = vadd.f32 %v5535_v50, %v1897_v40  ;;  %v1825_v12 = vpop.f32.mrb[71].mxu1  ;;  %v2782_v40 = vld [vmem:[#allocation2] sm:$0xff] }
 0x19a   : > { %2408 = vst.msk [vmem:[#allocation2 + $0x80] sm:$0xff] %vm574_vm3, %v2376_v33  ;;  %v1928_v42 = vadd.f32 %v1896_v7, %v1825_v12  ;;  %v2347_v54 = vld [vmem:[#allocation2 + $0x98] sm:$0xff] }
 0x19b   : > { %1961 = vst.msk [vmem:[#allocation2 + $0xb8] sm:$0xff] %vm574_vm3, %v1929_v11  ;;  %v2379_v0 = vadd.f32 %v5579_v48, %v2347_v54  ;;  %v2346_v36 = vld [vmem:[#allocation2 + $0x90] sm:$0xff]  ;;  %v5585_v41 = vpop.f32.mrb[70].mxu0 }
 0x19c   : > { %1960 = vst.msk [vmem:[#allocation2 + $0xb0] sm:$0xff] %vm574_vm3, %v1928_v42  ;;  %v2378_v52 = vadd.f32 %v2346_v36, %v2259_v28  ;;  %v5538_v35 = vpop.f32.mrb[72].mxu1  ;;  %v2279_v38 = vpop.f32.mrb[71].mxu0  ;;  %v2785_v36 = vld [vmem:[#allocation2 + $0x18] sm:$0xff] }
 0x19d   : > { %2411 = vst.msk [vmem:[#allocation2 + $0x98] sm:$0xff] %vm574_vm3, %v2379_v0  ;;  %v1931_v2 = vadd.f32 %v5538_v35, %v1899_v44  ;;  %v1835_v45 = vpop.f32.mrb[73].mxu1  ;;  %v2784_v44 = vld [vmem:[#allocation2 + $0x10] sm:$0xff] }
 0x19e   : > { %2410 = vst.msk [vmem:[#allocation2 + $0x90] sm:$0xff] %vm574_vm3, %v2378_v52  ;;  %v1930_v5 = vadd.f32 %v1898_v3, %v1835_v45  ;;  %v2349_v37 = vld [vmem:[#allocation2 + $0xa8] sm:$0xff] }
 0x19f   : > { %1963 = vst.msk [vmem:[#allocation2 + $0xc8] sm:$0xff] %vm574_vm3, %v1931_v2  ;;  %v2381_v49 = vadd.f32 %v5582_v32, %v2349_v37  ;;  %v2348_v51 = vld [vmem:[#allocation2 + $0xa0] sm:$0xff]  ;;  %v5588_v56 = vpop.f32.mrb[72].mxu0 }
 0x1a0   : > { %1962 = vst.msk [vmem:[#allocation2 + $0xc0] sm:$0xff] %vm574_vm3, %v1930_v5  ;;  %v2380_v60 = vadd.f32 %v2348_v51, %v2269_v34  ;;  %v5541_v58 = vpop.f32.mrb[74].mxu1  ;;  %v2289_v55 = vpop.f32.mrb[73].mxu0  ;;  %v2787_v51 = vld [vmem:[#allocation2 + $0x28] sm:$0xff] }
 0x1a1   : > { %2413 = vst.msk [vmem:[#allocation2 + $0xa8] sm:$0xff] %vm574_vm3, %v2381_v49  ;;  %v1933_v62 = vadd.f32 %v5541_v58, %v1901_v53  ;;  %v1845_v14 = vpop.f32.mrb[75].mxu1  ;;  %v2786_v53 = vld [vmem:[#allocation2 + $0x20] sm:$0xff] }
 0x1a2   : > { %2412 = vst.msk [vmem:[#allocation2 + $0xa0] sm:$0xff] %vm574_vm3, %v2380_v60  ;;  %v1932_v59 = vadd.f32 %v1900_v57, %v1845_v14  ;;  %v2351_v16 = vld [vmem:[#allocation2 + $0xb8] sm:$0xff] }
 0x1a3   : > { %1965 = vst.msk [vmem:[#allocation2 + $0xd8] sm:$0xff] %vm574_vm3, %v1933_v62  ;;  %v2383_v46 = vadd.f32 %v5585_v41, %v2351_v16  ;;  %v2350_v61 = vld [vmem:[#allocation2 + $0xb0] sm:$0xff]  ;;  %v5591_v63 = vpop.f32.mrb[74].mxu0 }
 0x1a4   : > { %1964 = vst.msk [vmem:[#allocation2 + $0xd0] sm:$0xff] %vm574_vm3, %v1932_v59  ;;  %v2382_v17 = vadd.f32 %v2350_v61, %v2279_v38  ;;  %v5544_v19 = vpop.f32.mrb[76].mxu1  ;;  %v2299_v22 = vpop.f32.mrb[75].mxu0  ;;  %v2789_v61 = vld [vmem:[#allocation2 + $0x38] sm:$0xff] }
 0x1a5   : > { %2415 = vst.msk [vmem:[#allocation2 + $0xb8] sm:$0xff] %vm574_vm3, %v2383_v46  ;;  %v1935_v1 = vadd.f32 %v5544_v19, %v1903_v9  ;;  %v1855_v10 = vpop.f32.mrb[77].mxu1  ;;  %v2788_v9 = vld [vmem:[#allocation2 + $0x30] sm:$0xff] }
 0x1a6   : > { %2414 = vst.msk [vmem:[#allocation2 + $0xb0] sm:$0xff] %vm574_vm3, %v2382_v17  ;;  %v1934_v13 = vadd.f32 %v1902_v47, %v1855_v10  ;;  %v2353_v6 = vld [vmem:[#allocation2 + $0xc8] sm:$0xff] }
 0x1a7   : > { %1967 = vst.msk [vmem:[#allocation2 + $0xe8] sm:$0xff] %vm574_vm3, %v1935_v1  ;;  %v2385_v24 = vadd.f32 %v5588_v56, %v2353_v6  ;;  %v2352_v26 = vld [vmem:[#allocation2 + $0xc0] sm:$0xff]  ;;  %v5594_v15 = vpop.f32.mrb[76].mxu0 }
 0x1a8   : > { %1966 = vst.msk [vmem:[#allocation2 + $0xe0] sm:$0xff] %vm574_vm3, %v1934_v13  ;;  %v2384_v18 = vadd.f32 %v2352_v26, %v2289_v55  ;;  %v5547_v8 = vpop.f32.mrb[78].mxu1  ;;  %v2309_v48 = vpop.f32.mrb[77].mxu0  ;;  %v2791_v26 = vld [vmem:[#allocation2 + $0x48] sm:$0xff] }
 0x1a9   : > { %2417 = vst.msk [vmem:[#allocation2 + $0xc8] sm:$0xff] %vm574_vm3, %v2385_v24  ;;  %v1937_v23 = vadd.f32 %v5547_v8, %v1905_v20  ;;  %v1865_v21 = vpop.f32.mrb[79].mxu1  ;;  %v2790_v20 = vld [vmem:[#allocation2 + $0x40] sm:$0xff] }
 0x1aa   : > { %2416 = vst.msk [vmem:[#allocation2 + $0xc0] sm:$0xff] %vm574_vm3, %v2384_v18  ;;  %v1936_v28 = vadd.f32 %v1904_v27, %v1865_v21  ;;  %v2355_v30 = vld [vmem:[#allocation2 + $0xd8] sm:$0xff] }
 0x1ab   : > { %1969 = vst.msk [vmem:[#allocation2 + $0xf8] sm:$0xff] %vm574_vm3, %v1937_v23  ;;  %v2387_v25 = vadd.f32 %v5591_v63, %v2355_v30  ;;  %v2354_v29 = vld [vmem:[#allocation2 + $0xd0] sm:$0xff]  ;;  %v5597_v39 = vpop.f32.mrb[78].mxu0 }
 0x1ac   : > { %1968 = vst.msk [vmem:[#allocation2 + $0xf0] sm:$0xff] %vm574_vm3, %v1936_v28  ;;  %v2386_v31 = vadd.f32 %v2354_v29, %v2299_v22  ;;  %v5602_v4 = vpop.f32.mrb[80].mxu1  ;;  %v2319_v32 = vpop.f32.mrb[79].mxu0  ;;  %v2793_v29 = vld [vmem:[#allocation2 + $0x58] sm:$0xff] }
 0x1ad   : > { %2419 = vst.msk [vmem:[#allocation2 + $0xd8] sm:$0xff] %vm574_vm3, %v2387_v25  ;;  %v2815_v33 = vadd.f32 %v5602_v4, %v2783_v43  ;;  %v2623_v50 = vpop.f32.mrb[81].mxu1  ;;  %v2792_v43 = vld [vmem:[#allocation2 + $0x50] sm:$0xff] }
 0x1ae   : > { %2418 = vst.msk [vmem:[#allocation2 + $0xd0] sm:$0xff] %vm574_vm3, %v2386_v31  ;;  %v2814_v34 = vadd.f32 %v2782_v40, %v2623_v50  ;;  %v2357_v11 = vld [vmem:[#allocation2 + $0xe8] sm:$0xff] }
 0x1af   : > { %2847 = vst.msk [vmem:[#allocation2 + $0x8] sm:$0xff] %vm574_vm3, %v2815_v33  ;;  %v2389_v12 = vadd.f32 %v5594_v15, %v2357_v11  ;;  %v2356_v7 = vld [vmem:[#allocation2 + $0xe0] sm:$0xff]  ;;  %v5652_v42 = vpop.f32.mrb[80].mxu0 }
 0x1b0   : > { %2846 = vst.msk [vmem:[#allocation2] sm:$0xff] %vm574_vm3, %v2814_v34  ;;  %v2388_v54 = vadd.f32 %v2356_v7, %v2309_v48  ;;  %v5605_v0 = vpop.f32.mrb[82].mxu1  ;;  %v3078_v41 = vpop.f32.mrb[81].mxu0  ;;  %v2795_v7 = vld [vmem:[#allocation2 + $0x68] sm:$0xff] }
 0x1b1   : > { %2421 = vst.msk [vmem:[#allocation2 + $0xe8] sm:$0xff] %vm574_vm3, %v2389_v12  ;;  %v2817_v52 = vadd.f32 %v5605_v0, %v2785_v36  ;;  %v2633_v35 = vpop.f32.mrb[83].mxu1  ;;  %v2794_v36 = vld [vmem:[#allocation2 + $0x60] sm:$0xff] }
 0x1b2   : > { %2420 = vst.msk [vmem:[#allocation2 + $0xe0] sm:$0xff] %vm574_vm3, %v2388_v54  ;;  %v2816_v38 = vadd.f32 %v2784_v44, %v2633_v35  ;;  %v2359_v2 = vld [vmem:[#allocation2 + $0xf8] sm:$0xff] }
 0x1b3   : > { %2849 = vst.msk [vmem:[#allocation2 + $0x18] sm:$0xff] %vm574_vm3, %v2817_v52  ;;  %v2391_v45 = vadd.f32 %v5597_v39, %v2359_v2  ;;  %v2358_v3 = vld [vmem:[#allocation2 + $0xf0] sm:$0xff]  ;;  %v5655_v5 = vpop.f32.mrb[82].mxu0 }
 0x1b4   : > { %2848 = vst.msk [vmem:[#allocation2 + $0x10] sm:$0xff] %vm574_vm3, %v2816_v38  ;;  %v2390_v37 = vadd.f32 %v2358_v3, %v2319_v32  ;;  %v5608_v49 = vpop.f32.mrb[84].mxu1  ;;  %v3088_v56 = vpop.f32.mrb[83].mxu0  ;;  %v2797_v3 = vld [vmem:[#allocation2 + $0x78] sm:$0xff] }
 0x1b5   : > { %2423 = vst.msk [vmem:[#allocation2 + $0xf8] sm:$0xff] %vm574_vm3, %v2391_v45  ;;  %v2819_v60 = vadd.f32 %v5608_v49, %v2787_v51  ;;  %v2643_v58 = vpop.f32.mrb[85].mxu1  ;;  %v2796_v51 = vld [vmem:[#allocation2 + $0x70] sm:$0xff] }
 0x1b6   : > { %2422 = vst.msk [vmem:[#allocation2 + $0xf0] sm:$0xff] %vm574_vm3, %v2390_v37  ;;  %v2818_v55 = vadd.f32 %v2786_v53, %v2643_v58  ;;  %v3238_v62 = vld [vmem:[#allocation2 + $0x8] sm:$0xff] }
 0x1b7   : > { %2851 = vst.msk [vmem:[#allocation2 + $0x28] sm:$0xff] %vm574_vm3, %v2819_v60  ;;  %v3270_v14 = vadd.f32 %v5652_v42, %v3238_v62  ;;  %v3237_v57 = vld [vmem:[#allocation2] sm:$0xff]  ;;  %v5658_v59 = vpop.f32.mrb[84].mxu0 }
 0x1b8   : > { %2850 = vst.msk [vmem:[#allocation2 + $0x20] sm:$0xff] %vm574_vm3, %v2818_v55  ;;  %v3269_v16 = vadd.f32 %v3237_v57, %v3078_v41  ;;  %v5611_v46 = vpop.f32.mrb[86].mxu1  ;;  %v3098_v63 = vpop.f32.mrb[85].mxu0  ;;  %v2799_v57 = vld [vmem:[#allocation2 + $0x88] sm:$0xff] }
 0x1b9   : > { %3302 = vst.msk [vmem:[#allocation2 + $0x8] sm:$0xff] %vm574_vm3, %v3270_v14  ;;  %v2821_v17 = vadd.f32 %v5611_v46, %v2789_v61  ;;  %v2653_v19 = vpop.f32.mrb[87].mxu1  ;;  %v2798_v61 = vld [vmem:[#allocation2 + $0x80] sm:$0xff] }
 0x1ba   : > { %3301 = vst.msk [vmem:[#allocation2] sm:$0xff] %vm574_vm3, %v3269_v16  ;;  %v2820_v22 = vadd.f32 %v2788_v9, %v2653_v19  ;;  %v3240_v1 = vld [vmem:[#allocation2 + $0x18] sm:$0xff] }
 0x1bb   : > { %2853 = vst.msk [vmem:[#allocation2 + $0x38] sm:$0xff] %vm574_vm3, %v2821_v17  ;;  %v3272_v10 = vadd.f32 %v5655_v5, %v3240_v1  ;;  %v3239_v47 = vld [vmem:[#allocation2 + $0x10] sm:$0xff]  ;;  %v5661_v13 = vpop.f32.mrb[86].mxu0 }
 0x1bc   : > { %2852 = vst.msk [vmem:[#allocation2 + $0x30] sm:$0xff] %vm574_vm3, %v2820_v22  ;;  %v3271_v6 = vadd.f32 %v3239_v47, %v3088_v56  ;;  %v5614_v24 = vpop.f32.mrb[88].mxu1  ;;  %v3108_v15 = vpop.f32.mrb[87].mxu0  ;;  %v2801_v47 = vld [vmem:[#allocation2 + $0x98] sm:$0xff] }
 0x1bd   : > { %3304 = vst.msk [vmem:[#allocation2 + $0x18] sm:$0xff] %vm574_vm3, %v3272_v10  ;;  %v2823_v18 = vadd.f32 %v5614_v24, %v2791_v26  ;;  %v2663_v8 = vpop.f32.mrb[89].mxu1  ;;  %v2800_v26 = vld [vmem:[#allocation2 + $0x90] sm:$0xff] }
 0x1be   : > { %3303 = vst.msk [vmem:[#allocation2 + $0x10] sm:$0xff] %vm574_vm3, %v3271_v6  ;;  %v2822_v48 = vadd.f32 %v2790_v20, %v2663_v8  ;;  %v3242_v23 = vld [vmem:[#allocation2 + $0x28] sm:$0xff] }
 0x1bf   : > { %2855 = vst.msk [vmem:[#allocation2 + $0x48] sm:$0xff] %vm574_vm3, %v2823_v18  ;;  %v3274_v21 = vadd.f32 %v5658_v59, %v3242_v23  ;;  %v3241_v27 = vld [vmem:[#allocation2 + $0x20] sm:$0xff]  ;;  %v5664_v28 = vpop.f32.mrb[88].mxu0 }
 0x1c0   : > { %2854 = vst.msk [vmem:[#allocation2 + $0x40] sm:$0xff] %vm574_vm3, %v2822_v48  ;;  %v3273_v30 = vadd.f32 %v3241_v27, %v3098_v63  ;;  %v5617_v25 = vpop.f32.mrb[90].mxu1  ;;  %v3118_v39 = vpop.f32.mrb[89].mxu0  ;;  %v2803_v27 = vld [vmem:[#allocation2 + $0xa8] sm:$0xff] }
 0x1c1   : > { %3306 = vst.msk [vmem:[#allocation2 + $0x28] sm:$0xff] %vm574_vm3, %v3274_v21  ;;  %v2825_v31 = vadd.f32 %v5617_v25, %v2793_v29  ;;  %v2673_v4 = vpop.f32.mrb[91].mxu1  ;;  %v2802_v29 = vld [vmem:[#allocation2 + $0xa0] sm:$0xff] }
 0x1c2   : > { %3305 = vst.msk [vmem:[#allocation2 + $0x20] sm:$0xff] %vm574_vm3, %v3273_v30  ;;  %v2824_v32 = vadd.f32 %v2792_v43, %v2673_v4  ;;  %v3244_v33 = vld [vmem:[#allocation2 + $0x38] sm:$0xff] }
 0x1c3   : > { %2857 = vst.msk [vmem:[#allocation2 + $0x58] sm:$0xff] %vm574_vm3, %v2825_v31  ;;  %v3276_v50 = vadd.f32 %v5661_v13, %v3244_v33  ;;  %v3243_v40 = vld [vmem:[#allocation2 + $0x30] sm:$0xff]  ;;  %v5667_v34 = vpop.f32.mrb[90].mxu0 }
 0x1c4   : > { %2856 = vst.msk [vmem:[#allocation2 + $0x50] sm:$0xff] %vm574_vm3, %v2824_v32  ;;  %v3275_v11 = vadd.f32 %v3243_v40, %v3108_v15  ;;  %v5620_v12 = vpop.f32.mrb[92].mxu1  ;;  %v3128_v42 = vpop.f32.mrb[91].mxu0  ;;  %v2805_v40 = vld [vmem:[#allocation2 + $0xb8] sm:$0xff] }
 0x1c5   : > { %3308 = vst.msk [vmem:[#allocation2 + $0x38] sm:$0xff] %vm574_vm3, %v3276_v50  ;;  %v2827_v54 = vadd.f32 %v5620_v12, %v2795_v7  ;;  %v2683_v0 = vpop.f32.mrb[93].mxu1  ;;  %v2804_v7 = vld [vmem:[#allocation2 + $0xb0] sm:$0xff] }
 0x1c6   : > { %3307 = vst.msk [vmem:[#allocation2 + $0x30] sm:$0xff] %vm574_vm3, %v3275_v11  ;;  %v2826_v41 = vadd.f32 %v2794_v36, %v2683_v0  ;;  %v3246_v52 = vld [vmem:[#allocation2 + $0x48] sm:$0xff] }
 0x1c7   : > { %2859 = vst.msk [vmem:[#allocation2 + $0x68] sm:$0xff] %vm574_vm3, %v2827_v54  ;;  %v3278_v35 = vadd.f32 %v5664_v28, %v3246_v52  ;;  %v3245_v44 = vld [vmem:[#allocation2 + $0x40] sm:$0xff]  ;;  %v5670_v38 = vpop.f32.mrb[92].mxu0 }
 0x1c8   : > { %2858 = vst.msk [vmem:[#allocation2 + $0x60] sm:$0xff] %vm574_vm3, %v2826_v41  ;;  %v3277_v2 = vadd.f32 %v3245_v44, %v3118_v39  ;;  %v5623_v45 = vpop.f32.mrb[94].mxu1  ;;  %v3138_v5 = vpop.f32.mrb[93].mxu0  ;;  %v2807_v44 = vld [vmem:[#allocation2 + $0xc8] sm:$0xff] }
 0x1c9   : > { %3310 = vst.msk [vmem:[#allocation2 + $0x48] sm:$0xff] %vm574_vm3, %v3278_v35  ;;  %v2829_v37 = vadd.f32 %v5623_v45, %v2797_v3  ;;  %v2693_v49 = vpop.f32.mrb[95].mxu1  ;;  %v2806_v3 = vld [vmem:[#allocation2 + $0xc0] sm:$0xff] }
 0x1ca   : > { %3309 = vst.msk [vmem:[#allocation2 + $0x40] sm:$0xff] %vm574_vm3, %v3277_v2  ;;  %v2828_v56 = vadd.f32 %v2796_v51, %v2693_v49  ;;  %v3248_v60 = vld [vmem:[#allocation2 + $0x58] sm:$0xff] }
 0x1cb   : > { %2861 = vst.msk [vmem:[#allocation2 + $0x78] sm:$0xff] %vm574_vm3, %v2829_v37  ;;  %v3280_v58 = vadd.f32 %v5667_v34, %v3248_v60  ;;  %v3247_v53 = vld [vmem:[#allocation2 + $0x50] sm:$0xff]  ;;  %v5673_v55 = vpop.f32.mrb[94].mxu0 }
 0x1cc   : > { %2860 = vst.msk [vmem:[#allocation2 + $0x70] sm:$0xff] %vm574_vm3, %v2828_v56  ;;  %v3279_v62 = vadd.f32 %v3247_v53, %v3128_v42  ;;  %v5626_v14 = vpop.f32.mrb[96].mxu1  ;;  %v3148_v59 = vpop.f32.mrb[95].mxu0  ;;  %v2809_v53 = vld [vmem:[#allocation2 + $0xd8] sm:$0xff] }
 0x1cd   : > { %3312 = vst.msk [vmem:[#allocation2 + $0x58] sm:$0xff] %vm574_vm3, %v3280_v58  ;;  %v2831_v16 = vadd.f32 %v5626_v14, %v2799_v57  ;;  %v2703_v46 = vpop.f32.mrb[97].mxu1  ;;  %v2808_v57 = vld [vmem:[#allocation2 + $0xd0] sm:$0xff] }
 0x1ce   : > { %3311 = vst.msk [vmem:[#allocation2 + $0x50] sm:$0xff] %vm574_vm3, %v3279_v62  ;;  %v2830_v63 = vadd.f32 %v2798_v61, %v2703_v46  ;;  %v3250_v17 = vld [vmem:[#allocation2 + $0x68] sm:$0xff] }
 0x1cf   : > { %2863 = vst.msk [vmem:[#allocation2 + $0x88] sm:$0xff] %vm574_vm3, %v2831_v16  ;;  %v3282_v19 = vadd.f32 %v5670_v38, %v3250_v17  ;;  %v3249_v9 = vld [vmem:[#allocation2 + $0x60] sm:$0xff]  ;;  %v5676_v22 = vpop.f32.mrb[96].mxu0 }
 0x1d0   : > { %2862 = vst.msk [vmem:[#allocation2 + $0x80] sm:$0xff] %vm574_vm3, %v2830_v63  ;;  %v3281_v1 = vadd.f32 %v3249_v9, %v3138_v5  ;;  %v5629_v10 = vpop.f32.mrb[98].mxu1  ;;  %v3158_v13 = vpop.f32.mrb[97].mxu0  ;;  %v2811_v9 = vld [vmem:[#allocation2 + $0xe8] sm:$0xff] }
 0x1d1   : > { %3314 = vst.msk [vmem:[#allocation2 + $0x68] sm:$0xff] %vm574_vm3, %v3282_v19  ;;  %v2833_v6 = vadd.f32 %v5629_v10, %v2801_v47  ;;  %v2713_v24 = vpop.f32.mrb[99].mxu1  ;;  %v2810_v47 = vld [vmem:[#allocation2 + $0xe0] sm:$0xff] }
 0x1d2   : > { %3313 = vst.msk [vmem:[#allocation2 + $0x60] sm:$0xff] %vm574_vm3, %v3281_v1  ;;  %v2832_v15 = vadd.f32 %v2800_v26, %v2713_v24  ;;  %v3252_v18 = vld [vmem:[#allocation2 + $0x78] sm:$0xff] }
 0x1d3   : > { %2865 = vst.msk [vmem:[#allocation2 + $0x98] sm:$0xff] %vm574_vm3, %v2833_v6  ;;  %v3284_v8 = vadd.f32 %v5673_v55, %v3252_v18  ;;  %v3251_v20 = vld [vmem:[#allocation2 + $0x70] sm:$0xff]  ;;  %v5679_v48 = vpop.f32.mrb[98].mxu0 }
 0x1d4   : > { %2864 = vst.msk [vmem:[#allocation2 + $0x90] sm:$0xff] %vm574_vm3, %v2832_v15  ;;  %v3283_v23 = vadd.f32 %v3251_v20, %v3148_v59  ;;  %v5632_v21 = vpop.f32.mrb[100].mxu1  ;;  %v3168_v28 = vpop.f32.mrb[99].mxu0  ;;  %v2813_v20 = vld [vmem:[#allocation2 + $0xf8] sm:$0xff] }
 0x1d5   : > { %3316 = vst.msk [vmem:[#allocation2 + $0x78] sm:$0xff] %vm574_vm3, %v3284_v8  ;;  %v2835_v30 = vadd.f32 %v5632_v21, %v2803_v27  ;;  %v2723_v25 = vpop.f32.mrb[101].mxu1  ;;  %v2812_v27 = vld [vmem:[#allocation2 + $0xf0] sm:$0xff] }
 0x1d6   : > { %3315 = vst.msk [vmem:[#allocation2 + $0x70] sm:$0xff] %vm574_vm3, %v3283_v23  ;;  %v2834_v39 = vadd.f32 %v2802_v29, %v2723_v25  ;;  %v3254_v31 = vld [vmem:[#allocation2 + $0x88] sm:$0xff] }
 0x1d7   : > { %2867 = vst.msk [vmem:[#allocation2 + $0xa8] sm:$0xff] %vm574_vm3, %v2835_v30  ;;  %v3286_v4 = vadd.f32 %v5676_v22, %v3254_v31  ;;  %v3253_v43 = vld [vmem:[#allocation2 + $0x80] sm:$0xff]  ;;  %v5682_v32 = vpop.f32.mrb[100].mxu0 }
 0x1d8   : > { %2866 = vst.msk [vmem:[#allocation2 + $0xa0] sm:$0xff] %vm574_vm3, %v2834_v39  ;;  %v3285_v33 = vadd.f32 %v3253_v43, %v3158_v13  ;;  %v5635_v50 = vpop.f32.mrb[102].mxu1  ;;  %v3178_v34 = vpop.f32.mrb[101].mxu0  ;;  %v3692_v43 = vld [vmem:[#allocation2 + $0x8] sm:$0xff] }
 0x1d9   : > { %3318 = vst.msk [vmem:[#allocation2 + $0x88] sm:$0xff] %vm574_vm3, %v3286_v4  ;;  %v2837_v11 = vadd.f32 %v5635_v50, %v2805_v40  ;;  %v2733_v12 = vpop.f32.mrb[103].mxu1  ;;  %v3691_v40 = vld [vmem:[#allocation2] sm:$0xff] }
 0x1da   : > { %3317 = vst.msk [vmem:[#allocation2 + $0x80] sm:$0xff] %vm574_vm3, %v3285_v33  ;;  %v2836_v42 = vadd.f32 %v2804_v7, %v2733_v12  ;;  %v3256_v54 = vld [vmem:[#allocation2 + $0x98] sm:$0xff] }
 0x1db   : > { %2869 = vst.msk [vmem:[#allocation2 + $0xb8] sm:$0xff] %vm574_vm3, %v2837_v11  ;;  %v3288_v0 = vadd.f32 %v5679_v48, %v3256_v54  ;;  %v3255_v36 = vld [vmem:[#allocation2 + $0x90] sm:$0xff]  ;;  %v5685_v41 = vpop.f32.mrb[102].mxu0 }
 0x1dc   : > { %2868 = vst.msk [vmem:[#allocation2 + $0xb0] sm:$0xff] %vm574_vm3, %v2836_v42  ;;  %v3287_v52 = vadd.f32 %v3255_v36, %v3168_v28  ;;  %v5638_v35 = vpop.f32.mrb[104].mxu1  ;;  %v3188_v38 = vpop.f32.mrb[103].mxu0  ;;  %v3694_v36 = vld [vmem:[#allocation2 + $0x18] sm:$0xff] }
 0x1dd   : > { %3320 = vst.msk [vmem:[#allocation2 + $0x98] sm:$0xff] %vm574_vm3, %v3288_v0  ;;  %v2839_v2 = vadd.f32 %v5638_v35, %v2807_v44  ;;  %v2743_v45 = vpop.f32.mrb[105].mxu1  ;;  %v3693_v44 = vld [vmem:[#allocation2 + $0x10] sm:$0xff] }
 0x1de   : > { %3319 = vst.msk [vmem:[#allocation2 + $0x90] sm:$0xff] %vm574_vm3, %v3287_v52  ;;  %v2838_v5 = vadd.f32 %v2806_v3, %v2743_v45  ;;  %v3258_v37 = vld [vmem:[#allocation2 + $0xa8] sm:$0xff] }
 0x1df   : > { %2871 = vst.msk [vmem:[#allocation2 + $0xc8] sm:$0xff] %vm574_vm3, %v2839_v2  ;;  %v3290_v49 = vadd.f32 %v5682_v32, %v3258_v37  ;;  %v3257_v51 = vld [vmem:[#allocation2 + $0xa0] sm:$0xff]  ;;  %v5688_v56 = vpop.f32.mrb[104].mxu0 }
 0x1e0   : > { %2870 = vst.msk [vmem:[#allocation2 + $0xc0] sm:$0xff] %vm574_vm3, %v2838_v5  ;;  %v3289_v60 = vadd.f32 %v3257_v51, %v3178_v34  ;;  %v5641_v58 = vpop.f32.mrb[106].mxu1  ;;  %v3198_v55 = vpop.f32.mrb[105].mxu0  ;;  %v3696_v51 = vld [vmem:[#allocation2 + $0x28] sm:$0xff] }
 0x1e1   : > { %3322 = vst.msk [vmem:[#allocation2 + $0xa8] sm:$0xff] %vm574_vm3, %v3290_v49  ;;  %v2841_v62 = vadd.f32 %v5641_v58, %v2809_v53  ;;  %v2753_v14 = vpop.f32.mrb[107].mxu1  ;;  %v3695_v53 = vld [vmem:[#allocation2 + $0x20] sm:$0xff] }
 0x1e2   : > { %3321 = vst.msk [vmem:[#allocation2 + $0xa0] sm:$0xff] %vm574_vm3, %v3289_v60  ;;  %v2840_v59 = vadd.f32 %v2808_v57, %v2753_v14  ;;  %v3260_v16 = vld [vmem:[#allocation2 + $0xb8] sm:$0xff] }
 0x1e3   : > { %2873 = vst.msk [vmem:[#allocation2 + $0xd8] sm:$0xff] %vm574_vm3, %v2841_v62  ;;  %v3292_v46 = vadd.f32 %v5685_v41, %v3260_v16  ;;  %v3259_v61 = vld [vmem:[#allocation2 + $0xb0] sm:$0xff]  ;;  %v5691_v63 = vpop.f32.mrb[106].mxu0 }
 0x1e4   : > { %2872 = vst.msk [vmem:[#allocation2 + $0xd0] sm:$0xff] %vm574_vm3, %v2840_v59  ;;  %v3291_v17 = vadd.f32 %v3259_v61, %v3188_v38  ;;  %v5644_v19 = vpop.f32.mrb[108].mxu1  ;;  %v3208_v22 = vpop.f32.mrb[107].mxu0  ;;  %v3698_v61 = vld [vmem:[#allocation2 + $0x38] sm:$0xff] }
 0x1e5   : > { %3324 = vst.msk [vmem:[#allocation2 + $0xb8] sm:$0xff] %vm574_vm3, %v3292_v46  ;;  %v2843_v1 = vadd.f32 %v5644_v19, %v2811_v9  ;;  %v2763_v10 = vpop.f32.mrb[109].mxu1  ;;  %v3697_v9 = vld [vmem:[#allocation2 + $0x30] sm:$0xff] }
 0x1e6   : > { %3323 = vst.msk [vmem:[#allocation2 + $0xb0] sm:$0xff] %vm574_vm3, %v3291_v17  ;;  %v2842_v13 = vadd.f32 %v2810_v47, %v2763_v10  ;;  %v3262_v6 = vld [vmem:[#allocation2 + $0xc8] sm:$0xff] }
 0x1e7   : > { %2875 = vst.msk [vmem:[#allocation2 + $0xe8] sm:$0xff] %vm574_vm3, %v2843_v1  ;;  %v3294_v24 = vadd.f32 %v5688_v56, %v3262_v6  ;;  %v3261_v26 = vld [vmem:[#allocation2 + $0xc0] sm:$0xff]  ;;  %v5694_v15 = vpop.f32.mrb[108].mxu0 }
 0x1e8   : > { %2874 = vst.msk [vmem:[#allocation2 + $0xe0] sm:$0xff] %vm574_vm3, %v2842_v13  ;;  %v3293_v18 = vadd.f32 %v3261_v26, %v3198_v55  ;;  %v5647_v8 = vpop.f32.mrb[110].mxu1  ;;  %v3218_v48 = vpop.f32.mrb[109].mxu0  ;;  %v3700_v26 = vld [vmem:[#allocation2 + $0x48] sm:$0xff] }
 0x1e9   : > { %3326 = vst.msk [vmem:[#allocation2 + $0xc8] sm:$0xff] %vm574_vm3, %v3294_v24  ;;  %v2845_v23 = vadd.f32 %v5647_v8, %v2813_v20  ;;  %v2773_v21 = vpop.f32.mrb[111].mxu1  ;;  %v3699_v20 = vld [vmem:[#allocation2 + $0x40] sm:$0xff] }
 0x1ea   : > { %3325 = vst.msk [vmem:[#allocation2 + $0xc0] sm:$0xff] %vm574_vm3, %v3293_v18  ;;  %v2844_v28 = vadd.f32 %v2812_v27, %v2773_v21  ;;  %v3264_v30 = vld [vmem:[#allocation2 + $0xd8] sm:$0xff] }
 0x1eb   : > { %2877 = vst.msk [vmem:[#allocation2 + $0xf8] sm:$0xff] %vm574_vm3, %v2845_v23  ;;  %v3296_v25 = vadd.f32 %v5691_v63, %v3264_v30  ;;  %v3263_v29 = vld [vmem:[#allocation2 + $0xd0] sm:$0xff]  ;;  %v5697_v39 = vpop.f32.mrb[110].mxu0 }
 0x1ec   : > { %2876 = vst.msk [vmem:[#allocation2 + $0xf0] sm:$0xff] %vm574_vm3, %v2844_v28  ;;  %v3295_v31 = vadd.f32 %v3263_v29, %v3208_v22  ;;  %v5702_v4 = vpop.f32.mrb[112].mxu1  ;;  %v3228_v32 = vpop.f32.mrb[111].mxu0 }
 0x1ed   : > { %3328 = vst.msk [vmem:[#allocation2 + $0xd8] sm:$0xff] %vm574_vm3, %v3296_v25  ;;  %v3724_v33 = vadd.f32 %v5702_v4, %v3692_v43  ;;  %v3532_v50 = vpop.f32.mrb[113].mxu1 }
 0x1ee   : > { %3327 = vst.msk [vmem:[#allocation2 + $0xd0] sm:$0xff] %vm574_vm3, %v3295_v31  ;;  %v3723_v34 = vadd.f32 %v3691_v40, %v3532_v50  ;;  %v3266_v11 = vld [vmem:[#allocation2 + $0xe8] sm:$0xff]  ;;  %v3701_v50 = vld [vmem:[#allocation2 + $0x50] sm:$0xff] }
 0x1ef   : > { %3756 = vst.msk [vmem:[#allocation2 + $0x8] sm:$0xff] %vm574_vm3, %v3724_v33  ;;  %v3298_v12 = vadd.f32 %v5694_v15, %v3266_v11  ;;  %v3265_v7 = vld [vmem:[#allocation2 + $0xe0] sm:$0xff]  ;;  %v5752_v42 = vpop.f32.mrb[112].mxu0 }
 0x1f0   : > { %3755 = vst.msk [vmem:[#allocation2] sm:$0xff] %vm574_vm3, %v3723_v34  ;;  %v3297_v54 = vadd.f32 %v3265_v7, %v3218_v48  ;;  %v5705_v0 = vpop.f32.mrb[114].mxu1  ;;  %v3986_v41 = vpop.f32.mrb[113].mxu0 }
 0x1f1   : > { %3330 = vst.msk [vmem:[#allocation2 + $0xe8] sm:$0xff] %vm574_vm3, %v3298_v12  ;;  %v3726_v52 = vadd.f32 %v5705_v0, %v3694_v36  ;;  %v3542_v35 = vpop.f32.mrb[115].mxu1 }
 0x1f2   : > { %3329 = vst.msk [vmem:[#allocation2 + $0xe0] sm:$0xff] %vm574_vm3, %v3297_v54  ;;  %v3725_v38 = vadd.f32 %v3693_v44, %v3542_v35  ;;  %v3268_v2 = vld [vmem:[#allocation2 + $0xf8] sm:$0xff] }
 0x1f3   : > { %3758 = vst.msk [vmem:[#allocation2 + $0x18] sm:$0xff] %vm574_vm3, %v3726_v52  ;;  %v3300_v45 = vadd.f32 %v5697_v39, %v3268_v2  ;;  %v3267_v3 = vld [vmem:[#allocation2 + $0xf0] sm:$0xff]  ;;  %v5755_v5 = vpop.f32.mrb[114].mxu0  ;;  %v3702_v39 = vld [vmem:[#allocation2 + $0x58] sm:$0xff] }
 0x1f4   : > { %3757 = vst.msk [vmem:[#allocation2 + $0x10] sm:$0xff] %vm574_vm3, %v3725_v38  ;;  %v3299_v37 = vadd.f32 %v3267_v3, %v3228_v32  ;;  %v5708_v49 = vpop.f32.mrb[116].mxu1  ;;  %v3996_v56 = vpop.f32.mrb[115].mxu0  ;;  %v3704_v38 = vld [vmem:[#allocation2 + $0x68] sm:$0xff] }
 0x1f5   : > { %3332 = vst.msk [vmem:[#allocation2 + $0xf8] sm:$0xff] %vm574_vm3, %v3300_v45  ;;  %v3728_v60 = vadd.f32 %v5708_v49, %v3696_v51  ;;  %v3552_v58 = vpop.f32.mrb[117].mxu1  ;;  %v3703_v51 = vld [vmem:[#allocation2 + $0x60] sm:$0xff] }
 0x1f6   : > { %3331 = vst.msk [vmem:[#allocation2 + $0xf0] sm:$0xff] %vm574_vm3, %v3299_v37  ;;  %v3727_v55 = vadd.f32 %v3695_v53, %v3552_v58  ;;  %v4146_v62 = vld [vmem:[#allocation2 + $0x8] sm:$0xff] }
 0x1f7   : > { %3760 = vst.msk [vmem:[#allocation2 + $0x28] sm:$0xff] %vm574_vm3, %v3728_v60  ;;  %v4178_v14 = vadd.f32 %v5752_v42, %v4146_v62  ;;  %v4145_v57 = vld [vmem:[#allocation2] sm:$0xff]  ;;  %v5758_v59 = vpop.f32.mrb[116].mxu0 }
 0x1f8   : > { %3759 = vst.msk [vmem:[#allocation2 + $0x20] sm:$0xff] %vm574_vm3, %v3727_v55  ;;  %v4177_v16 = vadd.f32 %v4145_v57, %v3986_v41  ;;  %v5711_v46 = vpop.f32.mrb[118].mxu1  ;;  %v4006_v63 = vpop.f32.mrb[117].mxu0 }
 0x1f9   : > { %4210 = vst.msk [vmem:[#allocation2 + $0x8] sm:$0xff] %vm574_vm3, %v4178_v14  ;;  %v3730_v17 = vadd.f32 %v5711_v46, %v3698_v61  ;;  %v3562_v19 = vpop.f32.mrb[119].mxu1 }
 0x1fa   : > { %4209 = vst.msk [vmem:[#allocation2] sm:$0xff] %vm574_vm3, %v4177_v16  ;;  %v3729_v22 = vadd.f32 %v3697_v9, %v3562_v19  ;;  %v4148_v1 = vld [vmem:[#allocation2 + $0x18] sm:$0xff] }
 0x1fb   : > { %3762 = vst.msk [vmem:[#allocation2 + $0x38] sm:$0xff] %vm574_vm3, %v3730_v17  ;;  %v4180_v10 = vadd.f32 %v5755_v5, %v4148_v1  ;;  %v4147_v47 = vld [vmem:[#allocation2 + $0x10] sm:$0xff]  ;;  %v5761_v13 = vpop.f32.mrb[118].mxu0 }
 0x1fc   : > { %3761 = vst.msk [vmem:[#allocation2 + $0x30] sm:$0xff] %vm574_vm3, %v3729_v22  ;;  %v4179_v6 = vadd.f32 %v4147_v47, %v3996_v56  ;;  %v5714_v24 = vpop.f32.mrb[120].mxu1  ;;  %v4016_v15 = vpop.f32.mrb[119].mxu0 }
 0x1fd   : > { %4212 = vst.msk [vmem:[#allocation2 + $0x18] sm:$0xff] %vm574_vm3, %v4180_v10  ;;  %v3732_v18 = vadd.f32 %v5714_v24, %v3700_v26  ;;  %v3572_v8 = vpop.f32.mrb[121].mxu1  ;;  %v3705_v24 = vld [vmem:[#allocation2 + $0x70] sm:$0xff] }
 0x1fe   : > { %4211 = vst.msk [vmem:[#allocation2 + $0x10] sm:$0xff] %vm574_vm3, %v4179_v6  ;;  %v3731_v48 = vadd.f32 %v3699_v20, %v3572_v8  ;;  %v4150_v23 = vld [vmem:[#allocation2 + $0x28] sm:$0xff] }
 0x1ff   : > { %3764 = vst.msk [vmem:[#allocation2 + $0x48] sm:$0xff] %vm574_vm3, %v3732_v18  ;;  %v4182_v21 = vadd.f32 %v5758_v59, %v4150_v23  ;;  %v4149_v27 = vld [vmem:[#allocation2 + $0x20] sm:$0xff]  ;;  %v5764_v28 = vpop.f32.mrb[120].mxu0 }
 0x200   : > { %v4242_v30 = vld [vmem:[#allocation2 + $0x8] sm:$0xff]  ;;  %3763 = vst.msk [vmem:[#allocation2 + $0x40] sm:$0xff] %vm574_vm3, %v3731_v48  ;;  %v4181_v25 = vadd.f32 %v4149_v27, %v4006_v63  ;;  %v5717_v29 = vpop.f32.mrb[122].mxu1  ;;  %v4026_v31 = vpop.f32.mrb[121].mxu0 }
 0x201   : > { %4274 = vst.msk [vmem:[%s5943_s12 + $0x8] sm:$0xff] %vm574_vm3, %v4242_v30  ;;  %v4373_v4 = vmul.f32 %v4242_v30, %v4242_v30  ;;  %v4241_v43 = vld [vmem:[#allocation2] sm:$0xff]  ;;  %4214 = vst.msk [vmem:[#allocation2 + $0x28] sm:$0xff] %vm574_vm3, %v4182_v21  ;;  %v3734_v32 = vadd.f32 %v5717_v29, %v3702_v39  ;;  %v3582_v33 = vpop.f32.mrb[123].mxu1  ;;  %v4307_v40 = vsel %vm574_vm3, %v4242_v30, 0.0 }
 0x202   : > { %4273 = vst.msk [vmem:[%s5943_s12] sm:$0xff] %vm574_vm3, %v4241_v43  ;;  %v4306_v34 = vsel %vm574_vm3, %v4241_v43, 0.0  ;;  %v4372_v11 = vmul.f32 %v4241_v43, %v4241_v43  ;;  %4213 = vst.msk [vmem:[#allocation2 + $0x20] sm:$0xff] %vm574_vm3, %v4181_v25  ;;  %v3733_v12 = vadd.f32 %v3701_v50, %v3582_v33  ;;  %v4152_v7 = vld [vmem:[#allocation2 + $0x38] sm:$0xff] }
 0x203   : > { %3766 = vst.msk [vmem:[#allocation2 + $0x58] sm:$0xff] %vm574_vm3, %v3734_v32  ;;  %v4184_v42 = vadd.f32 %v5761_v13, %v4152_v7  ;;  %v4151_v54 = vld [vmem:[#allocation2 + $0x30] sm:$0xff]  ;;  %v5767_v0 = vpop.f32.mrb[122].mxu0  ;;  %v4405_v36 = vsel %vm574_vm3, %v4373_v4, 0.0  ;;  %v4308_v45 = vadd.f32 %v4307_v40, %v4306_v34  ;;  %v3706_v13 = vld [vmem:[#allocation2 + $0x78] sm:$0xff]  ;;  %v3708_v34 = vld [vmem:[#allocation2 + $0x88] sm:$0xff] }
 0x204   : > { %v4404_v41 = vsel %vm574_vm3, %v4372_v11, 0.0  ;;  %v4244_v52 = vld [vmem:[#allocation2 + $0x18] sm:$0xff]  ;;  %3765 = vst.msk [vmem:[#allocation2 + $0x50] sm:$0xff] %vm574_vm3, %v3733_v12  ;;  %v4183_v35 = vadd.f32 %v4151_v54, %v4016_v15  ;;  %v5720_v44 = vpop.f32.mrb[124].mxu1  ;;  %v4036_v2 = vpop.f32.mrb[123].mxu0  ;;  %v3707_v12 = vld [vmem:[#allocation2 + $0x80] sm:$0xff] }
 0x205   : > { %4276 = vst.msk [vmem:[%s5943_s12 + $0x18] sm:$0xff] %vm574_vm3, %v4244_v52  ;;  %v4375_v3 = vmul.f32 %v4244_v52, %v4244_v52  ;;  %v4243_v5 = vld [vmem:[#allocation2 + $0x10] sm:$0xff]  ;;  %4216 = vst.msk [vmem:[#allocation2 + $0x38] sm:$0xff] %vm574_vm3, %v4184_v42  ;;  %v3736_v37 = vadd.f32 %v5720_v44, %v3704_v38  ;;  %v3592_v49 = vpop.f32.mrb[125].mxu1  ;;  %v4406_v55 = vadd.f32 %v4405_v36, %v4404_v41  ;;  %v4311_v16 = vsel %vm574_vm3, %v4244_v52, 0.0 }
 0x206   : > { %4275 = vst.msk [vmem:[%s5943_s12 + $0x10] sm:$0xff] %vm574_vm3, %v4243_v5  ;;  %v4309_v56 = vsel %vm574_vm3, %v4243_v5, 0.0  ;;  %v4374_v60 = vmul.f32 %v4243_v5, %v4243_v5  ;;  %4215 = vst.msk [vmem:[#allocation2 + $0x30] sm:$0xff] %vm574_vm3, %v4183_v35  ;;  %v3735_v58 = vadd.f32 %v3703_v51, %v3592_v49  ;;  %v4154_v53 = vld [vmem:[#allocation2 + $0x48] sm:$0xff] }
 0x207   : > { %v4310_v62 = vadd.f32 %v4309_v56, %v4308_v45  ;;  %3768 = vst.msk [vmem:[#allocation2 + $0x68] sm:$0xff] %vm574_vm3, %v3736_v37  ;;  %v4186_v14 = vadd.f32 %v5764_v28, %v4154_v53  ;;  %v4153_v57 = vld [vmem:[#allocation2 + $0x40] sm:$0xff]  ;;  %v5770_v59 = vpop.f32.mrb[124].mxu0  ;;  %v4409_v9 = vsel %vm574_vm3, %v4375_v3, 0.0 }
 0x208   : > { %v4407_v46 = vsel %vm574_vm3, %v4374_v60, 0.0  ;;  %v4246_v61 = vld [vmem:[#allocation2 + $0x28] sm:$0xff]  ;;  %3767 = vst.msk [vmem:[#allocation2 + $0x60] sm:$0xff] %vm574_vm3, %v3735_v58  ;;  %v4185_v63 = vadd.f32 %v4153_v57, %v4026_v31  ;;  %v5723_v17 = vpop.f32.mrb[126].mxu1  ;;  %v4046_v19 = vpop.f32.mrb[125].mxu0 }
 0x209   : > { %v4408_v22 = vadd.f32 %v4407_v46, %v4406_v55  ;;  %4278 = vst.msk [vmem:[%s5943_s12 + $0x28] sm:$0xff] %vm574_vm3, %v4246_v61  ;;  %v4377_v1 = vmul.f32 %v4246_v61, %v4246_v61  ;;  %v4245_v10 = vld [vmem:[#allocation2 + $0x20] sm:$0xff]  ;;  %v4312_v47 = vadd.f32 %v4311_v16, %v4310_v62  ;;  %4218 = vst.msk [vmem:[#allocation2 + $0x48] sm:$0xff] %vm574_vm3, %v4186_v14  ;;  %v3602_v6 = vpop.f32.mrb[127].mxu1  ;;  %v4315_v30 = vsel %vm574_vm3, %v4246_v61, 0.0  ;;  %v3710_v55 = vld [vmem:[#allocation2 + $0x98] sm:$0xff] }
 0x20a   : > { %4277 = vst.msk [vmem:[%s5943_s12 + $0x20] sm:$0xff] %vm574_vm3, %v4245_v10  ;;  %v4313_v26 = vsel %vm574_vm3, %v4245_v10, 0.0  ;;  %v4376_v15 = vmul.f32 %v4245_v10, %v4245_v10  ;;  %4217 = vst.msk [vmem:[#allocation2 + $0x40] sm:$0xff] %vm574_vm3, %v4185_v63  ;;  %v3738_v18 = vadd.f32 %v5723_v17, %v3706_v13  ;;  %v3737_v8 = vadd.f32 %v3705_v24, %v3602_v6  ;;  %v4156_v20 = vld [vmem:[#allocation2 + $0x58] sm:$0xff]  ;;  %v3709_v14 = vld [vmem:[#allocation2 + $0x90] sm:$0xff] }
 0x20b   : > { %v4314_v48 = vadd.f32 %v4313_v26, %v4312_v47  ;;  %v4410_v23 = vadd.f32 %v4409_v9, %v4408_v22  ;;  %v4188_v21 = vadd.f32 %v5767_v0, %v4156_v20  ;;  %v4155_v27 = vld [vmem:[#allocation2 + $0x50] sm:$0xff]  ;;  %v7127_v28 = vpop.f32.mrb[126].mxu0  ;;  %v4413_v43 = vsel %vm574_vm3, %v4377_v1, 0.0 }
 0x20c   : > { %v4411_v25 = vsel %vm574_vm3, %v4376_v15, 0.0  ;;  %v4248_v29 = vld [vmem:[#allocation2 + $0x38] sm:$0xff]  ;;  %3770 = vst.msk [vmem:[#allocation2 + $0x78] sm:$0xff] %vm574_vm3, %v3738_v18  ;;  %3769 = vst.msk [vmem:[#allocation2 + $0x70] sm:$0xff] %vm574_vm3, %v3737_v8  ;;  %v4187_v39 = vadd.f32 %v4155_v27, %v4036_v2  ;;  %v5726_v31 = vpop.f32.mrb[128].mxu1  ;;  %v4056_v4 = vpop.f32.mrb[127].mxu0 }
 0x20d   : > { %v4412_v32 = vadd.f32 %v4411_v25, %v4410_v23  ;;  %4280 = vst.msk [vmem:[%s5943_s12 + $0x38] sm:$0xff] %vm574_vm3, %v4248_v29  ;;  %v4379_v33 = vmul.f32 %v4248_v29, %v4248_v29  ;;  %v4247_v50 = vld [vmem:[#allocation2 + $0x30] sm:$0xff]  ;;  %v4316_v40 = vadd.f32 %v4315_v30, %v4314_v48  ;;  %4220 = vst.msk [vmem:[#allocation2 + $0x58] sm:$0xff] %vm574_vm3, %v4188_v21  ;;  %v3612_v11 = vpop.f32.mrb[129].mxu1  ;;  %v4319_v2 = vsel %vm574_vm3, %v4248_v29, 0.0  ;;  %v3712_v48 = vld [vmem:[#allocation2 + $0xa8] sm:$0xff] }
 0x20e   : > { %4279 = vst.msk [vmem:[%s5943_s12 + $0x30] sm:$0xff] %vm574_vm3, %v4247_v50  ;;  %v4317_v7 = vsel %vm574_vm3, %v4247_v50, 0.0  ;;  %v4378_v42 = vmul.f32 %v4247_v50, %v4247_v50  ;;  %4219 = vst.msk [vmem:[#allocation2 + $0x50] sm:$0xff] %vm574_vm3, %v4187_v39  ;;  %v3740_v54 = vadd.f32 %v5726_v31, %v3708_v34  ;;  %v3739_v0 = vadd.f32 %v3707_v12, %v3612_v11  ;;  %v4158_v36 = vld [vmem:[#allocation2 + $0x68] sm:$0xff]  ;;  %v3711_v21 = vld [vmem:[#allocation2 + $0xa0] sm:$0xff] }
 0x20f   : > { %v4318_v41 = vadd.f32 %v4317_v7, %v4316_v40  ;;  %v4414_v52 = vadd.f32 %v4413_v43, %v4412_v32  ;;  %v4190_v35 = vadd.f32 %v5770_v59, %v4158_v36  ;;  %v4157_v44 = vld [vmem:[#allocation2 + $0x60] sm:$0xff]  ;;  %v7141_v38 = vpop.f32.mrb[128].mxu0  ;;  %v4417_v51 = vsel %vm574_vm3, %v4379_v33, 0.0 }
 0x210   : > { %v4415_v45 = vsel %vm574_vm3, %v4378_v42, 0.0  ;;  %v4250_v3 = vld [vmem:[#allocation2 + $0x48] sm:$0xff]  ;;  %3772 = vst.msk [vmem:[#allocation2 + $0x88] sm:$0xff] %vm574_vm3, %v3740_v54  ;;  %3771 = vst.msk [vmem:[#allocation2 + $0x80] sm:$0xff] %vm574_vm3, %v3739_v0  ;;  %v4189_v5 = vadd.f32 %v4157_v44, %v4046_v19  ;;  %v5729_v37 = vpop.f32.mrb[130].mxu1  ;;  %v4066_v49 = vpop.f32.mrb[129].mxu0 }
 0x211   : > { %v4416_v56 = vadd.f32 %v4415_v45, %v4414_v52  ;;  %4282 = vst.msk [vmem:[%s5943_s12 + $0x48] sm:$0xff] %vm574_vm3, %v4250_v3  ;;  %v4381_v60 = vmul.f32 %v4250_v3, %v4250_v3  ;;  %v4249_v58 = vld [vmem:[#allocation2 + $0x40] sm:$0xff]  ;;  %v4320_v53 = vadd.f32 %v4319_v2, %v4318_v41  ;;  %4222 = vst.msk [vmem:[#allocation2 + $0x68] sm:$0xff] %vm574_vm3, %v4190_v35  ;;  %v3622_v62 = vpop.f32.mrb[131].mxu1  ;;  %v4323_v22 = vsel %vm574_vm3, %v4250_v3, 0.0  ;;  %v3714_v41 = vld [vmem:[#allocation2 + $0xb8] sm:$0xff] }
 0x212   : > { %4281 = vst.msk [vmem:[%s5943_s12 + $0x40] sm:$0xff] %vm574_vm3, %v4249_v58  ;;  %v4321_v57 = vsel %vm574_vm3, %v4249_v58, 0.0  ;;  %v4380_v59 = vmul.f32 %v4249_v58, %v4249_v58  ;;  %4221 = vst.msk [vmem:[#allocation2 + $0x60] sm:$0xff] %vm574_vm3, %v4189_v5  ;;  %v3742_v16 = vadd.f32 %v5729_v37, %v3710_v55  ;;  %v3741_v46 = vadd.f32 %v3709_v14, %v3622_v62  ;;  %v3713_v35 = vld [vmem:[#allocation2 + $0xb0] sm:$0xff]  ;;  %v3716_v62 = vld [vmem:[#allocation2 + $0xc8] sm:$0xff] }
 0x213   : > { %v4322_v61 = vadd.f32 %v4321_v57, %v4320_v53  ;;  %v4418_v63 = vadd.f32 %v4417_v51, %v4416_v56  ;;  %v4160_v17 = vld [vmem:[#allocation2 + $0x78] sm:$0xff]  ;;  %v4159_v19 = vld [vmem:[#allocation2 + $0x70] sm:$0xff]  ;;  %v7155_v9 = vpop.f32.mrb[130].mxu0  ;;  %v4421_v26 = vsel %vm574_vm3, %v4381_v60, 0.0 }
 0x214   : > { %v4419_v1 = vsel %vm574_vm3, %v4380_v59, 0.0  ;;  %v4252_v10 = vld [vmem:[#allocation2 + $0x58] sm:$0xff]  ;;  %3774 = vst.msk [vmem:[#allocation2 + $0x98] sm:$0xff] %vm574_vm3, %v3742_v16  ;;  %3773 = vst.msk [vmem:[#allocation2 + $0x90] sm:$0xff] %vm574_vm3, %v3741_v46  ;;  %v4192_v47 = vadd.f32 %v7127_v28, %v4160_v17  ;;  %v4191_v13 = vadd.f32 %v4159_v19, %v4056_v4  ;;  %v5732_v6 = vpop.f32.mrb[132].mxu1  ;;  %v4076_v24 = vpop.f32.mrb[131].mxu0 }
 0x215   : > { %v4420_v15 = vadd.f32 %v4419_v1, %v4418_v63  ;;  %4284 = vst.msk [vmem:[%s5943_s12 + $0x58] sm:$0xff] %vm574_vm3, %v4252_v10  ;;  %v4383_v18 = vmul.f32 %v4252_v10, %v4252_v10  ;;  %v4251_v8 = vld [vmem:[#allocation2 + $0x50] sm:$0xff]  ;;  %v4324_v20 = vadd.f32 %v4323_v22, %v4322_v61  ;;  %v3632_v23 = vpop.f32.mrb[133].mxu1  ;;  %v3744_v28 = vadd.f32 %v5732_v6, %v3712_v48  ;;  %v3715_v1 = vld [vmem:[#allocation2 + $0xc0] sm:$0xff] }
 0x216   : > { %4283 = vst.msk [vmem:[%s5943_s12 + $0x50] sm:$0xff] %vm574_vm3, %v4251_v8  ;;  %v4325_v27 = vsel %vm574_vm3, %v4251_v8, 0.0  ;;  %v4382_v30 = vmul.f32 %v4251_v8, %v4251_v8  ;;  %4224 = vst.msk [vmem:[#allocation2 + $0x78] sm:$0xff] %vm574_vm3, %v4192_v47  ;;  %v3743_v25 = vadd.f32 %v3711_v21, %v3632_v23  ;;  %v4327_v32 = vsel %vm574_vm3, %v4252_v10, 0.0  ;;  %v3718_v23 = vld [vmem:[#allocation2 + $0xd8] sm:$0xff] }
 0x217   : > { %4223 = vst.msk [vmem:[#allocation2 + $0x70] sm:$0xff] %vm574_vm3, %v4191_v13  ;;  %v4326_v29 = vadd.f32 %v4325_v27, %v4324_v20  ;;  %v4422_v39 = vadd.f32 %v4421_v26, %v4420_v15  ;;  %v4162_v31 = vld [vmem:[#allocation2 + $0x88] sm:$0xff]  ;;  %v4161_v4 = vld [vmem:[#allocation2 + $0x80] sm:$0xff]  ;;  %v7170_v43 = vpop.f32.mrb[132].mxu0  ;;  %3776 = vst.msk [vmem:[#allocation2 + $0xa8] sm:$0xff] %vm574_vm3, %v3744_v28  ;;  %v4425_v7 = vsel %vm574_vm3, %v4383_v18, 0.0 }
 0x218   : > { %v4423_v33 = vsel %vm574_vm3, %v4382_v30, 0.0  ;;  %v4254_v50 = vld [vmem:[#allocation2 + $0x68] sm:$0xff]  ;;  %3775 = vst.msk [vmem:[#allocation2 + $0xa0] sm:$0xff] %vm574_vm3, %v3743_v25  ;;  %v4194_v40 = vadd.f32 %v7141_v38, %v4162_v31  ;;  %v4193_v34 = vadd.f32 %v4161_v4, %v4066_v49  ;;  %v5735_v11 = vpop.f32.mrb[134].mxu1  ;;  %v4086_v12 = vpop.f32.mrb[133].mxu0 }
 0x219   : > { %v4424_v42 = vadd.f32 %v4423_v33, %v4422_v39  ;;  %4286 = vst.msk [vmem:[%s5943_s12 + $0x68] sm:$0xff] %vm574_vm3, %v4254_v50  ;;  %v4385_v54 = vmul.f32 %v4254_v50, %v4254_v50  ;;  %v4253_v0 = vld [vmem:[#allocation2 + $0x60] sm:$0xff]  ;;  %v4328_v36 = vadd.f32 %v4327_v32, %v4326_v29  ;;  %v3642_v52 = vpop.f32.mrb[135].mxu1  ;;  %v3746_v38 = vadd.f32 %v5735_v11, %v3714_v41  ;;  %v3717_v33 = vld [vmem:[#allocation2 + $0xd0] sm:$0xff] }
 0x21a   : > { %4285 = vst.msk [vmem:[%s5943_s12 + $0x60] sm:$0xff] %vm574_vm3, %v4253_v0  ;;  %v4329_v44 = vsel %vm574_vm3, %v4253_v0, 0.0  ;;  %v4384_v2 = vmul.f32 %v4253_v0, %v4253_v0  ;;  %4226 = vst.msk [vmem:[#allocation2 + $0x88] sm:$0xff] %vm574_vm3, %v4194_v40  ;;  %v3745_v45 = vadd.f32 %v3713_v35, %v3642_v52  ;;  %v4331_v56 = vsel %vm574_vm3, %v4254_v50, 0.0  ;;  %v3720_v52 = vld [vmem:[#allocation2 + $0xe8] sm:$0xff] }
 0x21b   : > { %4225 = vst.msk [vmem:[#allocation2 + $0x80] sm:$0xff] %vm574_vm3, %v4193_v34  ;;  %v4330_v3 = vadd.f32 %v4329_v44, %v4328_v36  ;;  %v4426_v5 = vadd.f32 %v4425_v7, %v4424_v42  ;;  %v4164_v37 = vld [vmem:[#allocation2 + $0x98] sm:$0xff]  ;;  %v4163_v49 = vld [vmem:[#allocation2 + $0x90] sm:$0xff]  ;;  %v7185_v51 = vpop.f32.mrb[134].mxu0  ;;  %3778 = vst.msk [vmem:[#allocation2 + $0xb8] sm:$0xff] %vm574_vm3, %v3746_v38  ;;  %v4429_v17 = vsel %vm574_vm3, %v4385_v54, 0.0 }
 0x21c   : > { %v4427_v60 = vsel %vm574_vm3, %v4384_v2, 0.0  ;;  %3777 = vst.msk [vmem:[#allocation2 + $0xb0] sm:$0xff] %vm574_vm3, %v3745_v45  ;;  %v4196_v58 = vadd.f32 %v7155_v9, %v4164_v37  ;;  %v4195_v53 = vadd.f32 %v4163_v49, %v4076_v24  ;;  %v5738_v55 = vpop.f32.mrb[136].mxu1  ;;  %v4096_v14 = vpop.f32.mrb[135].mxu0 }
 0x21d   : > { %v4428_v57 = vadd.f32 %v4427_v60, %v4426_v5  ;;  %v4256_v59 = vld [vmem:[#allocation2 + $0x78] sm:$0xff]  ;;  %v4332_v46 = vadd.f32 %v4331_v56, %v4330_v3  ;;  %v3748_v61 = vadd.f32 %v5738_v55, %v3716_v62  ;;  %v3652_v63 = vpop.f32.mrb[137].mxu1  ;;  %v3719_v60 = vld [vmem:[#allocation2 + $0xe0] sm:$0xff] }
 0x21e   : > { %v4255_v16 = vld [vmem:[#allocation2 + $0x70] sm:$0xff]  ;;  %4288 = vst.msk [vmem:[%s5943_s12 + $0x78] sm:$0xff] %vm574_vm3, %v4256_v59  ;;  %v4387_v19 = vmul.f32 %v4256_v59, %v4256_v59  ;;  %4228 = vst.msk [vmem:[#allocation2 + $0x98] sm:$0xff] %vm574_vm3, %v4196_v58  ;;  %v3747_v13 = vadd.f32 %v3715_v1, %v3652_v63  ;;  %v4166_v6 = vld [vmem:[#allocation2 + $0xa8] sm:$0xff]  ;;  %v4335_v15 = vsel %vm574_vm3, %v4256_v59, 0.0 }
 0x21f   : > { %4287 = vst.msk [vmem:[%s5943_s12 + $0x70] sm:$0xff] %vm574_vm3, %v4255_v16  ;;  %v4333_v22 = vsel %vm574_vm3, %v4255_v16, 0.0  ;;  %v4386_v9 = vmul.f32 %v4255_v16, %v4255_v16  ;;  %4227 = vst.msk [vmem:[#allocation2 + $0x90] sm:$0xff] %vm574_vm3, %v4195_v53  ;;  %v4430_v47 = vadd.f32 %v4429_v17, %v4428_v57  ;;  %v4165_v24 = vld [vmem:[#allocation2 + $0xa0] sm:$0xff]  ;;  %v5788_v26 = vpop.f32.mrb[136].mxu0  ;;  %v4198_v8 = vadd.f32 %v7170_v43, %v4166_v6  ;;  %v3722_v63 = vld [vmem:[#allocation2 + $0xf8] sm:$0xff] }
 0x220   : > { %v4334_v10 = vadd.f32 %v4333_v22, %v4332_v46  ;;  %3780 = vst.msk [vmem:[#allocation2 + $0xc8] sm:$0xff] %vm574_vm3, %v3748_v61  ;;  %v4197_v20 = vadd.f32 %v4165_v24, %v4086_v12  ;;  %v5741_v48 = vpop.f32.mrb[138].mxu1  ;;  %v7204_v21 = vpop.f32.mrb[137].mxu0  ;;  %3779 = vst.msk [vmem:[#allocation2 + $0xc0] sm:$0xff] %vm574_vm3, %v3747_v13  ;;  %v4433_v31 = vsel %vm574_vm3, %v4387_v19, 0.0 }
 0x221   : > { %v4431_v18 = vsel %vm574_vm3, %v4386_v9, 0.0  ;;  %v4258_v30 = vld [vmem:[#allocation2 + $0x88] sm:$0xff]  ;;  %v3750_v29 = vadd.f32 %v5741_v48, %v3718_v23  ;;  %v3662_v39 = vpop.f32.mrb[139].mxu1  ;;  %4230 = vst.msk [vmem:[#allocation2 + $0xa8] sm:$0xff] %vm574_vm3, %v4198_v8 }
 0x222   : > { %v4432_v27 = vadd.f32 %v4431_v18, %v4430_v47  ;;  %v4257_v28 = vld [vmem:[#allocation2 + $0x80] sm:$0xff]  ;;  %v4336_v25 = vadd.f32 %v4335_v15, %v4334_v10  ;;  %4290 = vst.msk [vmem:[%s5943_s12 + $0x88] sm:$0xff] %vm574_vm3, %v4258_v30  ;;  %v4389_v4 = vmul.f32 %v4258_v30, %v4258_v30  ;;  %4229 = vst.msk [vmem:[#allocation2 + $0xa0] sm:$0xff] %vm574_vm3, %v4197_v20  ;;  %v4168_v11 = vld [vmem:[#allocation2 + $0xb8] sm:$0xff]  ;;  %v4339_v42 = vsel %vm574_vm3, %v4258_v30, 0.0 }
 0x223   : > { %4289 = vst.msk [vmem:[%s5943_s12 + $0x80] sm:$0xff] %vm574_vm3, %v4257_v28  ;;  %v4337_v43 = vsel %vm574_vm3, %v4257_v28, 0.0  ;;  %v4388_v32 = vmul.f32 %v4257_v28, %v4257_v28  ;;  %3782 = vst.msk [vmem:[#allocation2 + $0xd8] sm:$0xff] %vm574_vm3, %v3750_v29  ;;  %v3749_v34 = vadd.f32 %v3717_v33, %v3662_v39  ;;  %v4167_v12 = vld [vmem:[#allocation2 + $0xb0] sm:$0xff]  ;;  %v5791_v7 = vpop.f32.mrb[138].mxu0  ;;  %v4200_v0 = vadd.f32 %v7185_v51, %v4168_v11 }
 0x224   : > { %v4338_v50 = vadd.f32 %v4337_v43, %v4336_v25  ;;  %v4434_v40 = vadd.f32 %v4433_v31, %v4432_v27  ;;  %v4199_v36 = vadd.f32 %v4167_v12, %v4096_v14  ;;  %v5744_v41 = vpop.f32.mrb[140].mxu1  ;;  %v7219_v35 = vpop.f32.mrb[139].mxu0  ;;  %v4437_v37 = vsel %vm574_vm3, %v4389_v4, 0.0  ;;  %v3721_v18 = vld [vmem:[#allocation2 + $0xf0] sm:$0xff] }
 0x225   : > { %v4435_v54 = vsel %vm574_vm3, %v4388_v32, 0.0  ;;  %v4260_v2 = vld [vmem:[#allocation2 + $0x98] sm:$0xff]  ;;  %3781 = vst.msk [vmem:[#allocation2 + $0xd0] sm:$0xff] %vm574_vm3, %v3749_v34  ;;  %v3752_v3 = vadd.f32 %v5744_v41, %v3720_v52  ;;  %v3672_v5 = vpop.f32.mrb[141].mxu1  ;;  %4232 = vst.msk [vmem:[#allocation2 + $0xb8] sm:$0xff] %vm574_vm3, %v4200_v0 }
 0x226   : > { %v4436_v44 = vadd.f32 %v4435_v54, %v4434_v40  ;;  %v4259_v38 = vld [vmem:[#allocation2 + $0x90] sm:$0xff]  ;;  %v4340_v45 = vadd.f32 %v4339_v42, %v4338_v50  ;;  %4292 = vst.msk [vmem:[%s5943_s12 + $0x98] sm:$0xff] %vm574_vm3, %v4260_v2  ;;  %v4391_v49 = vmul.f32 %v4260_v2, %v4260_v2  ;;  %4231 = vst.msk [vmem:[#allocation2 + $0xb0] sm:$0xff] %vm574_vm3, %v4199_v36  ;;  %v4343_v59 = vsel %vm574_vm3, %v4260_v2, 0.0 }
 0x227   : > { %4291 = vst.msk [vmem:[%s5943_s12 + $0x90] sm:$0xff] %vm574_vm3, %v4259_v38  ;;  %v4341_v51 = vsel %vm574_vm3, %v4259_v38, 0.0  ;;  %v4390_v56 = vmul.f32 %v4259_v38, %v4259_v38  ;;  %v4170_v58 = vld [vmem:[#allocation2 + $0xc8] sm:$0xff]  ;;  %3784 = vst.msk [vmem:[#allocation2 + $0xe8] sm:$0xff] %vm574_vm3, %v3752_v3  ;;  %v3751_v62 = vadd.f32 %v3719_v60, %v3672_v5  ;;  %v5794_v57 = vpop.f32.mrb[140].mxu0  ;;  %v4169_v46 = vld [vmem:[#allocation2 + $0xc0] sm:$0xff] }
 0x228   : > { %v4342_v53 = vadd.f32 %v4341_v51, %v4340_v45  ;;  %v4438_v55 = vadd.f32 %v4437_v37, %v4436_v44  ;;  %v4202_v14 = vadd.f32 %v5788_v26, %v4170_v58  ;;  %v5747_v61 = vpop.f32.mrb[142].mxu1  ;;  %v4126_v17 = vpop.f32.mrb[141].mxu0  ;;  %v4262_v22 = vld [vmem:[#allocation2 + $0xa8] sm:$0xff]  ;;  %v4201_v10 = vadd.f32 %v4169_v46, %v7204_v21 }
 0x229   : > { %v4439_v16 = vsel %vm574_vm3, %v4390_v56, 0.0  ;;  %v4261_v9 = vld [vmem:[#allocation2 + $0xa0] sm:$0xff]  ;;  %3783 = vst.msk [vmem:[#allocation2 + $0xe0] sm:$0xff] %vm574_vm3, %v3751_v62  ;;  %v3754_v47 = vadd.f32 %v5747_v61, %v3722_v63  ;;  %v3682_v13 = vpop.f32.mrb[143].mxu1  ;;  %v4441_v6 = vsel %vm574_vm3, %v4391_v49, 0.0  ;;  %4294 = vst.msk [vmem:[%s5943_s12 + $0xa8] sm:$0xff] %vm574_vm3, %v4262_v22  ;;  %v4393_v24 = vmul.f32 %v4262_v22, %v4262_v22 }
 0x22a   : > { %v4440_v19 = vadd.f32 %v4439_v16, %v4438_v55  ;;  %v4344_v1 = vadd.f32 %v4343_v59, %v4342_v53  ;;  %4234 = vst.msk [vmem:[#allocation2 + $0xc8] sm:$0xff] %vm574_vm3, %v4202_v14  ;;  %4293 = vst.msk [vmem:[%s5943_s12 + $0xa0] sm:$0xff] %vm574_vm3, %v4261_v9  ;;  %v4345_v26 = vsel %vm574_vm3, %v4261_v9, 0.0  ;;  %v4392_v15 = vmul.f32 %v4261_v9, %v4261_v9  ;;  %v4172_v8 = vld [vmem:[#allocation2 + $0xd8] sm:$0xff] }
 0x22b   : > { %4233 = vst.msk [vmem:[#allocation2 + $0xc0] sm:$0xff] %vm574_vm3, %v4201_v10  ;;  %3786 = vst.msk [vmem:[#allocation2 + $0xf8] sm:$0xff] %vm574_vm3, %v3754_v47  ;;  %v3753_v23 = vadd.f32 %v3721_v18, %v3682_v13  ;;  %v4204_v21 = vadd.f32 %v5791_v7, %v4172_v8  ;;  %v5797_v27 = vpop.f32.mrb[142].mxu0  ;;  %v4347_v30 = vsel %vm574_vm3, %v4262_v22, 0.0  ;;  %v4445_v33 = vsel %vm574_vm3, %v4393_v24, 0.0 }
 0x22c   : > { %v4346_v20 = vadd.f32 %v4345_v26, %v4344_v1  ;;  %v4442_v48 = vadd.f32 %v4441_v6, %v4440_v19  ;;  %v4443_v28 = vsel %vm574_vm3, %v4392_v15, 0.0  ;;  %v4171_v25 = vld [vmem:[#allocation2 + $0xd0] sm:$0xff]  ;;  %v4136_v29 = vpop.f32.mrb[143].mxu0  ;;  %v4264_v31 = vld [vmem:[#allocation2 + $0xb8] sm:$0xff] }
 0x22d   : > { %v4263_v4 = vld [vmem:[#allocation2 + $0xb0] sm:$0xff]  ;;  %3785 = vst.msk [vmem:[#allocation2 + $0xf0] sm:$0xff] %vm574_vm3, %v3753_v23  ;;  %4236 = vst.msk [vmem:[#allocation2 + $0xd8] sm:$0xff] %vm574_vm3, %v4204_v21  ;;  %v4203_v32 = vadd.f32 %v4171_v25, %v7219_v35  ;;  %v4395_v50 = vmul.f32 %v4264_v31, %v4264_v31  ;;  %v4351_v54 = vsel %vm574_vm3, %v4264_v31, 0.0 }
 0x22e   : > { %v4444_v39 = vadd.f32 %v4443_v28, %v4442_v48  ;;  %v4348_v43 = vadd.f32 %v4347_v30, %v4346_v20  ;;  %4296 = vst.msk [vmem:[%s5943_s12 + $0xb8] sm:$0xff] %vm574_vm3, %v4264_v31  ;;  %4295 = vst.msk [vmem:[%s5943_s12 + $0xb0] sm:$0xff] %vm574_vm3, %v4263_v4  ;;  %v4349_v40 = vsel %vm574_vm3, %v4263_v4, 0.0  ;;  %v4394_v34 = vmul.f32 %v4263_v4, %v4263_v4  ;;  %v4174_v11 = vld [vmem:[#allocation2 + $0xe8] sm:$0xff] }
 0x22f   : > { %4235 = vst.msk [vmem:[#allocation2 + $0xd0] sm:$0xff] %vm574_vm3, %v4203_v32  ;;  %v4206_v42 = vadd.f32 %v5794_v57, %v4174_v11  ;;  %v4449_v44 = vsel %vm574_vm3, %v4395_v50, 0.0  ;;  %v4371_v11 = vld [vmem:[%s7316_s4] sm:$0xff] }
 0x230   : > { %v4350_v12 = vadd.f32 %v4349_v40, %v4348_v43  ;;  %v4446_v7 = vadd.f32 %v4445_v33, %v4444_v39  ;;  %v4447_v0 = vsel %vm574_vm3, %v4394_v34, 0.0  ;;  %v4173_v41 = vld [vmem:[#allocation2 + $0xe0] sm:$0xff] }
 0x231   : > { %v4266_v36 = vld [vmem:[#allocation2 + $0xc8] sm:$0xff]  ;;  %4238 = vst.msk [vmem:[#allocation2 + $0xe8] sm:$0xff] %vm574_vm3, %v4206_v42  ;;  %v4205_v38 = vadd.f32 %v4173_v41, %v4126_v17  ;;  %v4305_v33 = vld [vmem:[%s7315_s3] sm:$0xff] }
 0x232   : > { %v4448_v52 = vadd.f32 %v4447_v0, %v4446_v7  ;;  %4298 = vst.msk [vmem:[%s5943_s12 + $0xc8] sm:$0xff] %vm574_vm3, %v4266_v36  ;;  %v4352_v35 = vadd.f32 %v4351_v54, %v4350_v12  ;;  %v4265_v2 = vld [vmem:[#allocation2 + $0xc0] sm:$0xff]  ;;  %v4176_v45 = vld [vmem:[#allocation2 + $0xf8] sm:$0xff]  ;;  %v4397_v3 = vmul.f32 %v4266_v36, %v4266_v36  ;;  %v4355_v53 = vsel %vm574_vm3, %v4266_v36, 0.0 }
 0x233   : > { %4297 = vst.msk [vmem:[%s5943_s12 + $0xc0] sm:$0xff] %vm574_vm3, %v4265_v2  ;;  %v4353_v5 = vsel %vm574_vm3, %v4265_v2, 0.0  ;;  %v4396_v37 = vmul.f32 %v4265_v2, %v4265_v2  ;;  %4237 = vst.msk [vmem:[#allocation2 + $0xe0] sm:$0xff] %vm574_vm3, %v4205_v38  ;;  %v4208_v60 = vadd.f32 %v5797_v27, %v4176_v45 }
 0x234   : > { %v4450_v49 = vadd.f32 %v4449_v44, %v4448_v52  ;;  %v4354_v51 = vadd.f32 %v4353_v5, %v4352_v35  ;;  %v4268_v56 = vld [vmem:[#allocation2 + $0xd8] sm:$0xff]  ;;  %v4175_v58 = vld [vmem:[#allocation2 + $0xf0] sm:$0xff]  ;;  %v4453_v16 = vsel %vm574_vm3, %v4397_v3, 0.0 }
 0x235   : > { %v4451_v55 = vsel %vm574_vm3, %v4396_v37, 0.0  ;;  %4300 = vst.msk [vmem:[%s5943_s12 + $0xd8] sm:$0xff] %vm574_vm3, %v4268_v56  ;;  %v4207_v62 = vadd.f32 %v4175_v58, %v4136_v29  ;;  %4240 = vst.msk [vmem:[#allocation2 + $0xf8] sm:$0xff] %vm574_vm3, %v4208_v60  ;;  %v4399_v46 = vmul.f32 %v4268_v56, %v4268_v56  ;;  %v4359_v9 = vsel %vm574_vm3, %v4268_v56, 0.0 }
 0x236   : > { %v4452_v14 = vadd.f32 %v4451_v55, %v4450_v49  ;;  %v4267_v57 = vld [vmem:[#allocation2 + $0xd0] sm:$0xff]  ;;  %v4356_v59 = vadd.f32 %v4355_v53, %v4354_v51 }
 0x237   : > { %4299 = vst.msk [vmem:[%s5943_s12 + $0xd0] sm:$0xff] %vm574_vm3, %v4267_v57  ;;  %v4357_v61 = vsel %vm574_vm3, %v4267_v57, 0.0  ;;  %v4398_v63 = vmul.f32 %v4267_v57, %v4267_v57  ;;  %4239 = vst.msk [vmem:[#allocation2 + $0xf0] sm:$0xff] %vm574_vm3, %v4207_v62  ;;  %v4457_v13 = vsel %vm574_vm3, %v4399_v46, 0.0 }
 0x238   : > { %v4358_v17 = vadd.f32 %v4357_v61, %v4356_v59  ;;  %v4454_v19 = vadd.f32 %v4453_v16, %v4452_v14  ;;  %v4270_v22 = vld [vmem:[#allocation2 + $0xe8] sm:$0xff] }
 0x239   : > { %v4455_v1 = vsel %vm574_vm3, %v4398_v63, 0.0  ;;  %4302 = vst.msk [vmem:[%s5943_s12 + $0xe8] sm:$0xff] %vm574_vm3, %v4270_v22  ;;  %v4401_v24 = vmul.f32 %v4270_v22, %v4270_v22  ;;  %v4363_v48 = vsel %vm574_vm3, %v4270_v22, 0.0 }
 0x23a   : > { %v4456_v10 = vadd.f32 %v4455_v1, %v4454_v19  ;;  %v4360_v47 = vadd.f32 %v4359_v9, %v4358_v17  ;;  %v4269_v6 = vld [vmem:[#allocation2 + $0xe0] sm:$0xff] }
 0x23b   : > { %4301 = vst.msk [vmem:[%s5943_s12 + $0xe0] sm:$0xff] %vm574_vm3, %v4269_v6  ;;  %v4361_v26 = vsel %vm574_vm3, %v4269_v6, 0.0  ;;  %v4400_v15 = vmul.f32 %v4269_v6, %v4269_v6  ;;  %v4461_v29 = vsel %vm574_vm3, %v4401_v24, 0.0 }
 0x23c   : > { %v4458_v18 = vadd.f32 %v4457_v13, %v4456_v10  ;;  %v4362_v8 = vadd.f32 %v4361_v26, %v4360_v47  ;;  %v4272_v20 = vld [vmem:[#allocation2 + $0xf8] sm:$0xff] }
 0x23d   : > { %v4459_v23 = vsel %vm574_vm3, %v4400_v15, 0.0  ;;  %4304 = vst.msk [vmem:[%s5943_s12 + $0xf8] sm:$0xff] %vm574_vm3, %v4272_v20  ;;  %v4403_v39 = vmul.f32 %v4272_v20, %v4272_v20  ;;  %v4367_v32 = vsel %vm574_vm3, %v4272_v20, 0.0 }
 0x23e   : > { %v4271_v21 = vld [vmem:[#allocation2 + $0xf0] sm:$0xff]  ;;  %v4460_v27 = vadd.f32 %v4459_v23, %v4458_v18  ;;  %v4364_v30 = vadd.f32 %v4363_v48, %v4362_v8 }
 0x23f   : > { %4303 = vst.msk [vmem:[%s5943_s12 + $0xf0] sm:$0xff] %vm574_vm3, %v4271_v21  ;;  %v4365_v28 = vsel %vm574_vm3, %v4271_v21, 0.0  ;;  %v4402_v25 = vmul.f32 %v4271_v21, %v4271_v21  ;;  %v4465_v34 = vsel %vm574_vm3, %v4403_v39, 0.0 }
 0x240   : > { %v4366_v31 = vadd.f32 %v4365_v28, %v4364_v30  ;;  %v4462_v4 = vadd.f32 %v4461_v29, %v4460_v27 }
 0x241   : > { %v4463_v43 = vsel %vm574_vm3, %v4402_v25, 0.0 }
 0x242   : > { %v4368_v50 = vadd.f32 %v4367_v32, %v4366_v31  ;;  %v4464_v40 = vadd.f32 %v4463_v43, %v4462_v4 }
 0x244   : > { %v4369_v12 = vadd.f32 %v4368_v50, %v4305_v33  ;;  %v4466_v7 = vadd.f32 %v4465_v34, %v4464_v40 }
 0x246   : > { %4370 = vst.msk [vmem:[%s7315_s3] sm:$0xff] %vm574_vm3, %v4369_v12  ;;  %v4467_v42 = vadd.f32 %v4466_v7, %v4371_v11 }
 0x248   : > { %4468 = vst.msk [vmem:[%s7316_s4] sm:$0xff] %vm574_vm3, %v4467_v42 }
 0x249 PF: > { %s16_s15 = sadd.s32 1, %s5861_s15  }
 0x24a   : > { %p13_p4 = scmp.ge.s32.totalorder %s16_s15, 4  }
 0x24c   :  { %15 = sbr.rel (!%p13_p4) target bundleno = 1 (0x1), region = 93 }
 0x253   :  { %4502 = vsyncpa [#allocation4], 1 }
 0x254   :  { %4504 = vsyncpa [#allocation4 + $0x1], 1 }

</bundles_post_ra>
